<compile_context>
chip_gen: v5e
topology: v5e:2x2
jax: 0.10.0
libtpu: 0.0.40
codegen_flags: <defaults>
</compile_context>

<pallas_src>
import numpy as np
import jax
import jax.numpy as jnp
from jax.experimental import pallas as pl
from jax.experimental.pallas import tpu as pltpu


# ---------------------------------------------------------------------------
# Kernel
# ---------------------------------------------------------------------------
def _make_kernel(batch, height, blk1, blk2):
    f32 = jnp.float32
    h1 = height
    h2 = height // 4
    inv_n1 = 1.0 / float(batch * h1 * 3)   # BN1: B*H*W elements / channel (W=3)
    inv_n2 = 1.0 / float(batch * h2 * 2)   # BN2: W=2
    eps = 1e-5

    def shifted_stack(y, hcur):
        # Stack y shifted by h-1 / h / h+1 along sublanes (kh = 0,1,2).
        # y always has a row count that is a multiple of 8, so every concat
        # piece is tile-aligned.  Masks are built once per layer.
        L = y.shape[1]
        col = jax.lax.broadcasted_iota(jnp.int32, y.shape, 1)
        hpos = jnp.bitwise_and(col, hcur - 1)                 # hcur is 2^k
        z_m1 = jnp.where(hpos >= 1,
                         pltpu.roll(y, shift=1, axis=1), 0.0)        # y[h-1]
        z_p1 = jnp.where(hpos <= hcur - 2,
                         pltpu.roll(y, shift=L - 1, axis=1), 0.0)    # y[h+1]
        return jnp.concatenate([z_m1, y, z_p1], axis=0)

    def conv_bn_relu(y, a_ref, b_ref, g_ref, be_ref, hcur, c, w, inv_n):
        # conv3x3 as a single fused MXU matmul over the stacked shifts.
        z = shifted_stack(y, hcur)                                   # (3*rin, L)
        o = jnp.dot(a_ref[...], z, preferred_element_type=f32) + b_ref[...]
        # BatchNorm2d (training-mode batch stats).  Channel of row r is r % c,
        # so per-channel sums are sums of aligned c-row sublane slices.
        rs = jnp.sum(o, axis=1, keepdims=True)                       # (w*c, 1)
        cs = rs[0:c]
        for wi in range(1, w):
            cs = cs + rs[wi * c:(wi + 1) * c]
        mean = jnp.concatenate([cs * inv_n] * w, axis=0)             # (w*c, 1)
        d = o - mean
        sq = jnp.sum(d * d, axis=1, keepdims=True)
        cv = sq[0:c]
        for wi in range(1, w):
            cv = cv + sq[wi * c:(wi + 1) * c]
        var = jnp.concatenate([cv * inv_n] * w, axis=0)              # biased var
        yhat = d * jax.lax.rsqrt(var + eps)
        return jnp.maximum(yhat * g_ref[...] + be_ref[...], 0.0)

    def pool_h(yw, sel_ref, blk):
        # MaxPool along H: window 4, stride 4.  The lane rolls wrap across the
        # whole tile, but every *kept* column l = 4*j only reads l..l+3, which
        # stay inside the same batch segment (H % 4 == 0), so wrapped data is
        # never selected.  Decimation uses a fixed (blk, blk//4) 0/1 matmul
        # per 512-lane block (batch-size independent).
        L = yw.shape[1]
        m4 = yw
        for dd in (1, 2, 3):
            m4 = jnp.maximum(m4, pltpu.roll(yw, shift=L - dd, axis=1))
        nb = L // blk
        outs = [jnp.dot(m4[:, k * blk:(k + 1) * blk], sel_ref[...],
                        preferred_element_type=f32) for k in range(nb)]
        return outs[0] if nb == 1 else jnp.concatenate(outs, axis=1)

    def kernel(x_ref, a1_ref, b1_ref, g1_ref, be1_ref,
               a2_ref, b2_ref, g2_ref, be2_ref,
               sel1_ref, sel2_ref, out_ref):
        # layer 1: conv(1->8)+BN+ReLU; output rows = w*8 + c, w in {0,1,2}
        y = conv_bn_relu(x_ref[...], a1_ref, b1_ref, g1_ref, be1_ref,
                         hcur=h1, c=8, w=3, inv_n=inv_n1)            # (24, B*H)
        # pool1 over W (kernel 2, stride 1): rows -> wp*8 + c, wp in {0,1}
        yw = jnp.maximum(y[0:16, :], y[8:24, :])                     # (16, B*H)
        y = pool_h(yw, sel1_ref, blk1)                               # (16, B*H/4)
        # layer 2: conv(8->16)+BN+ReLU; output rows = w*16 + c, w in {0,1}
        y = conv_bn_relu(y, a2_ref, b2_ref, g2_ref, be2_ref,
                         hcur=h2, c=16, w=2, inv_n=inv_n2)           # (32, B*H/4)
        # pool2 over W (2 -> 1): rows -> channel c
        yw = jnp.maximum(y[0:16, :], y[16:32, :])                    # (16, B*H/4)
        out_ref[...] = pool_h(yw, sel2_ref, blk2)                    # (16, B*H/16)

    return kernel


# ---------------------------------------------------------------------------
# Parameter packing (runs ONCE per parameter set in the factory below).
# ---------------------------------------------------------------------------
def _pack_conv(w, bias, cin, win, cout, wout, rin=None):
    """Pack a 3x3 conv into a single (cout*wout, 3*rin) matmul operand.

    Output rows are w-major (r_out = w_o*cout + co); columns are kh-major then
    input rows r_in = w_i*cin + ci, zero-padded up to `rin` rows per kh."""
    w = np.asarray(w, np.float32)
    bias = np.asarray(bias, np.float32)
    if rin is None:
        rin = cin * win
    a = np.zeros((cout * wout, 3 * rin), np.float32)
    for kh in range(3):
        for wo in range(wout):
            for wi in range(win):
                kw = wi - wo + 1
                if not 0 <= kw < 3:
                    continue
                for co in range(cout):
                    for ci in range(cin):
                        a[wo * cout + co, kh * rin + wi * cin + ci] = w[co, ci, kh, kw]
    brows = np.tile(bias, wout)[:, None]
    return a, brows


def _rows(v, wout):
    # per-row (w-major) copy of a per-channel vector -> (wout*C, 1)
    return np.tile(np.asarray(v, np.float32), wout)[:, None]


def _pack_hsel(blk):
    # 0/1 matrix keeping every 4th lane of a `blk`-lane block (batch-indep.)
    s = np.zeros((blk, blk // 4), np.float32)
    s[np.arange(0, blk, 4), np.arange(blk // 4)] = 1.0
    return s


# ---------------------------------------------------------------------------
# Factory: pack once, return a jitted forward(x)
# ---------------------------------------------------------------------------
def make_cnn_reducer(params, batch_size, height=1024):
    w1, b1, g1, be1, w2, b2, g2, be2 = params
    B, H = int(batch_size), int(height)
    assert H % 16 == 0 and (H & (H - 1)) == 0, "H must be a power of two >= 16"
    H2, Hout = H // 4, H // 16
    L1, L2 = B * H, B * H2
    blk1 = 512 if L1 % 512 == 0 else L1
    blk2 = 512 if L2 % 512 == 0 else L2

    a1, b1r = _pack_conv(w1, b1, cin=1, win=3, cout=8, wout=3, rin=8)
    a2, b2r = _pack_conv(w2, b2, cin=8, win=2, cout=16, wout=2)
    consts = tuple(jnp.asarray(c) for c in (
        a1, b1r, _rows(g1, 3), _rows(be1, 3),
        a2, b2r, _rows(g2, 2), _rows(be2, 2),
        _pack_hsel(blk1), _pack_hsel(blk2)))

    kernel = _make_kernel(B, H, blk1, blk2)

    def _full(shape):
        return pl.BlockSpec(shape, lambda i: (0,) * len(shape))

    pcall = pl.pallas_call(
        kernel,
        out_shape=jax.ShapeDtypeStruct((16, B * Hout), jnp.float32),
        grid=(1,),
        in_specs=[_full((8, L1))] + [_full(c.shape) for c in consts],
        out_specs=_full((16, B * Hout)),
        compiler_params=pltpu.CompilerParams(
            dimension_semantics=("arbitrary",),
            vmem_limit_bytes=16 * 1024 * 1024),
    )

    @jax.jit
    def forward(x):
        # NCHW (B, 1, H, 3) -> (8, B*H): rows 0..2 hold w = 0..2, rows 3..7 are
        # zero padding so every in-kernel sublane concat stays 8-aligned.
        x2 = jnp.transpose(x, (1, 3, 0, 2)).reshape(3, L1).astype(jnp.float32)
        x8 = jnp.concatenate([x2, jnp.zeros((5, L1), jnp.float32)], axis=0)
        out2d = pcall(x8, *consts)
        # (C=16, B*Hout) -> (B, C*Hout), matching torch's x.view(-1, 1024)
        return jnp.transpose(out2d.reshape(16, B, Hout), (1, 0, 2)).reshape(B, 16 * Hout)

    return forward


# ---------------------------------------------------------------------------
# Pure-JAX reference (for in-script validation only)
# ---------------------------------------------------------------------------
def reference_forward(x, params):
    w1, b1, g1, be1, w2, b2, g2, be2 = params
    prec = jax.lax.Precision.HIGHEST

    def conv(y, w, b):
        out = jax.lax.conv_general_dilated(
            y, w, window_strides=(1, 1), padding=((1, 1), (1, 1)),
            dimension_numbers=("NCHW", "OIHW", "NCHW"), precision=prec)
        return out + b[None, :, None, None]

    def bn_relu(y, g, be, eps=1e-5):
        mean = jnp.mean(y, axis=(0, 2, 3), keepdims=True)
        var = jnp.mean((y - mean) ** 2, axis=(0, 2, 3), keepdims=True)
        yhat = (y - mean) / jnp.sqrt(var + eps)
        return jnp.maximum(yhat * g[None, :, None, None] + be[None, :, None, None], 0.0)

    def maxpool(y):
        return jax.lax.reduce_window(y, -jnp.inf, jax.lax.max,
                                     (1, 1, 4, 2), (1, 1, 4, 1), "VALID")

    y = maxpool(bn_relu(conv(x, w1, b1), g1, be1))
    y = maxpool(bn_relu(conv(y, w2, b2), g2, be2))
    return y.reshape(-1, 1024)


if __name__ == "__main__":
    key = jax.random.PRNGKey(0)
    kx, k1, k2, k3, k4 = jax.random.split(key, 5)

    B, H, W = 2, 1024, 3
    x = jax.random.normal(kx, (B, 1, H, W), jnp.float32)   # ELMo-style input

    # Deterministic parameter init (Conv2d uniform ~ PyTorch default scale;
    # BatchNorm: gamma=1, beta=0).
    bound1 = 1.0 / np.sqrt(1 * 3 * 3)
    w1 = jax.random.uniform(k1, (8, 1, 3, 3), jnp.float32, -bound1, bound1)
    b1 = jax.random.uniform(k2, (8,), jnp.float32, -bound1, bound1)
    bound2 = 1.0 / np.sqrt(8 * 3 * 3)
    w2 = jax.random.uniform(k3, (16, 8, 3, 3), jnp.float32, -bound2, bound2)
    b2 = jax.random.uniform(k4, (16,), jnp.float32, -bound2, bound2)
    g1, be1 = jnp.ones((8,), jnp.float32), jnp.zeros((8,), jnp.float32)
    g2, be2 = jnp.ones((16,), jnp.float32), jnp.zeros((16,), jnp.float32)
    params = (w1, b1, g1, be1, w2, b2, g2, be2)

    forward = make_cnn_reducer(params, batch_size=B, height=H)
    out = jax.block_until_ready(forward(x))
    assert out.shape == (B, 1024), out.shape

    ref = reference_forward(x, params)
    np.testing.assert_allclose(np.asarray(out), np.asarray(ref), rtol=1e-2, atol=1e-2)

    print("KERNEL_OK")
</pallas_src>

<mosaic_0001>
module attributes {stable_mosaic.version = 11 : i64} {
  func.func @kernel(%arg0: i32, %arg1: memref<8x2048xf32, #tpu.memory_space<vmem>>, %arg2: memref<24x24xf32, #tpu.memory_space<vmem>>, %arg3: memref<24x1xf32, #tpu.memory_space<vmem>>, %arg4: memref<24x1xf32, #tpu.memory_space<vmem>>, %arg5: memref<24x1xf32, #tpu.memory_space<vmem>>, %arg6: memref<32x48xf32, #tpu.memory_space<vmem>>, %arg7: memref<32x1xf32, #tpu.memory_space<vmem>>, %arg8: memref<32x1xf32, #tpu.memory_space<vmem>>, %arg9: memref<32x1xf32, #tpu.memory_space<vmem>>, %arg10: memref<512x128xf32, #tpu.memory_space<vmem>>, %arg11: memref<512x128xf32, #tpu.memory_space<vmem>>, %arg12: memref<16x128xf32, #tpu.memory_space<vmem>>) attributes {dimension_semantics = [#tpu.dimension_semantics<arbitrary>], iteration_bounds = array<i64: 1>, scalar_prefetch = 0 : i64, scratch_operands = 0 : i64, tpu.core_type = #tpu.core_type<tc>, window_params = [{pipeline_mode = #tpu.pipeline_mode<synchronous>, transform_indices = @transform_0, window_bounds = array<i64: 8, 2048>}, {pipeline_mode = #tpu.pipeline_mode<synchronous>, transform_indices = @transform_1, window_bounds = array<i64: 24, 24>}, {pipeline_mode = #tpu.pipeline_mode<synchronous>, transform_indices = @transform_2, window_bounds = array<i64: 24, 1>}, {pipeline_mode = #tpu.pipeline_mode<synchronous>, transform_indices = @transform_3, window_bounds = array<i64: 24, 1>}, {pipeline_mode = #tpu.pipeline_mode<synchronous>, transform_indices = @transform_4, window_bounds = array<i64: 24, 1>}, {pipeline_mode = #tpu.pipeline_mode<synchronous>, transform_indices = @transform_5, window_bounds = array<i64: 32, 48>}, {pipeline_mode = #tpu.pipeline_mode<synchronous>, transform_indices = @transform_6, window_bounds = array<i64: 32, 1>}, {pipeline_mode = #tpu.pipeline_mode<synchronous>, transform_indices = @transform_7, window_bounds = array<i64: 32, 1>}, {pipeline_mode = #tpu.pipeline_mode<synchronous>, transform_indices = @transform_8, window_bounds = array<i64: 32, 1>}, {pipeline_mode = #tpu.pipeline_mode<synchronous>, transform_indices = @transform_9, window_bounds = array<i64: 512, 128>}, {pipeline_mode = #tpu.pipeline_mode<synchronous>, transform_indices = @transform_10, window_bounds = array<i64: 512, 128>}, {pipeline_mode = #tpu.pipeline_mode<synchronous>, transform_indices = @transform_11, window_bounds = array<i64: 16, 128>}]} {
    %c0 = arith.constant 0 : index
    %c0_0 = arith.constant 0 : index
    %0 = vector.load %arg1[%c0, %c0_0] : memref<8x2048xf32, #tpu.memory_space<vmem>>, vector<8x2048xf32>
    %1 = tpu.iota {dimensions = array<i32: 1>} : vector<8x2048xi32>
    %c1023_i32 = arith.constant 1023 : i32
    %2 = vector.broadcast %c1023_i32 : i32 to vector<8x2048xi32>
    %3 = arith.andi %1, %2 : vector<8x2048xi32>
    %c1_i32 = arith.constant 1 : i32
    %4 = vector.broadcast %c1_i32 : i32 to vector<8x2048xi32>
    %5 = arith.cmpi sge, %3, %4 : vector<8x2048xi32>
    %c1_i32_1 = arith.constant 1 : i32
    %6 = tpu.dynamic_rotate %0 by %c1_i32_1 dim 1 : vector<8x2048xf32>, i32 -> vector<8x2048xf32>
    %cst = arith.constant 0.000000e+00 : f32
    %7 = vector.broadcast %cst : f32 to vector<8x2048xf32>
    %8 = arith.select %5, %6, %7 : vector<8x2048xi1>, vector<8x2048xf32>
    %c1022_i32 = arith.constant 1022 : i32
    %9 = vector.broadcast %c1022_i32 : i32 to vector<8x2048xi32>
    %10 = arith.cmpi sle, %3, %9 : vector<8x2048xi32>
    %c2047_i32 = arith.constant 2047 : i32
    %11 = tpu.dynamic_rotate %0 by %c2047_i32 dim 1 : vector<8x2048xf32>, i32 -> vector<8x2048xf32>
    %cst_2 = arith.constant 0.000000e+00 : f32
    %12 = vector.broadcast %cst_2 : f32 to vector<8x2048xf32>
    %13 = arith.select %10, %11, %12 : vector<8x2048xi1>, vector<8x2048xf32>
    %14 = tpu.concatenate %8, %0, %13 in 0 : vector<8x2048xf32>, vector<8x2048xf32>, vector<8x2048xf32> -> vector<24x2048xf32>
    %c0_3 = arith.constant 0 : index
    %c0_4 = arith.constant 0 : index
    %15 = vector.load %arg2[%c0_3, %c0_4] : memref<24x24xf32, #tpu.memory_space<vmem>>, vector<24x24xf32>
    %cst_5 = arith.constant dense<0.000000e+00> : vector<24x2048xf32>
    %16 = tpu.matmul %15, %14, %cst_5 {dimension_numbers = #tpu.dot_dimension_numbers<[1], [0], [0], [1], [0, 0, 1, 1], [], []>} : vector<24x24xf32>, vector<24x2048xf32>, vector<24x2048xf32> -> vector<24x2048xf32>
    %c0_6 = arith.constant 0 : index
    %c0_7 = arith.constant 0 : index
    %17 = vector.load %arg3[%c0_6, %c0_7] : memref<24x1xf32, #tpu.memory_space<vmem>>, vector<24x1xf32>
    %18 = vector.broadcast %17 : vector<24x1xf32> to vector<24x2048xf32>
    %19 = arith.addf %16, %18 : vector<24x2048xf32>
    %cst_8 = arith.constant dense<0.000000e+00> : vector<24xf32>
    %20 = vector.multi_reduction <add>, %19, %cst_8 [1] : vector<24x2048xf32> to vector<24xf32>
    %21 = vector.shape_cast %20 : vector<24xf32> to vector<24x1xf32>
    %22 = vector.extract_strided_slice %21 {offsets = [0, 0], sizes = [8, 1], strides = [1, 1]} : vector<24x1xf32> to vector<8x1xf32>
    %23 = vector.extract_strided_slice %21 {offsets = [8, 0], sizes = [8, 1], strides = [1, 1]} : vector<24x1xf32> to vector<8x1xf32>
    %24 = arith.addf %22, %23 : vector<8x1xf32>
    %25 = vector.extract_strided_slice %21 {offsets = [16, 0], sizes = [8, 1], strides = [1, 1]} : vector<24x1xf32> to vector<8x1xf32>
    %26 = arith.addf %24, %25 : vector<8x1xf32>
    %cst_9 = arith.constant 1.62760422E-4 : f32
    %27 = vector.broadcast %cst_9 : f32 to vector<8x1xf32>
    %28 = arith.mulf %26, %27 : vector<8x1xf32>
    %29 = tpu.concatenate %28, %28, %28 in 0 : vector<8x1xf32>, vector<8x1xf32>, vector<8x1xf32> -> vector<24x1xf32>
    %30 = vector.broadcast %29 : vector<24x1xf32> to vector<24x2048xf32>
    %31 = arith.subf %19, %30 : vector<24x2048xf32>
    %32 = arith.mulf %31, %31 : vector<24x2048xf32>
    %cst_10 = arith.constant dense<0.000000e+00> : vector<24xf32>
    %33 = vector.multi_reduction <add>, %32, %cst_10 [1] : vector<24x2048xf32> to vector<24xf32>
    %34 = vector.shape_cast %33 : vector<24xf32> to vector<24x1xf32>
    %35 = vector.extract_strided_slice %34 {offsets = [0, 0], sizes = [8, 1], strides = [1, 1]} : vector<24x1xf32> to vector<8x1xf32>
    %36 = vector.extract_strided_slice %34 {offsets = [8, 0], sizes = [8, 1], strides = [1, 1]} : vector<24x1xf32> to vector<8x1xf32>
    %37 = arith.addf %35, %36 : vector<8x1xf32>
    %38 = vector.extract_strided_slice %34 {offsets = [16, 0], sizes = [8, 1], strides = [1, 1]} : vector<24x1xf32> to vector<8x1xf32>
    %39 = arith.addf %37, %38 : vector<8x1xf32>
    %cst_11 = arith.constant 1.62760422E-4 : f32
    %40 = vector.broadcast %cst_11 : f32 to vector<8x1xf32>
    %41 = arith.mulf %39, %40 : vector<8x1xf32>
    %42 = tpu.concatenate %41, %41, %41 in 0 : vector<8x1xf32>, vector<8x1xf32>, vector<8x1xf32> -> vector<24x1xf32>
    %cst_12 = arith.constant 9.99999974E-6 : f32
    %43 = vector.broadcast %cst_12 : f32 to vector<24x1xf32>
    %44 = arith.addf %42, %43 : vector<24x1xf32>
    %45 = math.rsqrt %44 : vector<24x1xf32>
    %46 = vector.broadcast %45 : vector<24x1xf32> to vector<24x2048xf32>
    %47 = arith.mulf %31, %46 : vector<24x2048xf32>
    %c0_13 = arith.constant 0 : index
    %c0_14 = arith.constant 0 : index
    %48 = vector.load %arg4[%c0_13, %c0_14] : memref<24x1xf32, #tpu.memory_space<vmem>>, vector<24x1xf32>
    %49 = vector.broadcast %48 : vector<24x1xf32> to vector<24x2048xf32>
    %50 = arith.mulf %47, %49 : vector<24x2048xf32>
    %c0_15 = arith.constant 0 : index
    %c0_16 = arith.constant 0 : index
    %51 = vector.load %arg5[%c0_15, %c0_16] : memref<24x1xf32, #tpu.memory_space<vmem>>, vector<24x1xf32>
    %52 = vector.broadcast %51 : vector<24x1xf32> to vector<24x2048xf32>
    %53 = arith.addf %50, %52 : vector<24x2048xf32>
    %cst_17 = arith.constant 0.000000e+00 : f32
    %54 = vector.broadcast %cst_17 : f32 to vector<24x2048xf32>
    %55 = arith.maximumf %53, %54 : vector<24x2048xf32>
    %56 = vector.extract_strided_slice %55 {offsets = [0, 0], sizes = [16, 2048], strides = [1, 1]} : vector<24x2048xf32> to vector<16x2048xf32>
    %57 = vector.extract_strided_slice %55 {offsets = [8, 0], sizes = [16, 2048], strides = [1, 1]} : vector<24x2048xf32> to vector<16x2048xf32>
    %58 = arith.maximumf %56, %57 : vector<16x2048xf32>
    %c2047_i32_18 = arith.constant 2047 : i32
    %59 = tpu.dynamic_rotate %58 by %c2047_i32_18 dim 1 : vector<16x2048xf32>, i32 -> vector<16x2048xf32>
    %60 = arith.maximumf %58, %59 : vector<16x2048xf32>
    %c2046_i32 = arith.constant 2046 : i32
    %61 = tpu.dynamic_rotate %58 by %c2046_i32 dim 1 : vector<16x2048xf32>, i32 -> vector<16x2048xf32>
    %62 = arith.maximumf %60, %61 : vector<16x2048xf32>
    %c2045_i32 = arith.constant 2045 : i32
    %63 = tpu.dynamic_rotate %58 by %c2045_i32 dim 1 : vector<16x2048xf32>, i32 -> vector<16x2048xf32>
    %64 = arith.maximumf %62, %63 : vector<16x2048xf32>
    %65 = vector.extract_strided_slice %64 {offsets = [0, 0], sizes = [16, 512], strides = [1, 1]} : vector<16x2048xf32> to vector<16x512xf32>
    %c0_19 = arith.constant 0 : index
    %c0_20 = arith.constant 0 : index
    %66 = vector.load %arg10[%c0_19, %c0_20] : memref<512x128xf32, #tpu.memory_space<vmem>>, vector<512x128xf32>
    %cst_21 = arith.constant dense<0.000000e+00> : vector<16x128xf32>
    %67 = tpu.matmul %65, %66, %cst_21 {dimension_numbers = #tpu.dot_dimension_numbers<[1], [0], [0], [1], [0, 0, 1, 1], [], []>} : vector<16x512xf32>, vector<512x128xf32>, vector<16x128xf32> -> vector<16x128xf32>
    %68 = vector.extract_strided_slice %64 {offsets = [0, 512], sizes = [16, 512], strides = [1, 1]} : vector<16x2048xf32> to vector<16x512xf32>
    %c0_22 = arith.constant 0 : index
    %c0_23 = arith.constant 0 : index
    %69 = vector.load %arg10[%c0_22, %c0_23] : memref<512x128xf32, #tpu.memory_space<vmem>>, vector<512x128xf32>
    %cst_24 = arith.constant dense<0.000000e+00> : vector<16x128xf32>
    %70 = tpu.matmul %68, %69, %cst_24 {dimension_numbers = #tpu.dot_dimension_numbers<[1], [0], [0], [1], [0, 0, 1, 1], [], []>} : vector<16x512xf32>, vector<512x128xf32>, vector<16x128xf32> -> vector<16x128xf32>
    %71 = vector.extract_strided_slice %64 {offsets = [0, 1024], sizes = [16, 512], strides = [1, 1]} : vector<16x2048xf32> to vector<16x512xf32>
    %c0_25 = arith.constant 0 : index
    %c0_26 = arith.constant 0 : index
    %72 = vector.load %arg10[%c0_25, %c0_26] : memref<512x128xf32, #tpu.memory_space<vmem>>, vector<512x128xf32>
    %cst_27 = arith.constant dense<0.000000e+00> : vector<16x128xf32>
    %73 = tpu.matmul %71, %72, %cst_27 {dimension_numbers = #tpu.dot_dimension_numbers<[1], [0], [0], [1], [0, 0, 1, 1], [], []>} : vector<16x512xf32>, vector<512x128xf32>, vector<16x128xf32> -> vector<16x128xf32>
    %74 = vector.extract_strided_slice %64 {offsets = [0, 1536], sizes = [16, 512], strides = [1, 1]} : vector<16x2048xf32> to vector<16x512xf32>
    %c0_28 = arith.constant 0 : index
    %c0_29 = arith.constant 0 : index
    %75 = vector.load %arg10[%c0_28, %c0_29] : memref<512x128xf32, #tpu.memory_space<vmem>>, vector<512x128xf32>
    %cst_30 = arith.constant dense<0.000000e+00> : vector<16x128xf32>
    %76 = tpu.matmul %74, %75, %cst_30 {dimension_numbers = #tpu.dot_dimension_numbers<[1], [0], [0], [1], [0, 0, 1, 1], [], []>} : vector<16x512xf32>, vector<512x128xf32>, vector<16x128xf32> -> vector<16x128xf32>
    %77 = tpu.concatenate %67, %70, %73, %76 in 1 : vector<16x128xf32>, vector<16x128xf32>, vector<16x128xf32>, vector<16x128xf32> -> vector<16x512xf32>
    %78 = tpu.iota {dimensions = array<i32: 1>} : vector<16x512xi32>
    %c255_i32 = arith.constant 255 : i32
    %79 = vector.broadcast %c255_i32 : i32 to vector<16x512xi32>
    %80 = arith.andi %78, %79 : vector<16x512xi32>
    %c1_i32_31 = arith.constant 1 : i32
    %81 = vector.broadcast %c1_i32_31 : i32 to vector<16x512xi32>
    %82 = arith.cmpi sge, %80, %81 : vector<16x512xi32>
    %c1_i32_32 = arith.constant 1 : i32
    %83 = tpu.dynamic_rotate %77 by %c1_i32_32 dim 1 : vector<16x512xf32>, i32 -> vector<16x512xf32>
    %cst_33 = arith.constant 0.000000e+00 : f32
    %84 = vector.broadcast %cst_33 : f32 to vector<16x512xf32>
    %85 = arith.select %82, %83, %84 : vector<16x512xi1>, vector<16x512xf32>
    %c254_i32 = arith.constant 254 : i32
    %86 = vector.broadcast %c254_i32 : i32 to vector<16x512xi32>
    %87 = arith.cmpi sle, %80, %86 : vector<16x512xi32>
    %c511_i32 = arith.constant 511 : i32
    %88 = tpu.dynamic_rotate %77 by %c511_i32 dim 1 : vector<16x512xf32>, i32 -> vector<16x512xf32>
    %cst_34 = arith.constant 0.000000e+00 : f32
    %89 = vector.broadcast %cst_34 : f32 to vector<16x512xf32>
    %90 = arith.select %87, %88, %89 : vector<16x512xi1>, vector<16x512xf32>
    %91 = tpu.concatenate %85, %77, %90 in 0 : vector<16x512xf32>, vector<16x512xf32>, vector<16x512xf32> -> vector<48x512xf32>
    %c0_35 = arith.constant 0 : index
    %c0_36 = arith.constant 0 : index
    %92 = vector.load %arg6[%c0_35, %c0_36] : memref<32x48xf32, #tpu.memory_space<vmem>>, vector<32x48xf32>
    %cst_37 = arith.constant dense<0.000000e+00> : vector<32x512xf32>
    %93 = tpu.matmul %92, %91, %cst_37 {dimension_numbers = #tpu.dot_dimension_numbers<[1], [0], [0], [1], [0, 0, 1, 1], [], []>} : vector<32x48xf32>, vector<48x512xf32>, vector<32x512xf32> -> vector<32x512xf32>
    %c0_38 = arith.constant 0 : index
    %c0_39 = arith.constant 0 : index
    %94 = vector.load %arg7[%c0_38, %c0_39] : memref<32x1xf32, #tpu.memory_space<vmem>>, vector<32x1xf32>
    %95 = vector.broadcast %94 : vector<32x1xf32> to vector<32x512xf32>
    %96 = arith.addf %93, %95 : vector<32x512xf32>
    %cst_40 = arith.constant dense<0.000000e+00> : vector<32xf32>
    %97 = vector.multi_reduction <add>, %96, %cst_40 [1] : vector<32x512xf32> to vector<32xf32>
    %98 = vector.shape_cast %97 : vector<32xf32> to vector<32x1xf32>
    %99 = vector.extract_strided_slice %98 {offsets = [0, 0], sizes = [16, 1], strides = [1, 1]} : vector<32x1xf32> to vector<16x1xf32>
    %100 = vector.extract_strided_slice %98 {offsets = [16, 0], sizes = [16, 1], strides = [1, 1]} : vector<32x1xf32> to vector<16x1xf32>
    %101 = arith.addf %99, %100 : vector<16x1xf32>
    %cst_41 = arith.constant 9.765625E-4 : f32
    %102 = vector.broadcast %cst_41 : f32 to vector<16x1xf32>
    %103 = arith.mulf %101, %102 : vector<16x1xf32>
    %104 = tpu.concatenate %103, %103 in 0 : vector<16x1xf32>, vector<16x1xf32> -> vector<32x1xf32>
    %105 = vector.broadcast %104 : vector<32x1xf32> to vector<32x512xf32>
    %106 = arith.subf %96, %105 : vector<32x512xf32>
    %107 = arith.mulf %106, %106 : vector<32x512xf32>
    %cst_42 = arith.constant dense<0.000000e+00> : vector<32xf32>
    %108 = vector.multi_reduction <add>, %107, %cst_42 [1] : vector<32x512xf32> to vector<32xf32>
    %109 = vector.shape_cast %108 : vector<32xf32> to vector<32x1xf32>
    %110 = vector.extract_strided_slice %109 {offsets = [0, 0], sizes = [16, 1], strides = [1, 1]} : vector<32x1xf32> to vector<16x1xf32>
    %111 = vector.extract_strided_slice %109 {offsets = [16, 0], sizes = [16, 1], strides = [1, 1]} : vector<32x1xf32> to vector<16x1xf32>
    %112 = arith.addf %110, %111 : vector<16x1xf32>
    %cst_43 = arith.constant 9.765625E-4 : f32
    %113 = vector.broadcast %cst_43 : f32 to vector<16x1xf32>
    %114 = arith.mulf %112, %113 : vector<16x1xf32>
    %115 = tpu.concatenate %114, %114 in 0 : vector<16x1xf32>, vector<16x1xf32> -> vector<32x1xf32>
    %cst_44 = arith.constant 9.99999974E-6 : f32
    %116 = vector.broadcast %cst_44 : f32 to vector<32x1xf32>
    %117 = arith.addf %115, %116 : vector<32x1xf32>
    %118 = math.rsqrt %117 : vector<32x1xf32>
    %119 = vector.broadcast %118 : vector<32x1xf32> to vector<32x512xf32>
    %120 = arith.mulf %106, %119 : vector<32x512xf32>
    %c0_45 = arith.constant 0 : index
    %c0_46 = arith.constant 0 : index
    %121 = vector.load %arg8[%c0_45, %c0_46] : memref<32x1xf32, #tpu.memory_space<vmem>>, vector<32x1xf32>
    %122 = vector.broadcast %121 : vector<32x1xf32> to vector<32x512xf32>
    %123 = arith.mulf %120, %122 : vector<32x512xf32>
    %c0_47 = arith.constant 0 : index
    %c0_48 = arith.constant 0 : index
    %124 = vector.load %arg9[%c0_47, %c0_48] : memref<32x1xf32, #tpu.memory_space<vmem>>, vector<32x1xf32>
    %125 = vector.broadcast %124 : vector<32x1xf32> to vector<32x512xf32>
    %126 = arith.addf %123, %125 : vector<32x512xf32>
    %cst_49 = arith.constant 0.000000e+00 : f32
    %127 = vector.broadcast %cst_49 : f32 to vector<32x512xf32>
    %128 = arith.maximumf %126, %127 : vector<32x512xf32>
    %129 = vector.extract_strided_slice %128 {offsets = [0, 0], sizes = [16, 512], strides = [1, 1]} : vector<32x512xf32> to vector<16x512xf32>
    %130 = vector.extract_strided_slice %128 {offsets = [16, 0], sizes = [16, 512], strides = [1, 1]} : vector<32x512xf32> to vector<16x512xf32>
    %131 = arith.maximumf %129, %130 : vector<16x512xf32>
    %c511_i32_50 = arith.constant 511 : i32
    %132 = tpu.dynamic_rotate %131 by %c511_i32_50 dim 1 : vector<16x512xf32>, i32 -> vector<16x512xf32>
    %133 = arith.maximumf %131, %132 : vector<16x512xf32>
    %c510_i32 = arith.constant 510 : i32
    %134 = tpu.dynamic_rotate %131 by %c510_i32 dim 1 : vector<16x512xf32>, i32 -> vector<16x512xf32>
    %135 = arith.maximumf %133, %134 : vector<16x512xf32>
    %c509_i32 = arith.constant 509 : i32
    %136 = tpu.dynamic_rotate %131 by %c509_i32 dim 1 : vector<16x512xf32>, i32 -> vector<16x512xf32>
    %137 = arith.maximumf %135, %136 : vector<16x512xf32>
    %c0_51 = arith.constant 0 : index
    %c0_52 = arith.constant 0 : index
    %138 = vector.load %arg11[%c0_51, %c0_52] : memref<512x128xf32, #tpu.memory_space<vmem>>, vector<512x128xf32>
    %cst_53 = arith.constant dense<0.000000e+00> : vector<16x128xf32>
    %139 = tpu.matmul %137, %138, %cst_53 {dimension_numbers = #tpu.dot_dimension_numbers<[1], [0], [0], [1], [0, 0, 1, 1], [], []>} : vector<16x512xf32>, vector<512x128xf32>, vector<16x128xf32> -> vector<16x128xf32>
    %c0_54 = arith.constant 0 : index
    %c0_55 = arith.constant 0 : index
    %140 = vector.load %arg12[%c0_54, %c0_55] : memref<16x128xf32, #tpu.memory_space<vmem>>, vector<16x128xf32>
    tpu.vector_store %arg12[%c0_54, %c0_55], %139 {strides = array<i32>} : memref<16x128xf32, #tpu.memory_space<vmem>>, vector<16x128xf32>,
    return
  }
  func.func @transform_0(%arg0: i32) -> (i32, i32) {
    %c0_i32 = arith.constant 0 : i32
    %c0_i32_0 = arith.constant 0 : i32
    %c0_i32_1 = arith.constant 0 : i32
    return %c0_i32, %c0_i32_0 : i32, i32
  }
  func.func @transform_1(%arg0: i32) -> (i32, i32) {
    %c0_i32 = arith.constant 0 : i32
    %c0_i32_0 = arith.constant 0 : i32
    %c0_i32_1 = arith.constant 0 : i32
    return %c0_i32, %c0_i32_0 : i32, i32
  }
  func.func @transform_2(%arg0: i32) -> (i32, i32) {
    %c0_i32 = arith.constant 0 : i32
    %c0_i32_0 = arith.constant 0 : i32
    %c0_i32_1 = arith.constant 0 : i32
    return %c0_i32, %c0_i32_0 : i32, i32
  }
  func.func @transform_3(%arg0: i32) -> (i32, i32) {
    %c0_i32 = arith.constant 0 : i32
    %c0_i32_0 = arith.constant 0 : i32
    %c0_i32_1 = arith.constant 0 : i32
    return %c0_i32, %c0_i32_0 : i32, i32
  }
  func.func @transform_4(%arg0: i32) -> (i32, i32) {
    %c0_i32 = arith.constant 0 : i32
    %c0_i32_0 = arith.constant 0 : i32
    %c0_i32_1 = arith.constant 0 : i32
    return %c0_i32, %c0_i32_0 : i32, i32
  }
  func.func @transform_5(%arg0: i32) -> (i32, i32) {
    %c0_i32 = arith.constant 0 : i32
    %c0_i32_0 = arith.constant 0 : i32
    %c0_i32_1 = arith.constant 0 : i32
    return %c0_i32, %c0_i32_0 : i32, i32
  }
  func.func @transform_6(%arg0: i32) -> (i32, i32) {
    %c0_i32 = arith.constant 0 : i32
    %c0_i32_0 = arith.constant 0 : i32
    %c0_i32_1 = arith.constant 0 : i32
    return %c0_i32, %c0_i32_0 : i32, i32
  }
  func.func @transform_7(%arg0: i32) -> (i32, i32) {
    %c0_i32 = arith.constant 0 : i32
    %c0_i32_0 = arith.constant 0 : i32
    %c0_i32_1 = arith.constant 0 : i32
    return %c0_i32, %c0_i32_0 : i32, i32
  }
  func.func @transform_8(%arg0: i32) -> (i32, i32) {
    %c0_i32 = arith.constant 0 : i32
    %c0_i32_0 = arith.constant 0 : i32
    %c0_i32_1 = arith.constant 0 : i32
    return %c0_i32, %c0_i32_0 : i32, i32
  }
  func.func @transform_9(%arg0: i32) -> (i32, i32) {
    %c0_i32 = arith.constant 0 : i32
    %c0_i32_0 = arith.constant 0 : i32
    %c0_i32_1 = arith.constant 0 : i32
    return %c0_i32, %c0_i32_0 : i32, i32
  }
  func.func @transform_10(%arg0: i32) -> (i32, i32) {
    %c0_i32 = arith.constant 0 : i32
    %c0_i32_0 = arith.constant 0 : i32
    %c0_i32_1 = arith.constant 0 : i32
    return %c0_i32, %c0_i32_0 : i32, i32
  }
  func.func @transform_11(%arg0: i32) -> (i32, i32) {
    %c0_i32 = arith.constant 0 : i32
    %c0_i32_0 = arith.constant 0 : i32
    %c0_i32_1 = arith.constant 0 : i32
    return %c0_i32, %c0_i32_0 : i32, i32
  }
}

</mosaic_0001>

<bundles_post_ra>
// kernel: forward.1
= control target key start
LH: loop header
LB: loop body
LE: loop exit
PB: predicated region body
PF: predicated region fallthrough
CT: control target
= control target key end

     0   :  { %16 = vsyncpa [#allocation3], 0  ;;  %s6439_s0 = inlined_call_operand.vmem [shape: f32[8,2048], index: 0, kind: input, shape index: {}]   ;;  %s6440_s1 = inlined_call_operand.hbm [shape: f32[24,24], index: 1, kind: input, shape index: {}]   ;;  %s6441_s2 = inlined_call_operand.hbm [shape: f32[24,1], index: 2, kind: input, shape index: {}]   ;;  %s6442_s3 = inlined_call_operand.vmem [shape: f32[24,1], index: 3, kind: input, shape index: {}]   ;;  %s6443_s4 = inlined_call_operand.vmem [shape: f32[24,1], index: 4, kind: input, shape index: {}]   ;;  %s6444_s5 = inlined_call_operand.hbm [shape: f32[32,48], index: 5, kind: input, shape index: {}]   ;;  %s6445_s6 = inlined_call_operand.hbm [shape: f32[32,1], index: 6, kind: input, shape index: {}]   ;;  %s6446_s7 = inlined_call_operand.vmem [shape: f32[32,1], index: 7, kind: input, shape index: {}]   ;;  %s6447_s8 = inlined_call_operand.vmem [shape: f32[32,1], index: 8, kind: input, shape index: {}]   ;;  %s6448_s9 = inlined_call_operand.vmem [shape: f32[512,128], index: 9, kind: input, shape index: {}, may-alias: {9,10}]   ;;  %s6449_s10 = inlined_call_operand.vmem [shape: f32[512,128], index: 10, kind: input, shape index: {}, may-alias: {9,10}]   ;;  %s6450_s11 = inlined_call_operand.vmem [shape: f32[16,128], index: 11, kind: output, shape index: {}]  }
   0x1   :  { %17 = vsyncpa [#allocation5], 0 }
   0x2   :  { %18 = vsyncpa [#allocation8], 0  ;;  %s38_s19 = sshll.u32 %s6441_s2, 4  ;;  %s3396_s20 = smov [#allocation4]   ;;  %s39_s19 = int_to_ptr.hbm [resolvable:$true] %s38_s19 }
   0x3   :  { %s40_s21 = sshll.u32 %s3396_s20, 4  ;;  %s25_s24 = sshll.u32 %s6440_s1, 4  ;;  %s41_s21 = int_to_ptr.vmem [resolvable:$true] %s40_s21  ;;  %s26_s24 = int_to_ptr.hbm [resolvable:$true] %s25_s24 }
   0x4   :  { %s3397_s25 = smov 128   ;;  %s3398_s26 = smov 8  }
   0x5   :  { %46 = dma.hbm_to_vmem [thread:$0]  %s39_s19, 384, %s41_s21, [#allocation5], %s3397_s25, %s3397_s25, %s3398_s26  }
   0x6   :  { %s3399_s27 = smov [#allocation2]   ;;  %s55_s12 = sshll.u32 %s6444_s5, 4  ;;  %s56_s12 = int_to_ptr.hbm [resolvable:$true] %s55_s12 }
   0x7   :  { %s27_s28 = sshll.u32 %s3399_s27, 4  ;;  %s68_s14 = sshll.u32 %s6445_s6, 4  ;;  %s28_s28 = int_to_ptr.vmem [resolvable:$true] %s27_s28  ;;  %s69_s14 = int_to_ptr.hbm [resolvable:$true] %s68_s14 }
   0x8   :  { %33 = dma.hbm_to_vmem [thread:$0]  %s26_s24, 384, %s28_s28, [#allocation3], %s3397_s25, %s3397_s25, %s3398_s26  }
   0x9   :  { %s3400_s15 = smov [#allocation6]   ;;  %s3401_s1 = smov [#allocation7]  }
   0xa   :  { %s57_s16 = sshll.u32 %s3400_s15, 4  ;;  %s70_s17 = sshll.u32 %s3401_s1, 4  ;;  %s58_s16 = int_to_ptr.vmem [resolvable:$true] %s57_s16  ;;  %s71_s17 = int_to_ptr.vmem [resolvable:$true] %s70_s17 }
   0xb   :  { %63 = dma.hbm_to_vmem [thread:$0]  %s56_s12, 512, %s58_s16, [#allocation5], %s3397_s25, %s3397_s25, %s3398_s26  }
   0xc   :  { %76 = dma.hbm_to_vmem [thread:$0]  %s69_s14, 512, %s71_s17, [#allocation8], %s3397_s25, %s3397_s25, %s3398_s26  }
   0xd   :  { %3390 = dma.done.wait [#allocation3], 384  }
   0xe   :  { %3391 = vsyncadd [#allocation3], 4294966912 }
   0xf   :  { %3392 = dma.done.wait [#allocation5], 896  }
  0x10   :  { %3393 = vsyncadd [#allocation5], 4294966400 }
  0x11   :  { %3394 = dma.done.wait [#allocation8], 512  }
  0x12   :  { %3395 = vsyncadd [#allocation8], 4294966784  ;;  %v3482_v0 = vld [vmem:[%s6439_s0] sm:$0xff]  ;;  %v3487_v1 = vld [vmem:[%s6439_s0 + $0x10] sm:$0xff]  ;;  %s3402_s22 = smov 1   ;;  %s3403_s27 = smov 127   ;;  %v117_v28 = vlaneseq }
  0x13   :  { %v3492_v2 = vld [vmem:[%s6439_s0 + $0x18] sm:$0xff]  ;;  %166 = vrot.lane.b32.xlu2 %v3482_v0, %s3402_s22  ;;  %v3501_v4 = vld [vmem:[%s6439_s0 + $0x8] sm:$0xff]  ;;  %v3506_v5 = vld [vmem:[%s6439_s0 + $0x20] sm:$0xff]  ;;  %v3404_v30 = vmov 0   ;;  %vm333_vm2 = vcmask 195584   ;;  %vm2166_vm15 = vcmask 392192  }
  0x14   :  { %v2885_v3 = vpack.i.bf16 %v3492_v2, %v3487_v1  ;;  %v2890_v6 = vpack.i.bf16 %v3506_v5, %v3501_v4  ;;  %v2895_v7 = vpack.i.bf16 %v3487_v1, %v3501_v4  ;;  %v3522_v8 = vld [vmem:[%s6439_s0 + $0x28] sm:$0xff]  ;;  %v3527_v9 = vld [vmem:[%s6439_s0 + $0x30] sm:$0xff]  ;;  %v3532_v10 = vld [vmem:[%s6439_s0 + $0x38] sm:$0xff]  ;;  %v3615_v29 = vand.u32 127, %v117_v28  ;;  %2935 = vset.pattern.permute.xlu1 %v3404_v30  ;;  %2937 = vset.pattern.permute.xlu0 %v3404_v30 }
  0x15   :  { %v2900_v11 = vpack.i.bf16 %v3522_v8, %v3527_v9  ;;  %v3539_v12 = vld [vmem:[%s6439_s0 + $0x78] sm:$0xff]  ;;  %v2905_v13 = vpack.i.bf16 %v3527_v9, %v3522_v8  ;;  %v3551_v14 = vld [vmem:[%s6439_s0 + $0x40] sm:$0xff]  ;;  %v3558_v15 = vld [vmem:[%s6439_s0 + $0x48] sm:$0xff]  ;;  %2936 = vset.pattern.permute.xlu2 %v3404_v30 }
  0x16   :  { %2886 = vrot.lane.b32.xlu0 %v2885_v3, %s3403_s27  ;;  %2891 = vrot.lane.b32.xlu1 %v2890_v6, %s3403_s27  ;;  %v3563_v16 = vld [vmem:[%s6439_s0 + $0x60] sm:$0xff]  ;;  %v3573_v18 = vld [vmem:[%s6439_s0 + $0x50] sm:$0xff]  ;;  %6552 = vst [vmem:[#allocation12_spill] sm:$0xff] %v3615_v29  ;;  %v315_v31 = vld [vmem:[#allocation4] sm:$0xff]  ;;  %vm279_vm0 = vcmp.lt.s32.totalorder %v3615_v29, 127  ;;  %vm198_vm1 = vcmp.lt.s32.totalorder %v3615_v29, 1 }
  0x17   :  { %v2915_v17 = vpack.i.bf16 %v3563_v16, %v3558_v15  ;;  %v3578_v19 = vld [vmem:[%s6439_s0 + $0x58] sm:$0xff]  ;;  %v2920_v21 = vpack.i.bf16 %v3573_v18, %v3558_v15  ;;  %v3593_v22 = vld [vmem:[%s6439_s0 + $0x68] sm:$0xff]  ;;  %v3598_v23 = vld [vmem:[%s6439_s0 + $0x70] sm:$0xff]  ;;  %v134_v49 = vand.u32 1023, %v3615_v29  ;;  %v125_v53 = vadd.s32 896, %v3615_v29 }
  0x18   :  { %v2910_v20 = vpack.i.bf16 %v3578_v19, %v3573_v18  ;;  %v2930_v24 = vpack.i.bf16 %v3598_v23, %v3593_v22  ;;  %v2925_v25 = vpack.i.bf16 %v3593_v22, %v3598_v23  ;;  %v3635_v48 = vld [vmem:[#allocation2] sm:$0xff]  ;;  %v317_v54 = vld [vmem:[#allocation4 + $0x10] sm:$0xff] }
  0x19   :  { %vm150_vm3 = vcmp.ge.s32.totalorder %v134_v49, 1  ;;  %v3660_v60 = vld [vmem:[#allocation2 + $0x8] sm:$0xff]  ;;  %v141_v61 = vand.u32 1023, %v125_v53 }
  0x1b   :  { %172 = vrot.lane.b32.xlu2 %v3492_v2, %s3402_s22  ;;  %vm238_vm4 = vcmp.le.s32.totalorder %v141_v61, 1022 }
  0x1e   :  { %247 = vrot.lane.b32.xlu0 %v3482_v0, %s3403_s27  ;;  %2896 = vrot.lane.b32.xlu1 %v2895_v7, %s3402_s22 }
  0x23   :  { %261 = vrot.lane.b32.xlu2 %v3532_v10, %s3403_s27 }
  0x26   :  { %196 = vrot.lane.b32.xlu0 %v3539_v12, %s3402_s22  ;;  %2901 = vrot.lane.b32.xlu1 %v2900_v11, %s3403_s27 }
  0x2b   :  { %174 = vrot.lane.b32.xlu2 %v3506_v5, %s3402_s22 }
  0x2e   :  { %263 = vrot.lane.b32.xlu0 %v3551_v14, %s3403_s27  ;;  %2906 = vrot.lane.b32.xlu1 %v2905_v13, %s3402_s22 }
  0x33   :  { %2916 = vrot.lane.b32.xlu2 %v2915_v17, %s3403_s27 }
  0x36   :  { %180 = vrot.lane.b32.xlu0 %v3532_v10, %s3402_s22  ;;  %2911 = vrot.lane.b32.xlu1 %v2910_v20, %s3403_s27 }
  0x3b   :  { %188 = vrot.lane.b32.xlu2 %v3578_v19, %s3402_s22 }
  0x3e   :  { %2921 = vrot.lane.b32.xlu0 %v2920_v21, %s3402_s22  ;;  %182 = vrot.lane.b32.xlu1 %v3551_v14, %s3402_s22 }
  0x43   :  { %2931 = vrot.lane.b32.xlu2 %v2930_v24, %s3402_s22  ;;  %v126_v24 = vadd.s32 1024, %v3615_v29 }
  0x46   :  { %2926 = vrot.lane.b32.xlu0 %v2925_v25, %s3403_s27  ;;  %277 = vrot.lane.b32.xlu1 %v3539_v12, %s3403_s27 }
  0x4e   :  { %190 = vrot.lane.b32.xlu0 %v3563_v16, %s3402_s22  ;;  %320 = vperm.xlu1 %2935, %v315_v31  }
  0x56   :  { %330 = vperm.xlu0 %2937, %v317_v54  }
  0x6d   :  { %v167_v26 = vpop.permute.xlu2 %166 }
  0x75   :  { %v3613_v27 = vpop.permute.xlu2 %172 }
  0x7d   :  { %v3617_v32 = vpop.permute.xlu2 %261 }
  0x85   :  { %v175_v45 = vpop.permute.xlu2 %174 }
  0x86   :  { %v210_v6 = vsel %vm198_vm1, %v3613_v27, %v175_v45 }
  0x88   :  { %v2887_v33 = vpop.permute.xlu0 %2886  ;;  %v2892_v36 = vpop.permute.xlu1 %2891 }
  0x89   :  { %v2889_v34 = vunpack.i.h.bf16 %v2887_v33  ;;  %v2888_v35 = vunpack.i.l.bf16 %v2887_v33  ;;  %v2894_v37 = vunpack.i.h.bf16 %v2892_v36  ;;  %v2893_v38 = vunpack.i.l.bf16 %v2892_v36 }
  0x8b   :  { %v292_v39 = vsel %vm279_vm0, %v2888_v35, %v2889_v34  ;;  %v293_v40 = vsel %vm279_vm0, %v2893_v38, %v2888_v35  ;;  %v291_v41 = vsel %vm279_vm0, %v2889_v34, %v2894_v37  ;;  %v133_v35 = vadd.s32 1920, %v3615_v29 }
  0x8c   :  { %408 = vmatpush.msra.mxu2 %v292_v39  ;;  %382 = vmatpush.msra.mxu1 %v293_v40 }
  0x8d   :  { %434 = vmatpush.msra.mxu3 %v291_v41  ;;  %v3662_v62 = vpop.permute.xlu2 %2916 }
  0x8e   :  { %409 = vmatpush.msra.mxu2 %v3487_v1  ;;  %383 = vmatpush.msra.mxu1 %v3501_v4 }
  0x8f   :  { %435 = vmatpush.msra.mxu3 %v3492_v2  ;;  %v2918_v2 = vunpack.i.l.bf16 %v3662_v62 }
  0x90   :  { %v3629_v42 = vpop.permute.xlu0 %247  ;;  %v2897_v43 = vpop.permute.xlu1 %2896 }
  0x91   :  { %v294_v44 = vsel %vm279_vm0, %v3629_v42, %v2893_v38  ;;  %v2899_v46 = vunpack.i.h.bf16 %v2897_v43  ;;  %v2898_v47 = vunpack.i.l.bf16 %v2897_v43 }
  0x92   :  { %356 = vmatpush.msra.mxu0 %v294_v44 }
  0x93   :  { %v213_v50 = vsel %vm198_vm1, %v167_v26, %v2898_v47  ;;  %v212_v51 = vsel %vm198_vm1, %v2898_v47, %v2899_v46  ;;  %v211_v52 = vsel %vm198_vm1, %v2899_v46, %v3613_v27 }
  0x94   :  { %357 = vmatpush.msra.mxu0 %v3482_v0  ;;  %384 = vmatpush.msra.mxu1 %v213_v50 }
  0x95   :  { %410 = vmatpush.msra.mxu2 %v212_v51  ;;  %436 = vmatpush.msra.mxu3 %v211_v52  ;;  %v189_v33 = vpop.permute.xlu2 %188 }
  0x96   :  { %2802 = vmatmul.msk.f32.vlgmr.msra.gmra.mxu1 %vm333_vm2, %v3635_v48  ;;  %2805 = vmatmul.msk.f32.vlgmr.msra.gmra.mxu2 %vm333_vm2, %v3635_v48 }
  0x97   :  { %2808 = vmatmul.msk.f32.vlgmr.msra.gmra.mxu3 %vm333_vm2, %v3635_v48 }
  0x98   :  { %v3653_v55 = vpop.permute.xlu0 %196  ;;  %v2902_v56 = vpop.permute.xlu1 %2901 }
  0x99   :  { %v214_v57 = vsel %vm198_vm1, %v3653_v55, %v167_v26  ;;  %v2904_v58 = vunpack.i.h.bf16 %v2902_v56  ;;  %v2903_v59 = vunpack.i.l.bf16 %v2902_v56 }
  0x9a   :  { %2798 = vmatpush.msk.msra.mxu0 %vm150_vm3, %v214_v57 }
  0x9b   :  { %2799 = vmatmul.msk.f32.vlgmr.msra.gmra.mxu0 %vm333_vm2, %v3635_v48  ;;  %v290_v63 = vsel %vm279_vm0, %v2894_v37, %v2904_v58  ;;  %v289_v0 = vsel %vm279_vm0, %v2904_v58, %v2903_v59  ;;  %v288_v1 = vsel %vm279_vm0, %v2903_v59, %v3617_v32 }
  0x9c   :  { %460 = vmatpush.msrb.mxu0 %v290_v63  ;;  %486 = vmatpush.msrb.mxu1 %v289_v0 }
  0x9d   :  { %512 = vmatpush.msrb.mxu2 %v288_v1 }
  0x9e   :  { %2803 = vmatmul.msk.f32.gmra.mxu1 %vm333_vm2, %v3660_v60  ;;  %2806 = vmatmul.msk.f32.gmra.mxu2 %vm333_vm2, %v3660_v60 }
  0x9f   :  { %2809 = vmatmul.msk.f32.gmra.mxu3 %vm333_vm2, %v3660_v60  ;;  %461 = vmatpush.msrb.mxu0 %v3506_v5  ;;  %v3689_v5 = vld [vmem:[#allocation2 + $0x10] sm:$0xff] }
  0xa0   :  { %v264_v3 = vpop.permute.xlu0 %263  ;;  %513 = vmatpush.msrb.mxu2 %v3527_v9  ;;  %v2907_v4 = vpop.permute.xlu1 %2906  ;;  %487 = vmatpush.msrb.mxu1 %v3522_v8  ;;  %v316_v8 = vld [vmem:[#allocation4 + $0x8] sm:$0xff] }
  0xa1   :  { %v286_v7 = vsel %vm279_vm0, %v264_v3, %v2918_v2  ;;  %v287_v11 = vsel %vm279_vm0, %v3617_v32, %v264_v3  ;;  %v2909_v13 = vunpack.i.h.bf16 %v2907_v4  ;;  %v2908_v17 = vunpack.i.l.bf16 %v2907_v4  ;;  %462 = vmatpush.msrb.mxu0 %v210_v6  ;;  %325 = vperm.xlu2 %2936, %v316_v8  }
  0xa2   :  { %2820 = vmatpush.msk.msrb.mxu3 %vm238_vm4, %v287_v11 }
  0xa3   :  { %564 = vmatpush.msra.mxu0 %v286_v7  ;;  %v209_v9 = vsel %vm198_vm1, %v175_v45, %v2908_v17  ;;  %v208_v20 = vsel %vm198_vm1, %v2908_v17, %v2909_v13 }
  0xa4   :  { %2800 = vmatmul.msk.f32.gmra.mxu0 %vm333_vm2, %v3660_v60  ;;  %539 = vmatpush.msrb.mxu3 %v3532_v10  ;;  %v2919_v10 = vunpack.i.h.bf16 %v3662_v62 }
  0xa5   :  { %488 = vmatpush.msrb.mxu1 %v209_v9  ;;  %514 = vmatpush.msrb.mxu2 %v208_v20 }
  0xa6   :  { %2804 = vmatmul.msk.f32.gmra.mxu1 %vm333_vm2, %v3689_v5  ;;  %565 = vmatpush.msra.mxu0 %v3551_v14  ;;  %v142_v14 = vand.u32 1023, %v126_v24 }
  0xa7   :  { %2807 = vmatmul.msk.f32.gmra.mxu2 %vm333_vm2, %v3689_v5  ;;  %2810 = vmatmul.msk.f32.gmra.mxu3 %vm333_vm2, %v3689_v5 }
  0xa8   :  { %v181_v21 = vpop.permute.xlu0 %180  ;;  %v2912_v25 = vpop.permute.xlu1 %2911  ;;  %vm158_vm5 = vcmp.ge.s32.totalorder %v142_v14, 1 }
  0xa9   :  { %v207_v26 = vsel %vm198_vm1, %v2909_v13, %v181_v21  ;;  %v2914_v27 = vunpack.i.h.bf16 %v2912_v25  ;;  %v2913_v28 = vunpack.i.l.bf16 %v2912_v25 }
  0xaa   :  { %540 = vmatpush.msrb.mxu3 %v207_v26 }
  0xab   :  { %v283_v30 = vsel %vm279_vm0, %v2914_v27, %v2919_v10  ;;  %v285_v31 = vsel %vm279_vm0, %v2918_v2, %v2913_v28  ;;  %v284_v32 = vsel %vm279_vm0, %v2913_v28, %v2914_v27 }
  0xac   :  { %2801 = vmatmul.msk.f32.gmra.mxu0 %vm333_vm2, %v3689_v5  ;;  %642 = vmatpush.msra.mxu3 %v283_v30 }
  0xad   :  { %590 = vmatpush.msra.mxu1 %v285_v31  ;;  %616 = vmatpush.msra.mxu2 %v284_v32 }
  0xae   :  { %2814 = vmatmul.msk.f32.vlgmr.msrb.gmra.mxu1 %vm333_vm2, %v3635_v48  ;;  %643 = vmatpush.msra.mxu3 %v3578_v19 }
  0xaf   :  { %2817 = vmatmul.msk.f32.vlgmr.msrb.gmra.mxu2 %vm333_vm2, %v3635_v48  ;;  %2821 = vmatmul.msk.f32.vlgmr.msrb.gmra.mxu3 %vm333_vm2, %v3635_v48 }
  0xb0   :  { %v2922_v34 = vpop.permute.xlu0 %2921  ;;  %617 = vmatpush.msra.mxu2 %v3573_v18  ;;  %v183_v36 = vpop.permute.xlu1 %182  ;;  %591 = vmatpush.msra.mxu1 %v3558_v15  ;;  %v149_v18 = vand.u32 1023, %v133_v35 }
  0xb1   :  { %v2924_v37 = vunpack.i.h.bf16 %v2922_v34  ;;  %v2923_v38 = vunpack.i.l.bf16 %v2922_v34  ;;  %v206_v39 = vsel %vm198_vm1, %v181_v21, %v183_v36  ;;  %v2932_v15 = vpop.permute.xlu2 %2931 }
  0xb2   :  { %2824 = vmatpush.msk.msra.mxu0 %vm158_vm5, %v206_v39  ;;  %vm246_vm6 = vcmp.le.s32.totalorder %v149_v18, 1022  ;;  %v2934_v49 = vunpack.i.h.bf16 %v2932_v15  ;;  %v2933_v53 = vunpack.i.l.bf16 %v2932_v15 }
  0xb3   :  { %v203_v40 = vsel %vm198_vm1, %v2924_v37, %v189_v33  ;;  %v205_v41 = vsel %vm198_vm1, %v183_v36, %v2923_v38  ;;  %v204_v19 = vsel %vm198_vm1, %v2923_v38, %v2924_v37 }
  0xb4   :  { %2811 = vmatmul.msk.f32.vlgmr.msrb.gmra.mxu0 %vm333_vm2, %v3635_v48  ;;  %644 = vmatpush.msra.mxu3 %v203_v40 }
  0xb5   :  { %592 = vmatpush.msra.mxu1 %v205_v41  ;;  %618 = vmatpush.msra.mxu2 %v204_v19 }
  0xb6   :  { %2815 = vmatmul.msk.f32.gmra.mxu1 %vm333_vm2, %v3660_v60 }
  0xb7   :  { %2818 = vmatmul.msk.f32.gmra.mxu2 %vm333_vm2, %v3660_v60  ;;  %2822 = vmatmul.msk.f32.gmra.mxu3 %vm333_vm2, %v3660_v60 }
  0xb8   :  { %v2927_v43 = vpop.permute.xlu0 %2926  ;;  %v278_v44 = vpop.permute.xlu1 %277 }
  0xb9   :  { %v2929_v45 = vunpack.i.h.bf16 %v2927_v43  ;;  %v2928_v46 = vunpack.i.l.bf16 %v2927_v43  ;;  %v295_v47 = vsel %vm279_vm0, %v278_v44, %v3629_v42  ;;  %v199_v42 = vsel %vm198_vm1, %v2934_v49, %v3653_v55 }
  0xba   :  { %2846 = vmatpush.msk.msrb.mxu3 %vm246_vm6, %v295_v47 }
  0xbb   :  { %v282_v50 = vsel %vm279_vm0, %v2919_v10, %v2929_v45  ;;  %v281_v51 = vsel %vm279_vm0, %v2929_v45, %v2928_v46  ;;  %v280_v52 = vsel %vm279_vm0, %v2928_v46, %v278_v44 }
  0xbc   :  { %2812 = vmatmul.msk.f32.gmra.mxu0 %vm333_vm2, %v3660_v60  ;;  %694 = vmatpush.msrb.mxu1 %v281_v51 }
  0xbd   :  { %668 = vmatpush.msrb.mxu0 %v282_v50  ;;  %747 = vmatpush.msrb.mxu3 %v3539_v12  ;;  %v200_v12 = vsel %vm198_vm1, %v2933_v53, %v2934_v49 }
  0xbe   :  { %2816 = vmatmul.msk.f32.gmra.mxu1 %vm333_vm2, %v3689_v5  ;;  %720 = vmatpush.msrb.mxu2 %v280_v52 }
  0xbf   :  { %2819 = vmatmul.msk.f32.gmra.mxu2 %vm333_vm2, %v3689_v5  ;;  %2823 = vmatmul.msk.f32.gmra.mxu3 %vm333_vm2, %v3689_v5 }
  0xc0   :  { %748 = vmatpush.msrb.mxu3 %v199_v42  ;;  %v191_v54 = vpop.permute.xlu0 %190  ;;  %669 = vmatpush.msrb.mxu0 %v3563_v16  ;;  %v3823_v7 = vpop.permute.xlu1 %320 }
  0xc1   :  { %v202_v56 = vsel %vm198_vm1, %v189_v33, %v191_v54  ;;  %721 = vmatpush.msrb.mxu2 %v3598_v23  ;;  %695 = vmatpush.msrb.mxu1 %v3593_v22  ;;  %v201_v57 = vsel %vm198_vm1, %v191_v54, %v2933_v53 }
  0xc2   :  { %670 = vmatpush.msrb.mxu0 %v202_v56 }
  0xc3   :  { %696 = vmatpush.msrb.mxu1 %v201_v57  ;;  %722 = vmatpush.msrb.mxu2 %v200_v12 }
  0xc4   :  { %2813 = vmatmul.msk.f32.gmra.mxu0 %vm333_vm2, %v3689_v5 }
  0xc6   :  { %2828 = vmatmul.msk.f32.vlgmr.msra.gmra.mxu1 %vm333_vm2, %v3635_v48 }
  0xc7   :  { %2831 = vmatmul.msk.f32.vlgmr.msra.gmra.mxu2 %vm333_vm2, %v3635_v48  ;;  %2834 = vmatmul.msk.f32.vlgmr.msra.gmra.mxu3 %vm333_vm2, %v3635_v48 }
  0xc8   :  { %v3860_v37 = vpop.permute.xlu0 %330 }
  0xcc   :  { %2825 = vmatmul.msk.f32.vlgmr.msra.gmra.mxu0 %vm333_vm2, %v3635_v48 }
  0xce   :  { %2829 = vmatmul.msk.f32.gmra.mxu1 %vm333_vm2, %v3660_v60 }
  0xcf   :  { %2832 = vmatmul.msk.f32.gmra.mxu2 %vm333_vm2, %v3660_v60  ;;  %2835 = vmatmul.msk.f32.gmra.mxu3 %vm333_vm2, %v3660_v60 }
  0xd4   :  { %2826 = vmatmul.msk.f32.gmra.mxu0 %vm333_vm2, %v3660_v60 }
  0xd6   :  { %2830 = vmatmul.msk.f32.gmra.mxu1 %vm333_vm2, %v3689_v5 }
  0xd7   :  { %2833 = vmatmul.msk.f32.gmra.mxu2 %vm333_vm2, %v3689_v5  ;;  %2836 = vmatmul.msk.f32.gmra.mxu3 %vm333_vm2, %v3689_v5 }
  0xdc   :  { %2827 = vmatmul.msk.f32.gmra.mxu0 %vm333_vm2, %v3689_v5 }
  0xde   :  { %2840 = vmatmul.msk.f32.vlgmr.msrb.gmra.mxu1 %vm333_vm2, %v3635_v48 }
  0xdf   :  { %2843 = vmatmul.msk.f32.vlgmr.msrb.gmra.mxu2 %vm333_vm2, %v3635_v48  ;;  %2847 = vmatmul.msk.f32.vlgmr.msrb.gmra.mxu3 %vm333_vm2, %v3635_v48 }
  0xe4   :  { %2837 = vmatmul.msk.f32.vlgmr.msrb.gmra.mxu0 %vm333_vm2, %v3635_v48 }
  0xe6   :  { %2841 = vmatmul.msk.f32.gmra.mxu1 %vm333_vm2, %v3660_v60 }
  0xe7   :  { %2844 = vmatmul.msk.f32.gmra.mxu2 %vm333_vm2, %v3660_v60  ;;  %2848 = vmatmul.msk.f32.gmra.mxu3 %vm333_vm2, %v3660_v60 }
  0xec   :  { %2838 = vmatmul.msk.f32.gmra.mxu0 %vm333_vm2, %v3660_v60 }
  0xee   :  { %2842 = vmatmul.msk.f32.gmra.mxu1 %vm333_vm2, %v3689_v5 }
  0xef   :  { %2845 = vmatmul.msk.f32.gmra.mxu2 %vm333_vm2, %v3689_v5  ;;  %2849 = vmatmul.msk.f32.gmra.mxu3 %vm333_vm2, %v3689_v5 }
  0xf4   :  { %2839 = vmatmul.msk.f32.gmra.mxu0 %vm333_vm2, %v3689_v5 }
  0xfb   :  { %v3836_v21 = vpop.permute.xlu2 %325 }
 0x113   :  { %v386_v16 = vpop.f32.mrf.mxu1 }
 0x114   :  { %v3829_v13 = vadd.f32 %v386_v16, %v3823_v7 }
 0x118   :  { %v360_v22 = vpop.f32.mrf.mxu0 }
 0x119   :  { %v412_v23 = vpop.f32.mrf.mxu2  ;;  %v3826_v11 = vadd.f32 %v360_v22, %v3823_v7 }
 0x11a   :  { %v438_v48 = vpop.f32.mrf.mxu3  ;;  %v3832_v8 = vadd.f32 %v412_v23, %v3823_v7 }
 0x11b   :  { %v389_v55 = vpop.f32.mrf.mxu1  ;;  %v759_v10 = vadd.f32 %v3829_v13, %v3826_v11  ;;  %v3839_v24 = vadd.f32 %v438_v48, %v3823_v7 }
 0x11c   :  { %v3846_v28 = vadd.f32 %v389_v55, %v3836_v21 }
 0x11d   :  { %v760_v25 = vadd.f32 %v759_v10, %v3832_v8 }
 0x11f   :  { %v761_v33 = vadd.f32 %v760_v25, %v3839_v24 }
 0x121   :  { %v363_v58 = vpop.f32.mrf.mxu0  ;;  %v415_v59 = vpop.f32.mrf.mxu2 }
 0x122   :  { %v441_v60 = vpop.f32.mrf.mxu3  ;;  %v3843_v27 = vadd.f32 %v363_v58, %v3836_v21  ;;  %v3853_v34 = vadd.f32 %v415_v59, %v3836_v21 }
 0x123   :  { %v392_v61 = vpop.f32.mrf.mxu1  ;;  %v3864_v40 = vadd.f32 %v441_v60, %v3836_v21 }
 0x124   :  { %v776_v35 = vadd.f32 %v3846_v28, %v3843_v27  ;;  %v3871_v18 = vadd.f32 %v392_v61, %v3860_v37 }
 0x126   :  { %v777_v41 = vadd.f32 %v776_v35, %v3853_v34 }
 0x128   :  { %v778_v49 = vadd.f32 %v777_v41, %v3864_v40 }
 0x129   :  { %v366_v62 = vpop.f32.mrf.mxu0 }
 0x12a   :  { %v418_v63 = vpop.f32.mrf.mxu2  ;;  %v444_v0 = vpop.f32.mrf.mxu3  ;;  %v3868_v19 = vadd.f32 %v366_v62, %v3860_v37 }
 0x12b   :  { %v490_v1 = vpop.f32.mrf.mxu1  ;;  %v3882_v50 = vadd.f32 %v418_v63, %v3860_v37  ;;  %v3898_v57 = vadd.f32 %v444_v0, %v3860_v37 }
 0x12c   :  { %v3858_v36 = vadd.f32 %v490_v1, %v3823_v7  ;;  %v793_v51 = vadd.f32 %v3871_v18, %v3868_v19 }
 0x12e   :  { %v794_v16 = vadd.f32 %v793_v51, %v3882_v50 }
 0x130   :  { %v795_v63 = vadd.f32 %v794_v16, %v3898_v57 }
 0x131   :  { %v464_v2 = vpop.f32.mrf.mxu0 }
 0x132   :  { %v516_v3 = vpop.f32.mrf.mxu2  ;;  %v542_v4 = vpop.f32.mrf.mxu3  ;;  %v3849_v31 = vadd.f32 %v464_v2, %v3823_v7 }
 0x133   :  { %v493_v6 = vpop.f32.mrf.mxu1  ;;  %v3874_v44 = vadd.f32 %v516_v3, %v3823_v7  ;;  %v3888_v53 = vadd.f32 %v542_v4, %v3823_v7 }
 0x134   :  { %v762_v38 = vadd.f32 %v761_v33, %v3849_v31  ;;  %v3891_v42 = vadd.f32 %v493_v6, %v3836_v21 }
 0x136   :  { %v763_v45 = vadd.f32 %v762_v38, %v3858_v36 }
 0x138   :  { %v764_v52 = vadd.f32 %v763_v45, %v3874_v44 }
 0x139   :  { %v467_v17 = vpop.f32.mrf.mxu0 }
 0x13a   :  { %v519_v5 = vpop.f32.mrf.mxu2  ;;  %v545_v9 = vpop.f32.mrf.mxu3  ;;  %v3878_v47 = vadd.f32 %v467_v17, %v3836_v21  ;;  %v765_v48 = vadd.f32 %v764_v52, %v3888_v53 }
 0x13b   :  { %v496_v20 = vpop.f32.mrf.mxu1  ;;  %v3903_v58 = vadd.f32 %v519_v5, %v3836_v21  ;;  %v3916_v1 = vadd.f32 %v545_v9, %v3836_v21 }
 0x13c   :  { %v779_v54 = vadd.f32 %v778_v49, %v3878_v47  ;;  %v3919_v2 = vadd.f32 %v496_v20, %v3860_v37 }
 0x13e   :  { %v780_v59 = vadd.f32 %v779_v54, %v3891_v42 }
 0x140   :  { %v781_v0 = vadd.f32 %v780_v59, %v3903_v58 }
 0x141   :  { %v470_v26 = vpop.f32.mrf.mxu0 }
 0x142   :  { %v522_v14 = vpop.f32.mrf.mxu2  ;;  %v548_v30 = vpop.f32.mrf.mxu3  ;;  %v3907_v60 = vadd.f32 %v470_v26, %v3860_v37  ;;  %v782_v26 = vadd.f32 %v781_v0, %v3916_v1 }
 0x143   :  { %v594_v32 = vpop.f32.mrf.mxu1  ;;  %v3931_v9 = vadd.f32 %v522_v14, %v3860_v37 }
 0x144   :  { %v3910_v61 = vadd.f32 %v594_v32, %v3823_v7  ;;  %v796_v3 = vadd.f32 %v795_v63, %v3907_v60 }
 0x146   :  { %v797_v20 = vadd.f32 %v796_v3, %v3919_v2 }
 0x148   :  { %v798_v41 = vadd.f32 %v797_v20, %v3931_v9 }
 0x149   :  { %v568_v39 = vpop.f32.mrf.mxu0 }
 0x14a   :  { %v620_v15 = vpop.f32.mrf.mxu2  ;;  %v646_v43 = vpop.f32.mrf.mxu3  ;;  %v3895_v12 = vadd.f32 %v568_v39, %v3823_v7 }
 0x14b   :  { %v597_v46 = vpop.f32.mrf.mxu1  ;;  %v3923_v4 = vadd.f32 %v620_v15, %v3823_v7  ;;  %v3936_v33 = vadd.f32 %v646_v43, %v3823_v7  ;;  %v3944_v15 = vadd.f32 %v548_v30, %v3860_v37 }
 0x14c   :  { %v766_v62 = vadd.f32 %v765_v48, %v3895_v12  ;;  %v3939_v38 = vadd.f32 %v597_v46, %v3836_v21 }
 0x14e   :  { %v767_v6 = vadd.f32 %v766_v62, %v3910_v61 }
 0x150   :  { %v768_v32 = vadd.f32 %v767_v6, %v3923_v4 }
 0x151   :  { %v571_v56 = vpop.f32.mrf.mxu0 }
 0x152   :  { %v623_v22 = vpop.f32.mrf.mxu2  ;;  %v649_v23 = vpop.f32.mrf.mxu3  ;;  %v3927_v5 = vadd.f32 %v571_v56, %v3836_v21  ;;  %v769_v14 = vadd.f32 %v768_v32, %v3936_v33  ;;  %v799_v56 = vadd.f32 %v798_v41, %v3944_v15 }
 0x153   :  { %v600_v55 = vpop.f32.mrf.mxu1  ;;  %v3948_v49 = vadd.f32 %v623_v22, %v3836_v21  ;;  %v3963_v22 = vadd.f32 %v649_v23, %v3836_v21 }
 0x154   :  { %v783_v39 = vadd.f32 %v782_v26, %v3927_v5  ;;  %v3966_v48 = vadd.f32 %v600_v55, %v3860_v37 }
 0x156   :  { %v784_v43 = vadd.f32 %v783_v39, %v3939_v38 }
 0x158   :  { %v785_v59 = vadd.f32 %v784_v43, %v3948_v49 }
 0x159   :  { %v574_v17 = vpop.f32.mrf.mxu0 }
 0x15a   :  { %v626_v10 = vpop.f32.mrf.mxu2  ;;  %v652_v25 = vpop.f32.mrf.mxu3  ;;  %v3952_v51 = vadd.f32 %v574_v17, %v3860_v37  ;;  %v786_v26 = vadd.f32 %v785_v59, %v3963_v22 }
 0x15b   :  { %v698_v35 = vpop.f32.mrf.mxu1  ;;  %v3985_v41 = vadd.f32 %v626_v10, %v3860_v37 }
 0x15c   :  { %v3959_v30 = vadd.f32 %v698_v35, %v3823_v7  ;;  %v800_v62 = vadd.f32 %v799_v56, %v3952_v51 }
 0x15e   :  { %v801_v55 = vadd.f32 %v800_v62, %v3966_v48 }
 0x161   :  { %v672_v45 = vpop.f32.mrf.mxu0 }
 0x162   :  { %v3955_v46 = vadd.f32 %v672_v45, %v3823_v7  ;;  %v724_v52 = vpop.f32.mrf.mxu2  ;;  %v750_v54 = vpop.f32.mrf.mxu3  ;;  %v802_v45 = vadd.f32 %v801_v55, %v3985_v41 }
 0x163   :  { %v3971_v63 = vadd.f32 %v724_v52, %v3823_v7  ;;  %v701_v3 = vpop.f32.mrf.mxu1  ;;  %v3976_v17 = vadd.f32 %v750_v54, %v3823_v7  ;;  %v3997_v54 = vadd.f32 %v652_v25, %v3860_v37 }
 0x164   :  { %v770_v16 = vadd.f32 %v769_v14, %v3955_v46  ;;  %v3988_v14 = vadd.f32 %v701_v3, %v3836_v21 }
 0x165   :  { %v803_v62 = vadd.f32 %v802_v45, %v3997_v54 }
 0x166   :  { %v771_v0 = vadd.f32 %v770_v16, %v3959_v30 }
 0x168   :  { %v772_v6 = vadd.f32 %v771_v0, %v3971_v63 }
 0x169   :  { %v675_v23 = vpop.f32.mrf.mxu0 }
 0x16a   :  { %v3981_v20 = vadd.f32 %v675_v23, %v3836_v21  ;;  %v727_v32 = vpop.f32.mrf.mxu2  ;;  %v773_v35 = vadd.f32 %v772_v6, %v3976_v17  ;;  %v753_v39 = vpop.f32.mrf.mxu3 }
 0x16b   :  { %v3993_v43 = vadd.f32 %v727_v32, %v3836_v21  ;;  %v4001_v10 = vadd.f32 %v753_v39, %v3836_v21  ;;  %v704_v16 = vpop.f32.mrf.mxu1 }
 0x16c   :  { %v787_v7 = vadd.f32 %v786_v26, %v3981_v20  ;;  %774 = vadd.xlane.f32.xlu1 %v773_v35  ;;  %v4009_v23 = vadd.f32 %v704_v16, %v3860_v37 }
 0x16e   :  { %v788_v52 = vadd.f32 %v787_v7, %v3988_v14 }
 0x170   :  { %v789_v56 = vadd.f32 %v788_v52, %v3993_v43 }
 0x171   :  { %v678_v59 = vpop.f32.mrf.mxu0 }
 0x172   :  { %v4005_v0 = vadd.f32 %v678_v59, %v3860_v37  ;;  %v790_v3 = vadd.f32 %v789_v56, %v4001_v10  ;;  %v730_v6 = vpop.f32.mrf.mxu2  ;;  %v756_v26 = vpop.f32.mrf.mxu3 }
 0x173   :  { %v4013_v21 = vadd.f32 %v730_v6, %v3860_v37  ;;  %v4018_v35 = vadd.f32 %v756_v26, %v3860_v37  ;;  %v1098_v37 = vld [vmem:[%s6443_s4] sm:$0xff] }
 0x174   :  { %v804_v25 = vadd.f32 %v803_v62, %v4005_v0  ;;  %791 = vadd.xlane.f32.xlu2 %v790_v3  ;;  %v1032_v62 = vld [vmem:[%s6442_s3] sm:$0xff]  ;;  %v1099_v3 = vld [vmem:[%s6443_s4 + $0x8] sm:$0xff] }
 0x176   :  { %v805_v55 = vadd.f32 %v804_v25, %v4009_v23 }
 0x178   :  { %v806_v32 = vadd.f32 %v805_v55, %v4013_v21 }
 0x17a   :  { %v807_v39 = vadd.f32 %v806_v32, %v4018_v35 }
 0x17c   :  { %808 = vadd.xlane.f32.xlu0 %v807_v39 }
 0x1df   :  { %v775_v45 = vpop.xlane.xlu1 %774 }
 0x1e7   :  { %v792_v7 = vpop.xlane.xlu2 %791 }
 0x1e8   :  { %v810_v52 = vadd.f32 %v792_v7, %v775_v45 }
 0x1ef   :  { %v809_v56 = vpop.xlane.xlu0 %808 }
 0x1f0   :  { %v811_v16 = vadd.f32 %v810_v52, %v809_v56 }
 0x1f2   :  { %v812_v59 = vmul.f32 0.00016276042, %v811_v16 }
 0x1f4   :  { %815 = vperm.xlu2 %2936, %v812_v59  }
 0x1fc   :  { %1037 = vperm.xlu2 %2936, %v1032_v62  }
 0x204   :  { %1103 = vperm.xlu2 %2936, %v1098_v37  }
 0x20c   :  { %1108 = vperm.xlu2 %2936, %v1099_v3  }
 0x24e   :  { %v4030_v6 = vpop.permute.xlu2 %815 }
 0x24f   :  { %v4034_v25 = vsub.f32 %v3868_v19, %v4030_v6  ;;  %v4038_v26 = vsub.f32 %v3871_v18, %v4030_v6  ;;  %v4042_v55 = vsub.f32 %v3882_v50, %v4030_v6  ;;  %v4050_v7 = vsub.f32 %v3898_v57, %v4030_v6 }
 0x250   :  { %v4054_v19 = vsub.f32 %v3907_v60, %v4030_v6  ;;  %v4060_v50 = vsub.f32 %v3826_v11, %v4030_v6  ;;  %v4064_v52 = vsub.f32 %v3829_v13, %v4030_v6  ;;  %v4068_v57 = vsub.f32 %v3919_v2, %v4030_v6 }
 0x251   :  { %v898_v32 = vmul.f32 %v4034_v25, %v4034_v25  ;;  %v899_v39 = vmul.f32 %v4038_v26, %v4038_v26  ;;  %v900_v18 = vmul.f32 %v4042_v55, %v4042_v55  ;;  %v901_v60 = vmul.f32 %v4050_v7, %v4050_v7 }
 0x252   :  { %v4074_v16 = vsub.f32 %v3931_v9, %v4030_v6  ;;  %v902_v11 = vmul.f32 %v4054_v19, %v4054_v19  ;;  %v4080_v13 = vsub.f32 %v3832_v8, %v4030_v6  ;;  %v866_v2 = vmul.f32 %v4060_v50, %v4060_v50 }
 0x253   :  { %v948_v45 = vadd.f32 %v899_v39, %v898_v32  ;;  %v867_v62 = vmul.f32 %v4064_v52, %v4064_v52  ;;  %v4088_v37 = vsub.f32 %v3944_v15, %v4030_v6  ;;  %v903_v9 = vmul.f32 %v4068_v57, %v4068_v57 }
 0x254   :  { %v4094_v32 = vsub.f32 %v3839_v24, %v4030_v6  ;;  %v4098_v8 = vsub.f32 %v3952_v51, %v4030_v6  ;;  %v904_v39 = vmul.f32 %v4074_v16, %v4074_v16  ;;  %v4104_v15 = vsub.f32 %v3849_v31, %v4030_v6 }
 0x255   :  { %v949_v56 = vadd.f32 %v948_v45, %v900_v18  ;;  %v868_v45 = vmul.f32 %v4080_v13, %v4080_v13  ;;  %v4110_v24 = vsub.f32 %v3966_v48, %v4030_v6  ;;  %v905_v51 = vmul.f32 %v4088_v37, %v4088_v37 }
 0x256   :  { %v4120_v31 = vsub.f32 %v3858_v36, %v4030_v6  ;;  %v906_v48 = vmul.f32 %v4098_v8, %v4098_v8  ;;  %v4136_v36 = vsub.f32 %v3997_v54, %v4030_v6  ;;  %v4200_v29 = vsub.f32 %v3878_v47, %v4030_v6 }
 0x257   :  { %v950_v59 = vadd.f32 %v949_v56, %v901_v60  ;;  %v914_v60 = vadd.f32 %v867_v62, %v866_v2  ;;  %v907_v54 = vmul.f32 %v4110_v24, %v4110_v24  ;;  %v4214_v47 = vsub.f32 %v3891_v42, %v4030_v6 }
 0x258   :  { %v4228_v42 = vsub.f32 %v3903_v58, %v4030_v6  ;;  %v4242_v58 = vsub.f32 %v3916_v1, %v4030_v6 }
 0x259   :  { %v951_v3 = vadd.f32 %v950_v59, %v902_v11  ;;  %v4116_v11 = vsub.f32 %v3985_v41, %v4030_v6  ;;  %v869_v59 = vmul.f32 %v4094_v32, %v4094_v32  ;;  %v915_v2 = vadd.f32 %v914_v60, %v868_v45 }
 0x25a   :  { %v4132_v41 = vsub.f32 %v3846_v28, %v4030_v6  ;;  %v4150_v28 = vsub.f32 %v4009_v23, %v4030_v6  ;;  %v4158_v60 = vsub.f32 %v3888_v53, %v4030_v6  ;;  %v4164_v23 = vsub.f32 %v3853_v34, %v4030_v6 }
 0x25b   :  { %v952_v18 = vadd.f32 %v951_v3, %v903_v9  ;;  %v4128_v9 = vsub.f32 %v3843_v27, %v4030_v6  ;;  %v4140_v3 = vsub.f32 %v3874_v44, %v4030_v6  ;;  %v4146_v27 = vsub.f32 %v4005_v0, %v4030_v6 }
 0x25c   :  { %6554 = vst [vmem:[#allocation14_spill] sm:$0xff] %v4150_v28  ;;  %v908_v44 = vmul.f32 %v4116_v11, %v4116_v11  ;;  %v4176_v53 = vsub.f32 %v3895_v12, %v4030_v6  ;;  %v4182_v34 = vsub.f32 %v4018_v35, %v4030_v6  ;;  %v888_v1 = vmul.f32 %v4228_v42, %v4228_v42 }
 0x25d   :  { %v953_v56 = vadd.f32 %v952_v18, %v904_v39  ;;  %v870_v39 = vmul.f32 %v4104_v15, %v4104_v15  ;;  %v916_v18 = vadd.f32 %v915_v2, %v869_v59  ;;  %6553 = vst [vmem:[#allocation13_spill] sm:$0xff] %v4146_v27  ;;  %v882_v59 = vmul.f32 %v4128_v9, %v4128_v9 }
 0x25e   :  { %v883_v2 = vmul.f32 %v4132_v41, %v4132_v41  ;;  %6555 = vst [vmem:[#allocation15_spill] sm:$0xff] %v4182_v34  ;;  %v910_v12 = vmul.f32 %v4146_v27, %v4146_v27  ;;  %v874_v27 = vmul.f32 %v4176_v53, %v4176_v53 }
 0x25f   :  { %v954_v62 = vadd.f32 %v953_v56, %v905_v51  ;;  %v871_v51 = vmul.f32 %v4120_v31, %v4120_v31  ;;  %v917_v0 = vadd.f32 %v916_v18, %v870_v39  ;;  %v909_v18 = vmul.f32 %v4136_v36, %v4136_v36 }
 0x261   :  { %v955_v45 = vadd.f32 %v954_v62, %v906_v48  ;;  %v4172_v48 = vsub.f32 %v4013_v21, %v4030_v6  ;;  %v872_v62 = vmul.f32 %v4140_v3, %v4140_v3  ;;  %v918_v39 = vadd.f32 %v917_v0, %v871_v51 }
 0x262   :  { %v4188_v21 = vsub.f32 %v3864_v40, %v4030_v6  ;;  %v873_v51 = vmul.f32 %v4158_v60, %v4158_v60  ;;  %v884_v40 = vmul.f32 %v4164_v23, %v4164_v23 }
 0x263   :  { %v956_v56 = vadd.f32 %v955_v45, %v907_v54  ;;  %v4194_v45 = vsub.f32 %v3910_v61, %v4030_v6  ;;  %v919_v35 = vadd.f32 %v918_v39, %v872_v62  ;;  %v4208_v61 = vsub.f32 %v3923_v4, %v4030_v6 }
 0x264   :  { %v4222_v4 = vsub.f32 %v3936_v33, %v4030_v6  ;;  %v4236_v33 = vsub.f32 %v3955_v46, %v4030_v6 }
 0x265   :  { %v957_v54 = vadd.f32 %v956_v56, %v908_v44  ;;  %v931_v44 = vadd.f32 %v883_v2, %v882_v59  ;;  %v911_v56 = vmul.f32 %v4150_v28, %v4150_v28  ;;  %v920_v62 = vadd.f32 %v919_v35, %v873_v51 }
 0x266   :  { %v912_v2 = vmul.f32 %v4172_v48, %v4172_v48  ;;  %v886_v35 = vmul.f32 %v4200_v29, %v4200_v29  ;;  %v877_v46 = vmul.f32 %v4222_v4, %v4222_v4 }
 0x267   :  { %v958_v0 = vadd.f32 %v957_v54, %v909_v18  ;;  %v885_v18 = vmul.f32 %v4188_v21, %v4188_v21  ;;  %v932_v59 = vadd.f32 %v931_v44, %v884_v40  ;;  %v875_v54 = vmul.f32 %v4194_v45, %v4194_v45 }
 0x268   :  { %v921_v51 = vadd.f32 %v920_v62, %v874_v27  ;;  %v913_v40 = vmul.f32 %v4182_v34, %v4182_v34  ;;  %v876_v44 = vmul.f32 %v4208_v61, %v4208_v61  ;;  %v887_v62 = vmul.f32 %v4214_v47, %v4214_v47 }
 0x269   :  { %v959_v39 = vadd.f32 %v958_v0, %v910_v12  ;;  %v933_v0 = vadd.f32 %v932_v59, %v885_v18  ;;  %v4248_v18 = vsub.f32 %v3959_v30, %v4030_v6  ;;  %v878_v30 = vmul.f32 %v4236_v33, %v4236_v33 }
 0x26a   :  { %v922_v27 = vadd.f32 %v921_v51, %v875_v54  ;;  %v4260_v51 = vsub.f32 %v3971_v63, %v4030_v6 }
 0x26b   :  { %v960_v12 = vadd.f32 %v959_v39, %v911_v56  ;;  %v934_v39 = vadd.f32 %v933_v0, %v886_v35  ;;  %v4266_v35 = vsub.f32 %v3939_v38, %v4030_v6  ;;  %v879_v63 = vmul.f32 %v4248_v18, %v4248_v18 }
 0x26c   :  { %v923_v59 = vadd.f32 %v922_v27, %v876_v44  ;;  %v4278_v27 = vsub.f32 %v3948_v49, %v4030_v6 }
 0x26d   :  { %v961_v56 = vadd.f32 %v960_v12, %v912_v2  ;;  %v4254_v2 = vsub.f32 %v3927_v5, %v4030_v6  ;;  %v935_v54 = vadd.f32 %v934_v39, %v887_v62  ;;  %v889_v5 = vmul.f32 %v4242_v58, %v4242_v58 }
 0x26e   :  { %v924_v12 = vadd.f32 %v923_v59, %v877_v46  ;;  %v891_v39 = vmul.f32 %v4266_v35, %v4266_v35 }
 0x26f   :  { %v962_v34 = vadd.f32 %v961_v56, %v913_v40  ;;  %v936_v0 = vadd.f32 %v935_v54, %v888_v1  ;;  %v4272_v40 = vsub.f32 %v3976_v17, %v4030_v6  ;;  %v890_v38 = vmul.f32 %v4254_v2, %v4254_v2 }
 0x270   :  { %v925_v44 = vadd.f32 %v924_v12, %v878_v30  ;;  %v880_v56 = vmul.f32 %v4260_v51, %v4260_v51  ;;  %v4286_v17 = vsub.f32 %v3963_v22, %v4030_v6  ;;  %v4294_v1 = vsub.f32 %v3981_v20, %v4030_v6 }
 0x271   :  { %963 = vadd.xlane.f32.xlu0 %v962_v34  ;;  %v937_v34 = vadd.f32 %v936_v0, %v889_v5  ;;  %v881_v49 = vmul.f32 %v4272_v40, %v4272_v40  ;;  %v892_v54 = vmul.f32 %v4278_v27, %v4278_v27  ;;  %v4300_v22 = vsub.f32 %v3988_v14, %v4030_v6 }
 0x272   :  { %v926_v62 = vadd.f32 %v925_v44, %v879_v63  ;;  %v893_v5 = vmul.f32 %v4286_v17, %v4286_v17  ;;  %v4306_v63 = vsub.f32 %v3993_v43, %v4030_v6  ;;  %v894_v20 = vmul.f32 %v4294_v1, %v4294_v1 }
 0x273   :  { %v938_v46 = vadd.f32 %v937_v34, %v890_v38  ;;  %v4312_v38 = vsub.f32 %v4001_v10, %v4030_v6  ;;  %v895_v14 = vmul.f32 %v4300_v22, %v4300_v22  ;;  %v1100_v10 = vld [vmem:[%s6443_s4 + $0x10] sm:$0xff]  ;;  %s3406_s4 = smov 125  }
 0x274   :  { %v927_v59 = vadd.f32 %v926_v62, %v880_v56  ;;  %v896_v56 = vmul.f32 %v4306_v63, %v4306_v63  ;;  %v1034_v6 = vld [vmem:[%s6442_s3 + $0x10] sm:$0xff] }
 0x275   :  { %v939_v30 = vadd.f32 %v938_v46, %v891_v39  ;;  %6556 = vst [vmem:[#allocation16_spill] sm:$0xff] %v4312_v38  ;;  %v897_v43 = vmul.f32 %v4312_v38, %v4312_v38  ;;  %v1033_v46 = vld [vmem:[%s6442_s3 + $0x8] sm:$0xff]  ;;  %s3405_s3 = smov 126  }
 0x276   :  { %v928_v12 = vadd.f32 %v927_v59, %v881_v49 }
 0x277   :  { %v940_v0 = vadd.f32 %v939_v30, %v892_v54 }
 0x278   :  { %929 = vadd.xlane.f32.xlu1 %v928_v12 }
 0x279   :  { %v941_v44 = vadd.f32 %v940_v0, %v893_v5 }
 0x27b   :  { %v942_v34 = vadd.f32 %v941_v44, %v894_v20 }
 0x27d   :  { %v943_v62 = vadd.f32 %v942_v34, %v895_v14 }
 0x27f   :  { %v944_v39 = vadd.f32 %v943_v62, %v896_v56 }
 0x281   :  { %v945_v49 = vadd.f32 %v944_v39, %v897_v43 }
 0x283   :  { %946 = vadd.xlane.f32.xlu1 %v945_v49 }
 0x285   :  { %1042 = vperm.xlu0 %2937, %v1033_v46   ;;  %v4329_v46 = vpop.permute.xlu2 %1037 }
 0x28d   :  { %1113 = vperm.xlu0 %2937, %v1100_v10   ;;  %v4333_v10 = vpop.permute.xlu2 %1103 }
 0x29c   :  { %1047 = vperm.xlu1 %2935, %v1034_v6  }
 0x2e4   :  { %v964_v12 = vpop.xlane.xlu0 %963 }
 0x2eb   :  { %v930_v59 = vpop.xlane.xlu1 %929 }
 0x2f6   :  { %v947_v54 = vpop.xlane.xlu1 %946 }
 0x2f7   :  { %v965_v30 = vadd.f32 %v947_v54, %v930_v59 }
 0x2f9   :  { %v966_v5 = vadd.f32 %v965_v30, %v964_v12 }
 0x2fb   :  { %v967_v0 = vmul.f32 0.00016276042, %v966_v5  ;;  %v4345_v5 = vpop.permute.xlu0 %1042 }
 0x2fd   :  { %v968_v20 = vadd.f32 1e-05, %v967_v0 }
 0x2ff   :  { %3228 = vrsqrt.f32 %v968_v20  ;;  %vm975_vm8 = vweird.f32 %v968_v20 }
 0x305   :  { %v3229_v44 = vpop.eup %3228 }
 0x306   :  { %v970_v14 = vmul.f32 %v3229_v44, %v968_v20  ;;  %vm976_vm7 = vweird.f32 %v3229_v44 }
 0x307   :  { %vm977_vm9 = vmor %vm975_vm8, %vm976_vm7 }
 0x308   :  { %v971_v34 = vmul.f32 %v3229_v44, %v970_v14 }
 0x30a   :  { %v972_v56 = vmul.f32 0.5, %v971_v34  ;;  %v4359_v34 = vpop.permute.xlu2 %1108 }
 0x30c   :  { %v973_v62 = vsub.f32 1.5, %v972_v56 }
 0x30e   :  { %v974_v43 = vmul.f32 %v3229_v44, %v973_v62  ;;  %v4331_v49 = vpop.permute.xlu1 %1047 }
 0x310   :  { %v978_v39 = vsel %vm977_vm9, %v3229_v44, %v974_v43 }
 0x311   :  { %981 = vperm.xlu1 %2935, %v978_v39  }
 0x383   :  { %v4335_v6 = vpop.permute.xlu1 %981 }
 0x384   :  { %v986_v59 = vmul.f32 %v4335_v6, %v4080_v13  ;;  %v987_v54 = vmul.f32 %v4335_v6, %v4094_v32  ;;  %v1002_v30 = vmul.f32 %v4335_v6, %v4164_v23  ;;  %v1003_v12 = vmul.f32 %v4335_v6, %v4188_v21 }
 0x385   :  { %v984_v0 = vmul.f32 %v4335_v6, %v4060_v50  ;;  %v988_v20 = vmul.f32 %v4335_v6, %v4104_v15  ;;  %v1000_v13 = vmul.f32 %v4335_v6, %v4128_v9  ;;  %v1004_v32 = vmul.f32 %v4335_v6, %v4200_v29 }
 0x386   :  { %v1052_v44 = vmul.f32 %v4329_v46, %v986_v59  ;;  %v1053_v23 = vmul.f32 %v4329_v46, %v987_v54  ;;  %v1068_v21 = vmul.f32 %v4345_v5, %v1002_v30  ;;  %v1069_v14 = vmul.f32 %v4345_v5, %v1003_v12 }
 0x387   :  { %v1050_v50 = vmul.f32 %v4329_v46, %v984_v0  ;;  %v1054_v15 = vmul.f32 %v4329_v46, %v988_v20  ;;  %v1066_v56 = vmul.f32 %v4345_v5, %v1000_v13  ;;  %v1070_v9 = vmul.f32 %v4345_v5, %v1004_v32 }
 0x388   :  { %v1118_v29 = vadd.f32 %v4333_v10, %v1052_v44  ;;  %v1119_v62 = vadd.f32 %v4333_v10, %v1053_v23  ;;  %v1134_v43 = vadd.f32 %v4359_v34, %v1068_v21  ;;  %v1135_v39 = vadd.f32 %v4359_v34, %v1069_v14 }
 0x389   :  { %v1116_v59 = vadd.f32 %v4333_v10, %v1050_v50  ;;  %v1120_v54 = vadd.f32 %v4333_v10, %v1054_v15  ;;  %v4372_v30 = vadd.f32 %v4359_v34, %v1066_v56  ;;  %v1136_v12 = vadd.f32 %v4359_v34, %v1070_v9 }
 0x38a   :  { %v1166_v0 = vmax.f32 %v1118_v29, 0.0  ;;  %v1167_v20 = vmax.f32 %v1119_v62, 0.0  ;;  %v1182_v13 = vmax.f32 %v1134_v43, 0.0  ;;  %v1183_v32 = vmax.f32 %v1135_v39, 0.0 }
 0x38b   :  { %v1164_v44 = vmax.f32 %v1116_v59, 0.0  ;;  %v1168_v28 = vmax.f32 %v1120_v54, 0.0  ;;  %v1180_v23 = vmax.f32 %v4372_v30, 0.0  ;;  %v1184_v21 = vmax.f32 %v1136_v12, 0.0 }
 0x38c   :  { %v4376_v38 = vmax.f32 %v1166_v0, %v1182_v13  ;;  %v4378_v14 = vmax.f32 %v1167_v20, %v1183_v32  ;;  %v985_v50 = vmul.f32 %v4335_v6, %v4064_v52  ;;  %v1001_v15 = vmul.f32 %v4335_v6, %v4132_v41 }
 0x38d   :  { %v4384_v56 = vmax.f32 %v1164_v44, %v1180_v23  ;;  %v4386_v9 = vmax.f32 %v1168_v28, %v1184_v21  ;;  %v1018_v29 = vmul.f32 %v4335_v6, %v4042_v55  ;;  %v1019_v62 = vmul.f32 %v4335_v6, %v4050_v7  ;;  %v4399_v28 = vpop.permute.xlu0 %1113 }
 0x38e   :  { %v2948_v43 = vpack.i.bf16 %v4378_v14, %v4376_v38  ;;  %v1051_v39 = vmul.f32 %v4329_v46, %v985_v50  ;;  %v1067_v41 = vmul.f32 %v4345_v5, %v1001_v15  ;;  %v1020_v7 = vmul.f32 %v4335_v6, %v4054_v19 }
 0x38f   :  { %6557 = vst [vmem:[#allocation17_spill] sm:$0xff] %v4386_v9  ;;  %v2943_v52 = vpack.i.bf16 %v4384_v56, %v4386_v9  ;;  %v1084_v59 = vmul.f32 %v4331_v49, %v1018_v29  ;;  %v1085_v54 = vmul.f32 %v4331_v49, %v1019_v62  ;;  %v1016_v0 = vmul.f32 %v4335_v6, %v4034_v25 }
 0x390   :  { %2949 = vrot.lane.b32.xlu0 %v2948_v43, %s3405_s3  ;;  %2939 = vrot.lane.b32.xlu2 %v2948_v43, %s3403_s27  ;;  %v1117_v55 = vadd.f32 %v4333_v10, %v1051_v39  ;;  %v1133_v30 = vadd.f32 %v4359_v34, %v1067_v41  ;;  %v1086_v44 = vmul.f32 %v4331_v49, %v1020_v7 }
 0x391   :  { %2944 = vrot.lane.b32.xlu1 %v2943_v52, %s3403_s27  ;;  %v1150_v12 = vadd.f32 %v4399_v28, %v1084_v59  ;;  %v1151_v50 = vadd.f32 %v4399_v28, %v1085_v54  ;;  %v1017_v15 = vmul.f32 %v4335_v6, %v4038_v26  ;;  %v1082_v59 = vmul.f32 %v4331_v49, %v1016_v0 }
 0x392   :  { %v1165_v20 = vmax.f32 %v1117_v55, 0.0  ;;  %v1181_v19 = vmax.f32 %v1133_v30, 0.0  ;;  %v1152_v62 = vadd.f32 %v4399_v28, %v1086_v44  ;;  %v990_v26 = vmul.f32 %v4335_v6, %v4140_v3 }
 0x393   :  { %v1198_v29 = vmax.f32 %v1150_v12, 0.0  ;;  %v1083_v25 = vmul.f32 %v4331_v49, %v1017_v15  ;;  %v1199_v55 = vmax.f32 %v1151_v50, 0.0  ;;  %v991_v30 = vmul.f32 %v4335_v6, %v4158_v60 }
 0x394   :  { %v4417_v39 = vmax.f32 %v1165_v20, %v1181_v19  ;;  %v1200_v9 = vmax.f32 %v1152_v62, 0.0  ;;  %v1007_v3 = vmul.f32 %v4335_v6, %v4242_v58  ;;  %v1056_v50 = vmul.f32 %v4329_v46, %v990_v26 }
 0x395   :  { %v4419_v41 = vmax.f32 %v1182_v13, %v1198_v29  ;;  %v1148_v13 = vadd.f32 %v4399_v28, %v1082_v59  ;;  %v1149_v54 = vadd.f32 %v4399_v28, %v1083_v25  ;;  %v4434_v12 = vmax.f32 %v1183_v32, %v1199_v55 }
 0x396   :  { %v4436_v0 = vmax.f32 %v1184_v21, %v1200_v9  ;;  %v1057_v29 = vmul.f32 %v4329_v46, %v991_v30  ;;  %v1073_v32 = vmul.f32 %v4345_v5, %v1007_v3  ;;  %v1122_v21 = vadd.f32 %v4333_v10, %v1056_v50 }
 0x397   :  { %6558 = vst [vmem:[#allocation18_spill] sm:$0xff] %v4419_v41  ;;  %v2953_v7 = vpack.i.bf16 %v4419_v41, %v4417_v39  ;;  %v1196_v20 = vmax.f32 %v1148_v13, 0.0  ;;  %v1197_v44 = vmax.f32 %v1149_v54, 0.0  ;;  %v989_v25 = vmul.f32 %v4335_v6, %v4120_v31 }
 0x398   :  { %2964 = vrot.lane.b32.xlu0 %v2948_v43, %s3406_s4  ;;  %6559 = vst [vmem:[#allocation19_spill] sm:$0xff] %v4434_v12  ;;  %v1006_v43 = vmul.f32 %v4335_v6, %v4228_v42  ;;  %v2978_v15 = vpack.i.bf16 %v4436_v0, %v4434_v12  ;;  %v1123_v9 = vadd.f32 %v4333_v10, %v1057_v29  ;;  %v1170_v26 = vmax.f32 %v1122_v21, 0.0 }
 0x399   :  { %2954 = vrot.lane.b32.xlu2 %v2953_v7, %s3403_s27  ;;  %2959 = vrot.lane.b32.xlu1 %v2943_v52, %s3405_s3  ;;  %6560 = vst [vmem:[#allocation20_spill] sm:$0xff] %v4436_v0  ;;  %v4451_v42 = vmax.f32 %v1180_v23, %v1196_v20  ;;  %v4453_v58 = vmax.f32 %v1181_v19, %v1197_v44 }
 0x39a   :  { %v1072_v60 = vmul.f32 %v4345_v5, %v1006_v43  ;;  %v1139_v59 = vadd.f32 %v4359_v34, %v1073_v32  ;;  %v992_v55 = vmul.f32 %v4335_v6, %v4176_v53  ;;  %v1005_v23 = vmul.f32 %v4335_v6, %v4214_v47 }
 0x39b   :  { %6561 = vst [vmem:[#allocation21_spill] sm:$0xff] %v4451_v42  ;;  %v2993_v19 = vpack.i.bf16 %v4453_v58, %v4451_v42  ;;  %v1171_v13 = vmax.f32 %v1123_v9, 0.0  ;;  %v1055_v43 = vmul.f32 %v4329_v46, %v989_v25  ;;  %v1021_v25 = vmul.f32 %v4335_v6, %v4068_v57 }
 0x39c   :  { %6562 = vst [vmem:[#allocation22_spill] sm:$0xff] %v4453_v58  ;;  %v1138_v62 = vadd.f32 %v4359_v34, %v1072_v60  ;;  %v1187_v30 = vmax.f32 %v1139_v59, 0.0  ;;  %v1058_v31 = vmul.f32 %v4329_v46, %v992_v55  ;;  %v1071_v3 = vmul.f32 %v4345_v5, %v1005_v23  ;;  %v4906_v58 = vld [vmem:[%s6448_s9 + $0x1b8] sm:$0xff] }
 0x39d   :  { %v1121_v20 = vadd.f32 %v4333_v10, %v1055_v43  ;;  %v1023_v59 = vmul.f32 %v4335_v6, %v4088_v37  ;;  %v1024_v55 = vmul.f32 %v4335_v6, %v4098_v8 }
 0x39e   :  { %v1186_v54 = vmax.f32 %v1138_v62, 0.0  ;;  %v1124_v44 = vadd.f32 %v4333_v10, %v1058_v31  ;;  %v1137_v50 = vadd.f32 %v4359_v34, %v1071_v3  ;;  %v1022_v62 = vmul.f32 %v4335_v6, %v4074_v16 }
 0x39f   :  { %v1169_v32 = vmax.f32 %v1121_v20, 0.0  ;;  %v1090_v16 = vmul.f32 %v4331_v49, %v1024_v55 }
 0x3a0   :  { %2979 = vrot.lane.b32.xlu0 %v2978_v15, %s3403_s27  ;;  %v4476_v47 = vmax.f32 %v1170_v26, %v1186_v54  ;;  %v1172_v21 = vmax.f32 %v1124_v44, 0.0  ;;  %v1089_v26 = vmul.f32 %v4331_v49, %v1023_v59 }
 0x3a1   :  { %2969 = vrot.lane.b32.xlu2 %v2953_v7, %s3405_s3  ;;  %2974 = vrot.lane.b32.xlu1 %v2943_v52, %s3406_s4  ;;  %v1008_v52 = vmul.f32 %v4335_v6, %v4254_v2  ;;  %v4478_v2 = vmax.f32 %v1171_v13, %v1187_v30  ;;  %v1087_v13 = vmul.f32 %v4331_v49, %v1021_v25 }
 0x3a2   :  { %6563 = vst [vmem:[#allocation23_spill] sm:$0xff] %v4476_v47  ;;  %v1155_v8 = vadd.f32 %v4399_v28, %v1089_v26  ;;  %v1156_v31 = vadd.f32 %v4399_v28, %v1090_v16 }
 0x3a3   :  { %v1074_v53 = vmul.f32 %v4345_v5, %v1008_v52  ;;  %6564 = vst [vmem:[#allocation24_spill] sm:$0xff] %v4478_v2  ;;  %v3008_v60 = vpack.i.bf16 %v4478_v2, %v4476_v47  ;;  %v1153_v43 = vadd.f32 %v4399_v28, %v1087_v13  ;;  %v6601_v47 = vld [vmem:[#allocation15_spill] sm:$0xff] }
 0x3a4   :  { %v1204_v44 = vmax.f32 %v1156_v31, 0.0  ;;  %v4889_v2 = vld [vmem:[%s6448_s9 + $0xa8] sm:$0xff] }
 0x3a5   :  { %v1140_v29 = vadd.f32 %v4359_v34, %v1074_v53  ;;  %v1203_v53 = vmax.f32 %v1155_v8, 0.0  ;;  %v1201_v20 = vmax.f32 %v1153_v43, 0.0 }
 0x3a7   :  { %v1188_v9 = vmax.f32 %v1140_v29, 0.0  ;;  %v1010_v29 = vmul.f32 %v4335_v6, %v4278_v27  ;;  %v1009_v27 = vmul.f32 %v4335_v6, %v4266_v35 }
 0x3a8   :  { %2994 = vrot.lane.b32.xlu0 %v2993_v19, %s3403_s27 }
 0x3a9   :  { %2984 = vrot.lane.b32.xlu2 %v2953_v7, %s3406_s4  ;;  %2989 = vrot.lane.b32.xlu1 %v2978_v15, %s3405_s3  ;;  %v1185_v7 = vmax.f32 %v1137_v50, 0.0  ;;  %v4499_v52 = vmax.f32 %v1172_v21, %v1188_v9  ;;  %v994_v50 = vmul.f32 %v4335_v6, %v4208_v61  ;;  %v4531_v61 = vmax.f32 %v1188_v9, %v1204_v44 }
 0x3ab   :  { %v4497_v23 = vmax.f32 %v1169_v32, %v1185_v7  ;;  %6566 = vst [vmem:[#allocation26_spill] sm:$0xff] %v4499_v52  ;;  %v1011_v32 = vmul.f32 %v4335_v6, %v4286_v17  ;;  %v4529_v59 = vmax.f32 %v1185_v7, %v1201_v20  ;;  %v1012_v17 = vmul.f32 %v4335_v6, %v4294_v1 }
 0x3ac   :  { %6570 = vst [vmem:[#allocation30_spill] sm:$0xff] %v4531_v61  ;;  %v1076_v7 = vmul.f32 %v4345_v5, %v1010_v29  ;;  %v1075_v1 = vmul.f32 %v4345_v5, %v1009_v27 }
 0x3ad   :  { %6565 = vst [vmem:[#allocation25_spill] sm:$0xff] %v4497_v23  ;;  %v3018_v37 = vpack.i.bf16 %v4497_v23, %v4499_v52  ;;  %v1078_v55 = vmul.f32 %v4345_v5, %v1012_v17  ;;  %v1026_v17 = vmul.f32 %v4335_v6, %v4116_v11  ;;  %v4772_v52 = vld [vmem:[%s6448_s9 + $0x1d8] sm:$0xff]  ;;  %v4884_v23 = vld [vmem:[%s6448_s9 + $0x48] sm:$0xff] }
 0x3ae   :  { %6569 = vst [vmem:[#allocation29_spill] sm:$0xff] %v4529_v59  ;;  %v4558_v26 = vadd.f32 %v4359_v34, %v1076_v7  ;;  %v4567_v8 = vadd.f32 %v4359_v34, %v1075_v1 }
 0x3af   :  { %v4570_v43 = vadd.f32 %v4359_v34, %v1078_v55 }
 0x3b0   :  { %3009 = vrot.lane.b32.xlu0 %v3008_v60, %s3403_s27 }
 0x3b1   :  { %2999 = vrot.lane.b32.xlu2 %v2978_v15, %s3406_s4  ;;  %3004 = vrot.lane.b32.xlu1 %v2993_v19, %s3405_s3  ;;  %v1088_v15 = vmul.f32 %v4331_v49, %v1022_v62  ;;  %v4527_v62 = vmax.f32 %v1187_v30, %v1203_v53  ;;  %v6458_v29 = vmax.f32 %v4570_v43, 0.0 }
 0x3b3   :  { %v1154_v57 = vadd.f32 %v4399_v28, %v1088_v15  ;;  %6568 = vst [vmem:[#allocation28_spill] sm:$0xff] %v4527_v62 }
 0x3b5   :  { %v1202_v3 = vmax.f32 %v1154_v57, 0.0 }
 0x3b7   :  { %v4525_v21 = vmax.f32 %v1186_v54, %v1202_v3  ;;  %v1060_v54 = vmul.f32 %v4329_v46, %v994_v50  ;;  %v6461_v3 = vmax.f32 %v4558_v26, 0.0 }
 0x3b8   :  { %3024 = vrot.lane.b32.xlu0 %v3008_v60, %s3405_s3 }
 0x3b9   :  { %3014 = vrot.lane.b32.xlu2 %v2993_v19, %s3406_s4  ;;  %3019 = vrot.lane.b32.xlu1 %v3018_v37, %s3403_s27  ;;  %v995_v19 = vmul.f32 %v4335_v6, %v4222_v4  ;;  %6567 = vst [vmem:[#allocation27_spill] sm:$0xff] %v4525_v21  ;;  %v996_v4 = vmul.f32 %v4335_v6, %v4236_v33 }
 0x3ba   :  { %v3043_v9 = vpack.i.bf16 %v4527_v62, %v4525_v21  ;;  %v1077_v33 = vmul.f32 %v4345_v5, %v1011_v32  ;;  %v1126_v15 = vadd.f32 %v4333_v10, %v1060_v54  ;;  %v1027_v54 = vmul.f32 %v4335_v6, %v4136_v36  ;;  %v4794_v62 = vld [vmem:[%s6448_s9 + $0xc0] sm:$0xff] }
 0x3bb   :  { %v1061_v30 = vmul.f32 %v4329_v46, %v995_v19  ;;  %v1062_v35 = vmul.f32 %v4329_v46, %v996_v4  ;;  %v6459_v19 = vmax.f32 %v4567_v8, 0.0  ;;  %v4591_v4 = vld [vmem:[%s6448_s9 + $0x178] sm:$0xff] }
 0x3bc   :  { %v4562_v16 = vadd.f32 %v4359_v34, %v1077_v33  ;;  %v1174_v31 = vmax.f32 %v1126_v15, 0.0  ;;  %1740 = vmatpush.msra.mxu2 %v4591_v4  ;;  %v1092_v33 = vmul.f32 %v4331_v49, %v1026_v17  ;;  %v4631_v15 = vld [vmem:[%s6448_s9 + $0x170] sm:$0xff]  ;;  %v4669_v17 = vld [vmem:[%s6448_s9 + $0x78] sm:$0xff] }
 0x3bd   :  { %v1127_v13 = vadd.f32 %v4333_v10, %v1061_v30  ;;  %v1128_v57 = vadd.f32 %v4333_v10, %v1062_v35  ;;  %6578 = vst [vmem:[#allocation36_spill] sm:$0xff] %v4631_v15  ;;  %1694 = vmatpush.msra.mxu0 %v4669_v17 }
 0x3be   :  { %v6460_v20 = vmax.f32 %v4562_v16, 0.0  ;;  %v4581_v32 = vmax.f32 %v1174_v31, %v6461_v3  ;;  %v4655_v31 = vld [vmem:[%s6448_s9 + $0xe0] sm:$0xff]  ;;  %1741 = vmatpush.msra.mxu2 %v4631_v15  ;;  %6581 = vst [vmem:[#allocation39_spill] sm:$0xff] %v4669_v17 }
 0x3bf   :  { %v1175_v53 = vmax.f32 %v1127_v13, 0.0  ;;  %v1176_v50 = vmax.f32 %v1128_v57, 0.0  ;;  %v4636_v13 = vld [vmem:[%s6448_s9 + $0xe8] sm:$0xff] }
 0x3c0   :  { %3039 = vrot.lane.b32.xlu0 %v3018_v37, %s3406_s4  ;;  %6571 = vst [vmem:[#allocation31_spill] sm:$0xff] %v4581_v32  ;;  %v4650_v57 = vld [vmem:[%s6448_s9 + $0x168] sm:$0xff] }
 0x3c1   :  { %3029 = vrot.lane.b32.xlu2 %v3018_v37, %s3405_s3  ;;  %3034 = vrot.lane.b32.xlu1 %v3008_v60, %s3406_s4  ;;  %v993_v60 = vmul.f32 %v4335_v6, %v4194_v45  ;;  %v3048_v45 = vpack.i.bf16 %v4529_v59, %v4531_v61  ;;  %v4595_v27 = vmax.f32 %v1175_v53, %v6460_v20  ;;  %v4720_v61 = vld [vmem:[%s6448_s9 + $0x150] sm:$0xff] }
 0x3c2   :  { %v4609_v7 = vmax.f32 %v1176_v50, %v6458_v29  ;;  %6579 = vst [vmem:[#allocation37_spill] sm:$0xff] %v4636_v13  ;;  %v1158_v53 = vadd.f32 %v4399_v28, %v1092_v33  ;;  %v4664_v50 = vld [vmem:[%s6448_s9 + $0x1f0] sm:$0xff]  ;;  %1742 = vmatpush.msra.mxu2 %v4650_v57  ;;  %v4690_v33 = vld [vmem:[%s6448_s9 + $0x1e8] sm:$0xff] }
 0x3c3   :  { %v1059_v25 = vmul.f32 %v4329_v46, %v993_v60  ;;  %v4586_v60 = vld [vmem:[%s6448_s9 + $0xf8] sm:$0xff]  ;;  %6573 = vst [vmem:[#allocation33_spill] sm:$0xff] %v4595_v27  ;;  %v3083_v36 = vpack.i.bf16 %v4595_v27, %v4581_v32  ;;  %v1013_v32 = vmul.f32 %v4335_v6, %v4300_v22  ;;  %v4750_v27 = vld [vmem:[%s6448_s9 + $0xc8] sm:$0xff]  ;;  %v1030_v22 = vmul.f32 %v4335_v6, %v4172_v48 }
 0x3c4   :  { %6572 = vst [vmem:[#allocation32_spill] sm:$0xff] %v4586_v60  ;;  %1717 = vmatpush.msra.mxu1 %v4586_v60  ;;  %v1206_v29 = vmax.f32 %v1158_v53, 0.0  ;;  %v998_v53 = vmul.f32 %v4335_v6, %v4260_v51  ;;  %v1014_v51 = vmul.f32 %v4335_v6, %v4306_v63  ;;  %v6591_v63 = vmax.f32 %v4562_v16, 0.0 }
 0x3c5   :  { %v1125_v37 = vadd.f32 %v4333_v10, %v1059_v25  ;;  %6575 = vst [vmem:[#allocation35_spill] sm:$0xff] %v4609_v7  ;;  %v1093_v25 = vmul.f32 %v4331_v49, %v1027_v54  ;;  %v6593_v16 = vmax.f32 %v4567_v8, 0.0  ;;  %v6595_v48 = vmax.f32 %v4570_v43, 0.0  ;;  %v4799_v8 = vld [vmem:[%s6448_s9 + $0x140] sm:$0xff]  ;;  %v4806_v43 = vld [vmem:[%s6448_s9 + $0x1d0] sm:$0xff] }
 0x3c6   :  { %6580 = vst [vmem:[#allocation38_spill] sm:$0xff] %v4650_v57  ;;  %v1096_v21 = vmul.f32 %v4331_v49, %v1030_v22  ;;  %v4839_v22 = vld [vmem:[%s6448_s9 + $0x1c8] sm:$0xff] }
 0x3c7   :  { %v1173_v44 = vmax.f32 %v1125_v37, 0.0  ;;  %v4643_v37 = vld [vmem:[%s6448_s9 + $0x1f8] sm:$0xff]  ;;  %6584 = vst [vmem:[#allocation42_spill] sm:$0xff] %v4690_v33 }
 0x3c8   :  { %3054 = vrot.lane.b32.xlu0 %v3043_v9, %s3405_s3  ;;  %1763 = vmatpush.msra.mxu3 %v4643_v37  ;;  %v1162_v0 = vadd.f32 %v4399_v28, %v1096_v21 }
 0x3c9   :  { %3044 = vrot.lane.b32.xlu2 %v3043_v9, %s3403_s27  ;;  %3049 = vrot.lane.b32.xlu1 %v3048_v45, %s3403_s27  ;;  %v4605_v30 = vmax.f32 %v1173_v44, %v6459_v19  ;;  %v1159_v44 = vadd.f32 %v4399_v28, %v1093_v25  ;;  %v4695_v25 = vld [vmem:[%s6448_s9 + $0x70] sm:$0xff] }
 0x3ca   :  { %6585 = vst [vmem:[#allocation43_spill] sm:$0xff] %v4695_v25  ;;  %1764 = vmatpush.msra.mxu3 %v4664_v50  ;;  %1695 = vmatpush.msra.mxu0 %v4695_v25  ;;  %v1210_v12 = vmax.f32 %v1162_v0, 0.0  ;;  %v4938_v0 = vld [vmem:[%s6448_s9 + $0x1b0] sm:$0xff] }
 0x3cb   :  { %6574 = vst [vmem:[#allocation34_spill] sm:$0xff] %v4605_v30  ;;  %v3078_v35 = vpack.i.bf16 %v4605_v30, %v4609_v7  ;;  %v1207_v19 = vmax.f32 %v1159_v44, 0.0  ;;  %v4715_v7 = vld [vmem:[%s6448_s9 + $0xd0] sm:$0xff]  ;;  %v999_v44 = vmul.f32 %v4335_v6, %v4272_v40  ;;  %v997_v40 = vmul.f32 %v4335_v6, %v4248_v18 }
 0x3cc   :  { %1765 = vmatpush.msra.mxu3 %v4690_v33 }
 0x3cd   :  { %v4763_v18 = vmax.f32 %v6591_v63, %v1207_v19 }
 0x3cf   :  { %6592 = vst [vmem:[#allocation48_spill] sm:$0xff] %v4763_v18 }
 0x3d0   :  { %3069 = vrot.lane.b32.xlu0 %v3048_v45, %s3406_s4 }
 0x3d1   :  { %3059 = vrot.lane.b32.xlu2 %v3048_v45, %s3405_s3  ;;  %3064 = vrot.lane.b32.xlu1 %v3043_v9, %s3406_s4  ;;  %v1025_v9 = vmul.f32 %v4335_v6, %v4110_v24  ;;  %v6576_v45 = vld [vmem:[#allocation13_spill] sm:$0xff]  ;;  %v4626_v24 = vld [vmem:[%s6448_s9 + $0xf0] sm:$0xff] }
 0x3d2   :  { %v1028_v11 = vmul.f32 %v4335_v6, %v6576_v45  ;;  %6577 = vst [vmem:[#allocation13_spill] sm:$0xff] %v4626_v24  ;;  %1718 = vmatpush.msra.mxu1 %v4626_v24  ;;  %v4677_v45 = vld [vmem:[%s6448_s9 + $0x160] sm:$0xff] }
 0x3d3   :  { %v1091_v1 = vmul.f32 %v4331_v49, %v1025_v9  ;;  %6582 = vst [vmem:[#allocation40_spill] sm:$0xff] %v4677_v45  ;;  %1743 = vmatpush.msra.mxu2 %v4677_v45 }
 0x3d4   :  { %v1094_v55 = vmul.f32 %v4331_v49, %v1028_v11  ;;  %1719 = vmatpush.msra.mxu1 %v4636_v13  ;;  %v4683_v11 = vld [vmem:[%s6448_s9 + $0xd8] sm:$0xff] }
 0x3d5   :  { %v1157_v54 = vadd.f32 %v4399_v28, %v1091_v1  ;;  %6583 = vst [vmem:[#allocation41_spill] sm:$0xff] %v4683_v11  ;;  %v4701_v1 = vld [vmem:[%s6448_s9 + $0x158] sm:$0xff] }
 0x3d6   :  { %v1160_v9 = vadd.f32 %v4399_v28, %v1094_v55  ;;  %1720 = vmatpush.msra.mxu1 %v4655_v31  ;;  %6586 = vst [vmem:[#allocation44_spill] sm:$0xff] %v4701_v1  ;;  %v4707_v55 = vld [vmem:[%s6448_s9 + $0x68] sm:$0xff]  ;;  %1744 = vmatpush.msra.mxu2 %v4701_v1 }
 0x3d7   :  { %6587 = vst [vmem:[#allocation45_spill] sm:$0xff] %v4707_v55  ;;  %v1205_v20 = vmax.f32 %v1157_v54, 0.0  ;;  %1696 = vmatpush.msra.mxu0 %v4707_v55  ;;  %v4732_v54 = vld [vmem:[%s6448_s9 + $0x1e0] sm:$0xff] }
 0x3d8   :  { %3084 = vrot.lane.b32.xlu0 %v3083_v36, %s3405_s3  ;;  %1721 = vmatpush.msra.mxu1 %v4683_v11  ;;  %v1208_v3 = vmax.f32 %v1160_v9, 0.0  ;;  %6588 = vst [vmem:[#allocation46_spill] sm:$0xff] %v4732_v54  ;;  %v4737_v9 = vld [vmem:[%s6448_s9 + $0x60] sm:$0xff] }
 0x3d9   :  { %3074 = vrot.lane.b32.xlu2 %v3083_v36, %s3403_s27  ;;  %3079 = vrot.lane.b32.xlu1 %v3078_v35, %s3403_s27  ;;  %v4781_v19 = vmax.f32 %v6593_v16, %v1205_v20  ;;  %v1063_v20 = vmul.f32 %v4329_v46, %v997_v40  ;;  %v1079_v16 = vmul.f32 %v4345_v5, %v1013_v32 }
 0x3da   :  { %1722 = vmatpush.msra.mxu1 %v4715_v7  ;;  %1745 = vmatpush.msra.mxu2 %v4720_v61  ;;  %v1065_v40 = vmul.f32 %v4329_v46, %v999_v44 }
 0x3db   :  { %6594 = vst [vmem:[#allocation49_spill] sm:$0xff] %v4781_v19  ;;  %1766 = vmatpush.msra.mxu3 %v4732_v54  ;;  %1697 = vmatpush.msra.mxu0 %v4737_v9  ;;  %v1129_v44 = vadd.f32 %v4333_v10, %v1063_v20 }
 0x3dc   :  { %1723 = vmatpush.msra.mxu1 %v4750_v27 }
 0x3dd   :  { %1767 = vmatpush.msra.mxu3 %v4772_v52 }
 0x3de   :  { %1724 = vmatpush.msra.mxu1 %v4794_v62 }
 0x3df   :  { %1768 = vmatpush.msra.mxu3 %v4806_v43 }
 0x3e0   :  { %3099 = vrot.lane.b32.xlu0 %v3078_v35, %s3406_s4 }
 0x3e1   :  { %3089 = vrot.lane.b32.xlu2 %v3078_v35, %s3405_s3  ;;  %3094 = vrot.lane.b32.xlu1 %v3083_v36, %s3406_s4  ;;  %v4755_v35 = vld [vmem:[%s6448_s9 + $0x148] sm:$0xff]  ;;  %v6589_v36 = vmax.f32 %v4558_v26, 0.0  ;;  %v4777_v26 = vld [vmem:[%s6448_s9 + $0x58] sm:$0xff] }
 0x3e2   :  { %1746 = vmatpush.msra.mxu2 %v4755_v35  ;;  %1698 = vmatpush.msra.mxu0 %v4777_v26 }
 0x3e3   :  { %v4759_v30 = vmax.f32 %v6589_v36, %v1206_v29  ;;  %v4785_v29 = vmax.f32 %v6595_v48, %v1208_v3  ;;  %v6597_v36 = vld [vmem:[#allocation16_spill] sm:$0xff]  ;;  %v1080_v3 = vmul.f32 %v4345_v5, %v1014_v51  ;;  %v4816_v48 = vld [vmem:[%s6448_s9 + $0xb8] sm:$0xff]  ;;  %v1064_v51 = vmul.f32 %v4329_v46, %v998_v53  ;;  %1769 = vmatpush.msra.mxu3 %v4839_v22 }
 0x3e4   :  { %v1015_v63 = vmul.f32 %v4335_v6, %v6597_v36  ;;  %6598 = vst [vmem:[#allocation16_spill] sm:$0xff] %v4816_v48  ;;  %1747 = vmatpush.msra.mxu2 %v4799_v8  ;;  %1725 = vmatpush.msra.mxu1 %v4816_v48  ;;  %v4847_v46 = vld [vmem:[%s6448_s9 + $0x50] sm:$0xff] }
 0x3e5   :  { %6590 = vst [vmem:[#allocation47_spill] sm:$0xff] %v4759_v30  ;;  %v4820_v36 = vpack.i.bf16 %v4763_v18, %v4759_v30  ;;  %v3108_v32 = vpack.i.bf16 %v4781_v19, %v4785_v29  ;;  %v4834_v18 = vld [vmem:[%s6448_s9 + $0x138] sm:$0xff]  ;;  %v1146_v53 = vadd.f32 %v4359_v34, %v1080_v3  ;;  %v4870_v30 = vld [vmem:[%s6448_s9 + $0x1c0] sm:$0xff]  ;;  %v1130_v21 = vadd.f32 %v4333_v10, %v1064_v51 }
 0x3e6   :  { %6596 = vst [vmem:[#allocation50_spill] sm:$0xff] %v4785_v29  ;;  %v1081_v59 = vmul.f32 %v4345_v5, %v1015_v63  ;;  %v4852_v5 = vld [vmem:[%s6448_s9 + $0xb0] sm:$0xff]  ;;  %v4860_v63 = vadd.f32 %v4359_v34, %v1079_v16  ;;  %v6600_v3 = vld [vmem:[#allocation14_spill] sm:$0xff]  ;;  %v1031_v16 = vmul.f32 %v4335_v6, %v6601_v47  ;;  %1748 = vmatpush.msra.mxu2 %v4834_v18  ;;  %v4901_v47 = vld [vmem:[%s6448_s9 + $0x128] sm:$0xff] }
 0x3e7   :  { %6599 = vst [vmem:[#allocation51_spill] sm:$0xff] %v4852_v5  ;;  %v4865_v29 = vld [vmem:[%s6448_s9 + $0x130] sm:$0xff]  ;;  %v1029_v20 = vmul.f32 %v4335_v6, %v6600_v3  ;;  %v1131_v3 = vadd.f32 %v4333_v10, %v1065_v40  ;;  %1699 = vmatpush.msra.mxu0 %v4847_v46  ;;  %1726 = vmatpush.msra.mxu1 %v4852_v5  ;;  %v4913_v10 = vld [vmem:[%s6448_s9 + $0x40] sm:$0xff]  ;;  %v1194_v42 = vmax.f32 %v1146_v53, 0.0  ;;  %v4950_v53 = vld [vmem:[%s6448_s9 + $0x98] sm:$0xff] }
 0x3e8   :  { %3114 = vrot.lane.b32.xlu0 %v4820_v36, %s3405_s3  ;;  %6602 = vst [vmem:[#allocation14_spill] sm:$0xff] %v4889_v2  ;;  %v4894_v6 = vadd.f32 %v4359_v34, %v1081_v59  ;;  %1749 = vmatpush.msra.mxu2 %v4865_v29  ;;  %v4918_v34 = vld [vmem:[%s6448_s9 + $0xa0] sm:$0xff]  ;;  %v1177_v59 = vmax.f32 %v1129_v44, 0.0  ;;  %v1097_v5 = vmul.f32 %v4331_v49, %v1031_v16  ;;  %v1178_v44 = vmax.f32 %v1130_v21, 0.0 }
 0x3e9   :  { %3104 = vrot.lane.b32.xlu2 %v4820_v36, %s3403_s27  ;;  %3109 = vrot.lane.b32.xlu1 %v3108_v32, %s3403_s27  ;;  %6603 = vst [vmem:[#allocation15_spill] sm:$0xff] %v4918_v34  ;;  %v4926_v40 = vld [vmem:[%s6448_s9 + $0x120] sm:$0xff]  ;;  %v1095_v41 = vmul.f32 %v4331_v49, %v1029_v20  ;;  %v1179_v51 = vmax.f32 %v1131_v3, 0.0  ;;  %v4943_v49 = vld [vmem:[%s6448_s9 + $0x38] sm:$0xff]  ;;  %v6607_v16 = vmax.f32 %v4860_v63, 0.0 }
 0x3ea   :  { %v4872_v19 = vpop.permute.xlu2 %2939  ;;  %1770 = vmatpush.msra.mxu3 %v4870_v30  ;;  %1700 = vmatpush.msra.mxu0 %v4884_v23  ;;  %6604 = vst [vmem:[#allocation52_spill] sm:$0xff] %v4926_v40  ;;  %v1195_v48 = vmax.f32 %v4894_v6, 0.0  ;;  %v4955_v20 = vld [vmem:[%s6448_s9 + $0x118] sm:$0xff]  ;;  %v4967_v3 = vld [vmem:[%s6448_s9 + $0x1a8] sm:$0xff]  ;;  %v4972_v6 = vld [vmem:[%s6448_s9 + $0x30] sm:$0xff] }
 0x3eb   :  { %1727 = vmatpush.msra.mxu1 %v4889_v2  ;;  %1750 = vmatpush.msra.mxu2 %v4901_v47  ;;  %6605 = vst [vmem:[#allocation53_spill] sm:$0xff] %v4950_v53  ;;  %v4962_v21 = vmax.f32 %v1177_v59, %v6607_v16  ;;  %v4983_v59 = vld [vmem:[%s6448_s9 + $0x90] sm:$0xff]  ;;  %v4992_v2 = vmax.f32 %v1178_v44, %v1194_v42  ;;  %v5025_v44 = vld [vmem:[%s6448_s9 + $0x198] sm:$0xff] }
 0x3ec   :  { %1771 = vmatpush.msra.mxu3 %v4906_v58  ;;  %1701 = vmatpush.msra.mxu0 %v4913_v10  ;;  %6606 = vst [vmem:[#allocation54_spill] sm:$0xff] %v4955_v20  ;;  %v4988_v16 = vld [vmem:[%s6448_s9 + $0x110] sm:$0xff] }
 0x3ed   :  { %1728 = vmatpush.msra.mxu1 %v4918_v34  ;;  %1751 = vmatpush.msra.mxu2 %v4926_v40  ;;  %6608 = vst [vmem:[#allocation55_spill] sm:$0xff] %v4962_v21  ;;  %v4974_v34 = vmax.f32 %v1194_v42, %v1210_v12  ;;  %v5013_v42 = vld [vmem:[%s6448_s9 + $0x88] sm:$0xff] }
 0x3ee   :  { %6609 = vst [vmem:[#allocation56_spill] sm:$0xff] %v4972_v6  ;;  %1772 = vmatpush.msra.mxu3 %v4938_v0  ;;  %1702 = vmatpush.msra.mxu0 %v4943_v49 }
 0x3ef   :  { %6610 = vst [vmem:[#allocation57_spill] sm:$0xff] %v4974_v34  ;;  %1729 = vmatpush.msra.mxu1 %v4950_v53  ;;  %1752 = vmatpush.msra.mxu2 %v4955_v20  ;;  %v5029_v53 = vpack.i.bf16 %v4974_v34, %v4962_v21  ;;  %v5058_v34 = vld [vmem:[%s6448_s9 + $0x190] sm:$0xff]  ;;  %v5065_v21 = vld [vmem:[%s6448_s9 + $0x18] sm:$0xff] }
 0x3f0   :  { %3129 = vrot.lane.b32.xlu0 %v3108_v32, %s3406_s4  ;;  %6611 = vst [vmem:[#allocation58_spill] sm:$0xff] %v4983_v59  ;;  %1773 = vmatpush.msra.mxu3 %v4967_v3 }
 0x3f1   :  { %3119 = vrot.lane.b32.xlu2 %v3108_v32, %s3405_s3  ;;  %3124 = vrot.lane.b32.xlu1 %v4820_v36, %s3406_s4  ;;  %v1161_v32 = vadd.f32 %v4399_v28, %v1095_v41  ;;  %v1163_v36 = vadd.f32 %v4399_v28, %v1097_v5  ;;  %6612 = vst [vmem:[#allocation59_spill] sm:$0xff] %v4988_v16  ;;  %v5001_v28 = vld [vmem:[%s6448_s9 + $0x1a0] sm:$0xff]  ;;  %v5006_v5 = vld [vmem:[%s6448_s9 + $0x28] sm:$0xff] }
 0x3f2   :  { %6613 = vst [vmem:[#allocation60_spill] sm:$0xff] %v4992_v2  ;;  %v4994_v41 = vmax.f32 %v1179_v51, %v1195_v48  ;;  %1703 = vmatpush.msra.mxu0 %v4972_v6  ;;  %v5018_v51 = vld [vmem:[%s6448_s9 + $0x108] sm:$0xff]  ;;  %1730 = vmatpush.msra.mxu1 %v4983_v59 }
 0x3f3   :  { %v4990_v12 = vpop.permute.xlu2 %2954  ;;  %6615 = vst [vmem:[#allocation62_spill] sm:$0xff] %v5001_v28  ;;  %1753 = vmatpush.msra.mxu2 %v4988_v16  ;;  %v1209_v20 = vmax.f32 %v1161_v32, 0.0  ;;  %v1211_v40 = vmax.f32 %v1163_v36, 0.0  ;;  %1774 = vmatpush.msra.mxu3 %v5001_v28  ;;  %v5040_v16 = vld [vmem:[%s6448_s9 + $0x20] sm:$0xff] }
 0x3f4   :  { %6614 = vst [vmem:[#allocation61_spill] sm:$0xff] %v4994_v41  ;;  %1704 = vmatpush.msra.mxu0 %v5006_v5  ;;  %v3133_v59 = vpack.i.bf16 %v4994_v41, %v4992_v2  ;;  %1731 = vmatpush.msra.mxu1 %v5013_v42  ;;  %v5045_v32 = vld [vmem:[%s6448_s9 + $0x80] sm:$0xff]  ;;  %v6622_v41 = vmax.f32 %v4860_v63, 0.0 }
 0x3f5   :  { %6616 = vst [vmem:[#allocation63_spill] sm:$0xff] %v5006_v5  ;;  %1754 = vmatpush.msra.mxu2 %v5018_v51  ;;  %1775 = vmatpush.msra.mxu3 %v5025_v44  ;;  %v5053_v36 = vld [vmem:[%s6448_s9 + $0x100] sm:$0xff] }
 0x3f6   :  { %6617 = vst [vmem:[#allocation64_spill] sm:$0xff] %v5013_v42  ;;  %v5069_v2 = vmax.f32 %v6622_v41, %v1209_v20  ;;  %v5071_v42 = vmax.f32 %v1195_v48, %v1211_v40  ;;  %1705 = vmatpush.msra.mxu0 %v5040_v16  ;;  %1732 = vmatpush.msra.mxu1 %v5045_v32  ;;  %v5087_v48 = vld [vmem:[%s6448_s9 + $0x10] sm:$0xff]  ;;  %v5093_v63 = vld [vmem:[%s6448_s9 + $0x180] sm:$0xff]  ;;  %v5100_v40 = vld [vmem:[%s6448_s9 + $0x8] sm:$0xff] }
 0x3f7   :  { %6618 = vst [vmem:[#allocation65_spill] sm:$0xff] %v5018_v51  ;;  %v5078_v51 = vld [vmem:[%s6448_s9 + $0x188] sm:$0xff]  ;;  %1755 = vmatpush.msra.mxu2 %v5053_v36  ;;  %1776 = vmatpush.msra.mxu3 %v5058_v34  ;;  %v5111_v41 = vld [vmem:[%s6448_s9] sm:$0xff] }
 0x3f8   :  { %6619 = vst [vmem:[#allocation66_spill] sm:$0xff] %v5025_v44  ;;  %3144 = vrot.lane.b32.xlu0 %v5029_v53, %s3403_s27  ;;  %1706 = vmatpush.msra.mxu0 %v5065_v21  ;;  %v3158_v20 = vpack.i.bf16 %v5069_v2, %v5071_v42 }
 0x3f9   :  { %6620 = vst [vmem:[#allocation67_spill] sm:$0xff] %v5045_v32  ;;  %3134 = vrot.lane.b32.xlu2 %v3133_v59, %s3403_s27  ;;  %3139 = vrot.lane.b32.xlu1 %v3133_v59, %s3405_s3  ;;  %v2942_v32 = vunpack.i.h.bf16 %v4872_v19 }
 0x3fa   :  { %6621 = vst [vmem:[#allocation68_spill] sm:$0xff] %v5065_v21  ;;  %1832 = vmatpush.msrb.mxu2 %v4591_v4  ;;  %1777 = vmatpush.msra.mxu3 %v5078_v51 }
 0x3fb   :  { %6623 = vst [vmem:[#allocation69_spill] sm:$0xff] %v5069_v2  ;;  %v5080_v44 = vpop.permute.xlu2 %2969  ;;  %1809 = vmatpush.msrb.mxu1 %v4586_v60  ;;  %1707 = vmatpush.msra.mxu0 %v5087_v48 }
 0x3fc   :  { %6624 = vst [vmem:[#allocation70_spill] sm:$0xff] %v5071_v42  ;;  %1833 = vmatpush.msrb.mxu2 %v4631_v15  ;;  %1778 = vmatpush.msra.mxu3 %v5093_v63  ;;  %v2941_v15 = vunpack.i.l.bf16 %v4872_v19  ;;  %v6629_v19 = vld [vmem:[#allocation12_spill] sm:$0xff] }
 0x3fd   :  { %6625 = vst [vmem:[#allocation71_spill] sm:$0xff] %v5087_v48  ;;  %1810 = vmatpush.msrb.mxu1 %v4626_v24  ;;  %1708 = vmatpush.msra.mxu0 %v5100_v40  ;;  %v2956_v24 = vunpack.i.l.bf16 %v4990_v12  ;;  %vm1436_vm10 = vcmp.lt.s32.totalorder %v6629_v19, 126  ;;  %vm1565_vm11 = vcmp.lt.s32.totalorder %v6629_v19, 125 }
 0x3fe   :  { %6626 = vst [vmem:[#allocation72_spill] sm:$0xff] %v5100_v40  ;;  %1855 = vmatpush.msrb.mxu3 %v4643_v37  ;;  %1834 = vmatpush.msrb.mxu2 %v4650_v57 }
 0x3ff   :  { %6627 = vst [vmem:[#allocation73_spill] sm:$0xff] %v5111_v41  ;;  %1709 = vmatpush.msra.mxu0 %v5111_v41  ;;  %1811 = vmatpush.msrb.mxu1 %v4636_v13  ;;  %v1334_v57 = vsel %vm279_vm0, %v2956_v24, %v2941_v15  ;;  %v2971_v13 = vunpack.i.l.bf16 %v5080_v44 }
 0x400   :  { %3159 = vrot.lane.b32.xlu0 %v3158_v20, %s3403_s27  ;;  %1856 = vmatpush.msrb.mxu3 %v4664_v50 }
 0x401   :  { %3149 = vrot.lane.b32.xlu2 %v3133_v59, %s3406_s4  ;;  %3154 = vrot.lane.b32.xlu1 %v5029_v53, %s3405_s3 }
 0x402   :  { %v5119_v60 = vpop.permute.xlu0 %2949  ;;  %1786 = vmatpush.msrb.mxu0 %v4669_v17  ;;  %1835 = vmatpush.msrb.mxu2 %v4677_v45  ;;  %v1332_v17 = vsel %vm279_vm0, %v2941_v15, %v2942_v32 }
 0x403   :  { %v5126_v20 = vpop.permute.xlu2 %2984  ;;  %v5128_v40 = vpop.permute.xlu1 %2944  ;;  %v2952_v59 = vunpack.i.h.bf16 %v5119_v60  ;;  %v2951_v41 = vunpack.i.l.bf16 %v5119_v60  ;;  %1857 = vmatpush.msrb.mxu3 %v4690_v33  ;;  %v1342_v15 = vmax.f32 %v4376_v38, %v1332_v17  ;;  %1812 = vmatpush.msrb.mxu1 %v4655_v31 }
 0x404   :  { %6628 = vst [vmem:[#allocation74_spill] sm:$0xff] %v5128_v40  ;;  %1787 = vmatpush.msrb.mxu0 %v4695_v25  ;;  %1836 = vmatpush.msrb.mxu2 %v4701_v1 }
 0x405   :  { %1858 = vmatpush.msrb.mxu3 %v4732_v54  ;;  %v1461_v60 = vsel %vm1436_vm10, %v2951_v41, %v2952_v59  ;;  %v1463_v25 = vsel %vm1436_vm10, %v2971_v13, %v2951_v41  ;;  %v2986_v54 = vunpack.i.l.bf16 %v5126_v20  ;;  %1813 = vmatpush.msrb.mxu1 %v4683_v11 }
 0x406   :  { %1788 = vmatpush.msrb.mxu0 %v4707_v55  ;;  %v1341_v55 = vmax.f32 %v4417_v39, %v1334_v57  ;;  %1837 = vmatpush.msrb.mxu2 %v4720_v61  ;;  %v1471_v39 = vmax.f32 %v1342_v15, %v1461_v60  ;;  %v6533_v57 = vunpack.i.h.bf16 %v5128_v40 }
 0x407   :  { %1859 = vmatpush.msrb.mxu3 %v4772_v52  ;;  %1814 = vmatpush.msrb.mxu1 %v4715_v7 }
 0x408   :  { %1563 = vrot.lane.b32.xlu0 %v5071_v42, %s3406_s4  ;;  %1789 = vmatpush.msrb.mxu0 %v4737_v9  ;;  %v1470_v38 = vmax.f32 %v1341_v55, %v1463_v25  ;;  %v1336_v17 = vsel %vm279_vm0, %v6533_v57, %v2956_v24  ;;  %v6637_v57 = vld [vmem:[#allocation18_spill] sm:$0xff] }
 0x409   :  { %3164 = vrot.lane.b32.xlu2 %v5029_v53, %s3406_s4  ;;  %1434 = vrot.lane.b32.xlu1 %v5071_v42, %s3405_s3 }
 0x40a   :  { %v2965_v1 = vpop.permute.xlu0 %2964  ;;  %1860 = vmatpush.msrb.mxu3 %v4806_v43  ;;  %1790 = vmatpush.msrb.mxu0 %v4777_v26 }
 0x40b   :  { %v2967_v41 = vunpack.i.h.bf16 %v2965_v1  ;;  %v2966_v45 = vunpack.i.l.bf16 %v2965_v1  ;;  %v5164_v33 = vpop.permute.xlu2 %2999  ;;  %v5166_v53 = vpop.permute.xlu1 %2959  ;;  %1838 = vmatpush.msrb.mxu2 %v4755_v35  ;;  %1815 = vmatpush.msrb.mxu1 %v4750_v27 }
 0x40c   :  { %v6532_v60 = vunpack.i.h.bf16 %v5166_v53  ;;  %v6536_v15 = vunpack.i.l.bf16 %v5166_v53  ;;  %1861 = vmatpush.msrb.mxu3 %v4839_v22  ;;  %1791 = vmatpush.msrb.mxu0 %v4847_v46 }
 0x40d   :  { %v1590_v1 = vsel %vm1565_vm11, %v2966_v45, %v2967_v41  ;;  %v1592_v42 = vsel %vm1565_vm11, %v2986_v54, %v2966_v45  ;;  %v6630_v45 = vunpack.i.l.bf16 %v5128_v40  ;;  %1839 = vmatpush.msrb.mxu2 %v4799_v8  ;;  %1816 = vmatpush.msrb.mxu1 %v4794_v62 }
 0x40e   :  { %v1599_v25 = vmax.f32 %v1470_v38, %v1592_v42  ;;  %v1600_v55 = vmax.f32 %v1471_v39, %v1590_v1  ;;  %v1465_v42 = vsel %vm1436_vm10, %v6532_v60, %v2971_v13  ;;  %v1459_v24 = vsel %vm1436_vm10, %v2952_v59, %v6536_v15  ;;  %1862 = vmatpush.msrb.mxu3 %v4870_v30  ;;  %v6636_v60 = vld [vmem:[#allocation52_spill] sm:$0xff] }
 0x40f   :  { %v1330_v11 = vsel %vm279_vm0, %v2942_v32, %v6630_v45  ;;  %v1340_v32 = vmax.f32 %v4384_v56, %v1336_v17  ;;  %1792 = vmatpush.msrb.mxu0 %v4884_v23  ;;  %1840 = vmatpush.msrb.mxu2 %v4834_v18 }
 0x410   :  { %1733 = vmatmul.f32.vlgmr.msra.gmra.mxu1 %v1599_v25  ;;  %1756 = vmatmul.f32.vlgmr.msra.gmra.mxu2 %v1600_v55  ;;  %v1343_v39 = vmax.f32 %v4378_v14, %v1330_v11 }
 0x411   :  { %1426 = vrot.lane.b32.xlu2 %v5069_v2, %s3405_s3  ;;  %1555 = vrot.lane.b32.xlu1 %v5069_v2, %s3406_s4  ;;  %v1469_v55 = vmax.f32 %v1340_v32, %v1465_v42  ;;  %v2957_v32 = vunpack.i.h.bf16 %v4990_v12  ;;  %v2972_v12 = vunpack.i.h.bf16 %v5080_v44  ;;  %v2987_v44 = vunpack.i.h.bf16 %v5126_v20  ;;  %v6639_v2 = vld [vmem:[#allocation14_spill] sm:$0xff] }
 0x412   :  { %v5204_v38 = vpop.permute.xlu0 %2979  ;;  %v1472_v56 = vmax.f32 %v1343_v39, %v1459_v24  ;;  %1863 = vmatpush.msrb.mxu3 %v4906_v58  ;;  %1793 = vmatpush.msrb.mxu0 %v4913_v10  ;;  %v6632_v39 = vld [vmem:[#allocation16_spill] sm:$0xff] }
 0x413   :  { %v5210_v1 = vpop.permute.xlu2 %3014  ;;  %v5212_v25 = vpop.permute.xlu1 %2974  ;;  %v6534_v14 = vunpack.i.h.bf16 %v5204_v38  ;;  %v2981_v11 = vunpack.i.l.bf16 %v5204_v38  ;;  %1841 = vmatpush.msrb.mxu2 %v4865_v29  ;;  %1817 = vmatpush.msrb.mxu1 %v6632_v39 }
 0x414   :  { %6631 = vst [vmem:[#allocation12_spill] sm:$0xff] %v5210_v1  ;;  %v6531_v13 = vunpack.i.h.bf16 %v5212_v25  ;;  %v6535_v59 = vunpack.i.l.bf16 %v5212_v25  ;;  %1864 = vmatpush.msrb.mxu3 %v4938_v0  ;;  %1794 = vmatpush.msrb.mxu0 %v4943_v49 }
 0x415   :  { %1842 = vmatpush.msrb.mxu2 %v4901_v47 }
 0x416   :  { %v1594_v17 = vsel %vm1565_vm11, %v6531_v13, %v2986_v54  ;;  %v1588_v45 = vsel %vm1565_vm11, %v2967_v41, %v6535_v59  ;;  %v1331_v54 = vsel %vm279_vm0, %v2981_v11, %v6534_v14  ;;  %v1333_v41 = vsel %vm279_vm0, %v2957_v32, %v2981_v11  ;;  %1865 = vmatpush.msrb.mxu3 %v4967_v3  ;;  %v6638_v59 = vld [vmem:[#allocation19_spill] sm:$0xff] }
 0x417   :  { %v1598_v42 = vmax.f32 %v1469_v55, %v1594_v17  ;;  %v1601_v24 = vmax.f32 %v1472_v56, %v1588_v45  ;;  %1795 = vmatpush.msrb.mxu0 %v4972_v6  ;;  %v6635_v45 = vld [vmem:[#allocation51_spill] sm:$0xff]  ;;  %v3001_v11 = vunpack.i.l.bf16 %v5164_v33  ;;  %1843 = vmatpush.msrb.mxu2 %v6636_v60  ;;  %v1358_v14 = vmax.f32 %v6637_v57, %v1333_v41 }
 0x418   :  { %1818 = vmatpush.msrb.mxu1 %v6635_v45  ;;  %1866 = vmatpush.msrb.mxu3 %v5001_v28  ;;  %v1359_v15 = vmax.f32 %v6638_v59, %v1331_v54  ;;  %v6641_v28 = vld [vmem:[#allocation54_spill] sm:$0xff] }
 0x419   :  { %1710 = vmatmul.f32.vlgmr.msra.gmra.mxu0 %v1598_v42  ;;  %1779 = vmatmul.f32.vlgmr.msra.gmra.mxu3 %v1601_v24  ;;  %v6642_v54 = vld [vmem:[#allocation66_spill] sm:$0xff]  ;;  %v1591_v41 = vsel %vm1565_vm11, %v2987_v44, %v3001_v11  ;;  %v6643_v24 = vunpack.i.h.bf16 %v5164_v33 }
 0x41a   :  { %v5244_v55 = vpop.permute.xlu0 %2994  ;;  %1796 = vmatpush.msrb.mxu0 %v5006_v5  ;;  %1819 = vmatpush.msrb.mxu1 %v6639_v2  ;;  %v6644_v5 = vld [vmem:[#allocation15_spill] sm:$0xff] }
 0x41b   :  { %6633 = vst [vmem:[#allocation16_spill] sm:$0xff] %v5244_v55  ;;  %v5249_v56 = vpop.permute.xlu2 %3029  ;;  %v5251_v17 = vpop.permute.xlu1 %2989  ;;  %v2997_v42 = vunpack.i.h.bf16 %v5244_v55  ;;  %1844 = vmatpush.msrb.mxu2 %v6641_v28  ;;  %1867 = vmatpush.msrb.mxu3 %v6642_v54  ;;  %v1589_v2 = vsel %vm1565_vm11, %v3001_v11, %v6643_v24  ;;  %v6647_v11 = vld [vmem:[#allocation53_spill] sm:$0xff] }
 0x41c   :  { %6634 = vst [vmem:[#allocation75_spill] sm:$0xff] %v5251_v17  ;;  %v2991_v13 = vunpack.i.l.bf16 %v5251_v17  ;;  %v6640_v6 = vunpack.i.h.bf16 %v5251_v17  ;;  %1797 = vmatpush.msrb.mxu0 %v5040_v16  ;;  %1820 = vmatpush.msrb.mxu1 %v6644_v5  ;;  %v6645_v17 = vld [vmem:[#allocation59_spill] sm:$0xff]  ;;  %v6648_v24 = vld [vmem:[#allocation65_spill] sm:$0xff] }
 0x41d   :  { %1845 = vmatpush.msrb.mxu2 %v6645_v17  ;;  %1868 = vmatpush.msrb.mxu3 %v5058_v34 }
 0x41e   :  { %v1462_v45 = vsel %vm1436_vm10, %v2972_v12, %v2991_v13  ;;  %v1460_v20 = vsel %vm1436_vm10, %v2991_v13, %v6640_v6  ;;  %1798 = vmatpush.msrb.mxu0 %v5065_v21  ;;  %1821 = vmatpush.msrb.mxu1 %v6647_v11  ;;  %v6652_v21 = vld [vmem:[#allocation58_spill] sm:$0xff] }
 0x41f   :  { %v1487_v57 = vmax.f32 %v1358_v14, %v1462_v45  ;;  %v1488_v59 = vmax.f32 %v1359_v15, %v1460_v20  ;;  %v1335_v15 = vsel %vm279_vm0, %v2997_v42, %v2957_v32  ;;  %v6646_v14 = vunpack.i.l.bf16 %v5244_v55  ;;  %1846 = vmatpush.msrb.mxu2 %v6648_v24  ;;  %1869 = vmatpush.msrb.mxu3 %v5078_v51  ;;  %v6651_v55 = vld [vmem:[#allocation22_spill] sm:$0xff] }
 0x420   :  { %1799 = vmatpush.msrb.mxu0 %v5087_v48  ;;  %v1357_v11 = vmax.f32 %v6651_v55, %v1335_v15  ;;  %1822 = vmatpush.msrb.mxu1 %v6652_v21  ;;  %v6653_v55 = vunpack.i.l.bf16 %v5210_v1 }
 0x421   :  { %v1616_v6 = vmax.f32 %v1487_v57, %v1591_v41  ;;  %v1617_v13 = vmax.f32 %v1488_v59, %v1589_v2  ;;  %v1337_v45 = vsel %vm279_vm0, %v6646_v14, %v2997_v42  ;;  %v3017_v57 = vunpack.i.h.bf16 %v5210_v1  ;;  %v6650_v42 = vld [vmem:[#allocation21_spill] sm:$0xff]  ;;  %1847 = vmatpush.msrb.mxu2 %v5053_v36  ;;  %1870 = vmatpush.msrb.mxu3 %v5093_v63 }
 0x422   :  { %v3010_v20 = vpop.permute.xlu0 %3009  ;;  %v1356_v14 = vmax.f32 %v6650_v42, %v1337_v45  ;;  %v6654_v42 = vld [vmem:[#allocation72_spill] sm:$0xff] }
 0x423   :  { %v5295_v5 = vpop.permute.xlu2 %3044  ;;  %v5297_v2 = vpop.permute.xlu1 %3004  ;;  %1759 = vmatmul.f32.gmra.mxu2 %v1616_v6  ;;  %1782 = vmatmul.f32.gmra.mxu3 %v1617_v13  ;;  %v1595_v15 = vsel %vm1565_vm11, %v6653_v55, %v3017_v57  ;;  %v1593_v45 = vsel %vm1565_vm11, %v3017_v57, %v2987_v44  ;;  %v3012_v44 = vunpack.i.h.bf16 %v3010_v20  ;;  %v3011_v57 = vunpack.i.l.bf16 %v3010_v20  ;;  %v6659_v55 = vld [vmem:[#allocation38_spill] sm:$0xff] }
 0x424   :  { %6649 = vst [vmem:[#allocation52_spill] sm:$0xff] %v5297_v2  ;;  %v3007_v59 = vunpack.i.h.bf16 %v5297_v2  ;;  %v6546_v41 = vunpack.i.l.bf16 %v5297_v2  ;;  %1924 = vmatpush.msra.mxu2 %v4591_v4  ;;  %1947 = vmatpush.msra.mxu3 %v4643_v37  ;;  %v6657_v37 = vld [vmem:[#allocation73_spill] sm:$0xff] }
 0x425   :  { %1800 = vmatpush.msrb.mxu0 %v6654_v42 }
 0x426   :  { %v1466_v6 = vsel %vm1436_vm10, %v6546_v41, %v3007_v59  ;;  %v1464_v13 = vsel %vm1436_vm10, %v3007_v59, %v2972_v12  ;;  %v6655_v41 = vld [vmem:[#allocation64_spill] sm:$0xff]  ;;  %1948 = vmatpush.msra.mxu3 %v4664_v50  ;;  %v6660_v50 = vld [vmem:[#allocation42_spill] sm:$0xff] }
 0x427   :  { %v1485_v32 = vmax.f32 %v1356_v14, %v1466_v6  ;;  %v1486_v48 = vmax.f32 %v1357_v11, %v1464_v13  ;;  %1823 = vmatpush.msrb.mxu1 %v6655_v41  ;;  %v6656_v14 = vld [vmem:[#allocation36_spill] sm:$0xff]  ;;  %1801 = vmatpush.msrb.mxu0 %v6657_v37  ;;  %v6658_v11 = vld [vmem:[#allocation67_spill] sm:$0xff] }
 0x428   :  { %1925 = vmatpush.msra.mxu2 %v6656_v14  ;;  %1949 = vmatpush.msra.mxu3 %v6660_v50  ;;  %v6662_v14 = vld [vmem:[#allocation32_spill] sm:$0xff] }
 0x429   :  { %v1614_v12 = vmax.f32 %v1485_v32, %v1595_v15  ;;  %v1615_v59 = vmax.f32 %v1486_v48, %v1593_v45  ;;  %1824 = vmatpush.msrb.mxu1 %v6658_v11  ;;  %v3032_v15 = vunpack.i.h.bf16 %v5249_v56  ;;  %v6661_v45 = vld [vmem:[#allocation39_spill] sm:$0xff]  ;;  %v6667_v11 = vld [vmem:[#allocation17_spill] sm:$0xff]  ;;  %v6670_v41 = vld [vmem:[#allocation24_spill] sm:$0xff] }
 0x42a   :  { %v3025_v4 = vpop.permute.xlu0 %3024  ;;  %1926 = vmatpush.msra.mxu2 %v6659_v55  ;;  %1878 = vmatpush.msra.mxu0 %v6661_v45  ;;  %v6664_v55 = vld [vmem:[#allocation40_spill] sm:$0xff]  ;;  %v6665_v45 = vld [vmem:[#allocation46_spill] sm:$0xff] }
 0x42b   :  { %v5330_v6 = vpop.permute.xlu2 %3059  ;;  %v5332_v13 = vpop.permute.xlu1 %3019  ;;  %1713 = vmatmul.f32.gmra.mxu0 %v1614_v12  ;;  %1736 = vmatmul.f32.gmra.mxu1 %v1615_v59  ;;  %v3027_v1 = vunpack.i.h.bf16 %v3025_v4  ;;  %v3026_v2 = vunpack.i.l.bf16 %v3025_v4  ;;  %v6663_v12 = vunpack.i.l.bf16 %v5128_v40  ;;  %v1324_v4 = vsel %vm279_vm0, %v3011_v57, %v3012_v44  ;;  %v6669_v40 = vld [vmem:[#allocation44_spill] sm:$0xff] }
 0x42c   :  { %v3022_v32 = vunpack.i.h.bf16 %v5332_v13  ;;  %v6549_v48 = vunpack.i.l.bf16 %v5332_v13  ;;  %1901 = vmatpush.msra.mxu1 %v6662_v14  ;;  %1927 = vmatpush.msra.mxu2 %v6664_v55  ;;  %v6666_v14 = vld [vmem:[#allocation43_spill] sm:$0xff] }
 0x42d   :  { %1950 = vmatpush.msra.mxu3 %v6665_v45  ;;  %1879 = vmatpush.msra.mxu0 %v6666_v14  ;;  %v6672_v45 = vunpack.i.l.bf16 %v5166_v53 }
 0x42e   :  { %v1322_v20 = vsel %vm279_vm0, %v3012_v44, %v6549_v48  ;;  %v1328_v59 = vsel %vm279_vm0, %v6663_v12, %v3022_v32  ;;  %v1326_v50 = vsel %vm279_vm0, %v3022_v32, %v3011_v57  ;;  %v6668_v48 = vld [vmem:[#allocation13_spill] sm:$0xff]  ;;  %1928 = vmatpush.msra.mxu2 %v6669_v40  ;;  %v6551_v12 = vunpack.i.l.bf16 %v5249_v56 }
 0x42f   :  { %v1344_v37 = vmax.f32 %v6667_v11, %v1328_v59  ;;  %1902 = vmatpush.msra.mxu1 %v6668_v48  ;;  %v1347_v55 = vmax.f32 %v6670_v41, %v1322_v20  ;;  %1951 = vmatpush.msra.mxu3 %v4772_v52  ;;  %v6671_v32 = vld [vmem:[#allocation45_spill] sm:$0xff]  ;;  %v1457_v14 = vsel %vm1436_vm10, %v6672_v45, %v3032_v15  ;;  %v6675_v41 = vld [vmem:[#allocation23_spill] sm:$0xff] }
 0x430   :  { %1880 = vmatpush.msra.mxu0 %v6671_v32  ;;  %v1453_v11 = vsel %vm1436_vm10, %v3026_v2, %v3027_v1  ;;  %v6673_v44 = vld [vmem:[#allocation25_spill] sm:$0xff]  ;;  %1929 = vmatpush.msra.mxu2 %v4720_v61  ;;  %v1346_v52 = vmax.f32 %v6675_v41, %v1324_v4  ;;  %v1451_v20 = vsel %vm1436_vm10, %v3027_v1, %v6551_v12  ;;  %v6676_v41 = vunpack.i.l.bf16 %v5212_v25 }
 0x431   :  { %v1345_v57 = vmax.f32 %v6673_v44, %v1326_v50  ;;  %v6674_v40 = vld [vmem:[#allocation37_spill] sm:$0xff]  ;;  %1952 = vmatpush.msra.mxu3 %v4806_v43  ;;  %v1455_v50 = vsel %vm1436_vm10, %v3032_v15, %v3026_v2  ;;  %v1473_v4 = vmax.f32 %v1344_v37, %v1457_v14  ;;  %v1476_v12 = vmax.f32 %v1347_v55, %v1451_v20 }
 0x432   :  { %v5370_v48 = vpop.permute.xlu0 %3039  ;;  %1903 = vmatpush.msra.mxu1 %v6674_v40  ;;  %1881 = vmatpush.msra.mxu0 %v4737_v9  ;;  %v1475_v1 = vmax.f32 %v1346_v52, %v1453_v11  ;;  %v6677_v37 = vld [vmem:[#allocation41_spill] sm:$0xff]  ;;  %v3047_v11 = vunpack.i.h.bf16 %v5295_v5 }
 0x433   :  { %v3042_v59 = vunpack.i.h.bf16 %v5370_v48  ;;  %v3041_v32 = vunpack.i.l.bf16 %v5370_v48  ;;  %v3035_v45 = vpop.permute.xlu1 %3034  ;;  %v5385_v61 = vpop.permute.xlu2 %3074  ;;  %1930 = vmatpush.msra.mxu2 %v4755_v35  ;;  %1953 = vmatpush.msra.mxu3 %v4839_v22 }
 0x434   :  { %v3037_v44 = vunpack.i.h.bf16 %v3035_v45  ;;  %v3036_v40 = vunpack.i.l.bf16 %v3035_v45  ;;  %1904 = vmatpush.msra.mxu1 %v4655_v31  ;;  %1882 = vmatpush.msra.mxu0 %v4777_v26  ;;  %v1474_v31 = vmax.f32 %v1345_v57, %v1455_v50  ;;  %v3046_v57 = vunpack.i.l.bf16 %v5295_v5 }
 0x435   :  { %v1586_v43 = vsel %vm1565_vm11, %v6676_v41, %v3042_v59  ;;  %1931 = vmatpush.msra.mxu2 %v4799_v8  ;;  %1954 = vmatpush.msra.mxu3 %v4870_v30  ;;  %v3061_v50 = vunpack.i.l.bf16 %v5330_v6 }
 0x436   :  { %v1602_v9 = vmax.f32 %v1473_v4, %v1586_v43  ;;  %v1580_v2 = vsel %vm1565_vm11, %v3037_v44, %v3041_v32  ;;  %v1582_v35 = vsel %vm1565_vm11, %v3036_v40, %v3037_v44  ;;  %1905 = vmatpush.msra.mxu1 %v6677_v37  ;;  %v1584_v15 = vsel %vm1565_vm11, %v3042_v59, %v3036_v40  ;;  %v6680_v59 = vld [vmem:[#allocation29_spill] sm:$0xff]  ;;  %v6681_v44 = vld [vmem:[#allocation27_spill] sm:$0xff]  ;;  %v6682_v40 = vld [vmem:[#allocation28_spill] sm:$0xff] }
 0x437   :  { %v1604_v55 = vmax.f32 %v1475_v1, %v1582_v35  ;;  %v1605_v14 = vmax.f32 %v1476_v12, %v1580_v2  ;;  %v1603_v26 = vmax.f32 %v1474_v31, %v1584_v15  ;;  %1883 = vmatpush.msra.mxu0 %v4847_v46  ;;  %1932 = vmatpush.msra.mxu2 %v4834_v18  ;;  %v6678_v18 = vunpack.i.h.bf16 %v5204_v38  ;;  %v6684_v43 = vld [vmem:[#allocation75_spill] sm:$0xff]  ;;  %v6686_v35 = vld [vmem:[#allocation56_spill] sm:$0xff] }
 0x438   :  { %1802 = vmatmul.f32.vlgmr.msrb.gmra.mxu0 %v1602_v9  ;;  %1906 = vmatpush.msra.mxu1 %v4715_v7  ;;  %v6685_v9 = vunpack.i.h.bf16 %v6684_v43  ;;  %v6687_v37 = vld [vmem:[#allocation51_spill] sm:$0xff] }
 0x439   :  { %1848 = vmatmul.f32.vlgmr.msrb.gmra.mxu2 %v1604_v55  ;;  %1871 = vmatmul.f32.vlgmr.msrb.gmra.mxu3 %v1605_v14 }
 0x43a   :  { %1825 = vmatmul.f32.vlgmr.msrb.gmra.mxu1 %v1603_v26  ;;  %v3055_v22 = vpop.permute.xlu0 %3054  ;;  %1955 = vmatpush.msra.mxu3 %v4906_v58  ;;  %v1325_v58 = vsel %vm279_vm0, %v3046_v57, %v3047_v11  ;;  %v6688_v26 = vunpack.i.h.bf16 %v5164_v33 }
 0x43b   :  { %v5409_v52 = vpop.permute.xlu1 %3049  ;;  %1884 = vmatpush.msra.mxu0 %v4884_v23  ;;  %1907 = vmatpush.msra.mxu1 %v4750_v27  ;;  %v5419_v46 = vpop.permute.xlu2 %3089  ;;  %v3057_v5 = vunpack.i.h.bf16 %v3055_v22  ;;  %v3056_v12 = vunpack.i.l.bf16 %v3055_v22  ;;  %v3062_v23 = vunpack.i.h.bf16 %v5330_v6  ;;  %v3264_v6 = vld [vmem:[%s6448_s9 + $0x130] sm:$0xff] }
 0x43c   :  { %v3052_v8 = vunpack.i.h.bf16 %v5409_v52  ;;  %v3051_v30 = vunpack.i.l.bf16 %v5409_v52  ;;  %1933 = vmatpush.msra.mxu2 %v4865_v29  ;;  %1956 = vmatpush.msra.mxu3 %v4938_v0  ;;  %v6679_v29 = vld [vmem:[#allocation20_spill] sm:$0xff]  ;;  %v3258_v52 = vld [vmem:[%s6448_s9 + $0x58] sm:$0xff] }
 0x43d   :  { %1885 = vmatpush.msra.mxu0 %v4913_v10  ;;  %1908 = vmatpush.msra.mxu1 %v4794_v62  ;;  %v1362_v10 = vmax.f32 %v6681_v44, %v1325_v58  ;;  %v1454_v62 = vsel %vm1436_vm10, %v3056_v12, %v3057_v5  ;;  %v1458_v2 = vsel %vm1436_vm10, %v6685_v9, %v3062_v23  ;;  %v6693_v44 = vld [vmem:[#allocation53_spill] sm:$0xff]  ;;  %v6697_v9 = vld [vmem:[#allocation64_spill] sm:$0xff] }
 0x43e   :  { %v1327_v7 = vsel %vm279_vm0, %v3052_v8, %v3046_v57  ;;  %v1329_v20 = vsel %vm279_vm0, %v6678_v18, %v3052_v8  ;;  %v1323_v27 = vsel %vm279_vm0, %v3047_v11, %v3051_v30  ;;  %1934 = vmatpush.msra.mxu2 %v4901_v47  ;;  %1957 = vmatpush.msra.mxu3 %v4967_v3  ;;  %v6683_v47 = vld [vmem:[#allocation62_spill] sm:$0xff]  ;;  %v6689_v8 = vld [vmem:[#allocation63_spill] sm:$0xff] }
 0x43f   :  { %v1360_v38 = vmax.f32 %v6679_v29, %v1329_v20  ;;  %v1361_v45 = vmax.f32 %v6680_v59, %v1327_v7  ;;  %1886 = vmatpush.msra.mxu0 %v4943_v49  ;;  %1909 = vmatpush.msra.mxu1 %v6632_v39  ;;  %v1363_v1 = vmax.f32 %v6682_v40, %v1323_v27  ;;  %v6691_v27 = vld [vmem:[#allocation15_spill] sm:$0xff]  ;;  %v6695_v40 = vunpack.i.l.bf16 %v5332_v13  ;;  %v3235_v13 = vld [vmem:[%s6448_s9 + $0x1f8] sm:$0xff] }
 0x440   :  { %1935 = vmatpush.msra.mxu2 %v6636_v60  ;;  %1958 = vmatpush.msra.mxu3 %v6683_v47  ;;  %v1456_v31 = vsel %vm1436_vm10, %v3062_v23, %v3056_v12  ;;  %v1452_v14 = vsel %vm1436_vm10, %v3057_v5, %v3061_v50  ;;  %v1491_v57 = vmax.f32 %v1362_v10, %v1454_v62  ;;  %v6690_v12 = vld [vmem:[#allocation14_spill] sm:$0xff] }
 0x441   :  { %1887 = vmatpush.msra.mxu0 %v6686_v35  ;;  %1910 = vmatpush.msra.mxu1 %v6687_v37  ;;  %v1489_v55 = vmax.f32 %v1360_v38, %v1458_v2  ;;  %v1490_v11 = vmax.f32 %v1361_v45, %v1456_v31  ;;  %v1492_v5 = vmax.f32 %v1363_v1, %v1452_v14  ;;  %v6692_v38 = vld [vmem:[#allocation68_spill] sm:$0xff]  ;;  %v3091_v35 = vunpack.i.l.bf16 %v5419_v46 }
 0x442   :  { %v5444_v4 = vpop.permute.xlu0 %3069  ;;  %1936 = vmatpush.msra.mxu2 %v6641_v28  ;;  %1959 = vmatpush.msra.mxu3 %v6642_v54  ;;  %v3236_v2 = vld [vmem:[%s6448_s9 + $0x170] sm:$0xff] }
 0x443   :  { %v3072_v41 = vunpack.i.h.bf16 %v5444_v4  ;;  %v3071_v49 = vunpack.i.l.bf16 %v5444_v4  ;;  %v3065_v39 = vpop.permute.xlu1 %3064  ;;  %1888 = vmatpush.msra.mxu0 %v6689_v8  ;;  %1911 = vmatpush.msra.mxu1 %v6690_v12  ;;  %v5485_v58 = vpop.permute.xlu2 %3104  ;;  %v3237_v31 = vld [vmem:[%s6448_s9 + $0x1f0] sm:$0xff]  ;;  %v6703_v12 = vunpack.i.l.bf16 %v5249_v56 }
 0x444   :  { %v3067_v60 = vunpack.i.h.bf16 %v3065_v39  ;;  %v3066_v15 = vunpack.i.l.bf16 %v3065_v39  ;;  %1937 = vmatpush.msra.mxu2 %v6645_v17  ;;  %1960 = vmatpush.msra.mxu3 %v5058_v34  ;;  %v3077_v34 = vunpack.i.h.bf16 %v5385_v61  ;;  %v6696_v39 = vld [vmem:[#allocation26_spill] sm:$0xff] }
 0x445   :  { %v1587_v22 = vsel %vm1565_vm11, %v6688_v26, %v3072_v41  ;;  %1889 = vmatpush.msra.mxu0 %v5040_v16  ;;  %1912 = vmatpush.msra.mxu1 %v6691_v27  ;;  %v3076_v16 = vunpack.i.l.bf16 %v5385_v61  ;;  %v3092_v61 = vunpack.i.h.bf16 %v5419_v46 }
 0x446   :  { %v1618_v7 = vmax.f32 %v1489_v55, %v1587_v22  ;;  %v1585_v18 = vsel %vm1565_vm11, %v3072_v41, %v3066_v15  ;;  %v1583_v28 = vsel %vm1565_vm11, %v3066_v15, %v3067_v60  ;;  %v1581_v20 = vsel %vm1565_vm11, %v3067_v60, %v3071_v49  ;;  %1938 = vmatpush.msra.mxu2 %v6648_v24  ;;  %v6694_v24 = vld [vmem:[#allocation71_spill] sm:$0xff]  ;;  %v6699_v55 = vld [vmem:[#allocation33_spill] sm:$0xff] }
 0x447   :  { %v1619_v33 = vmax.f32 %v1490_v11, %v1585_v18  ;;  %v1620_v54 = vmax.f32 %v1491_v57, %v1583_v28  ;;  %v1621_v23 = vmax.f32 %v1492_v5, %v1581_v20  ;;  %1961 = vmatpush.msra.mxu3 %v5078_v51  ;;  %1890 = vmatpush.msra.mxu0 %v6692_v38  ;;  %v6700_v22 = vld [vmem:[#allocation73_spill] sm:$0xff]  ;;  %v6701_v11 = vld [vmem:[#allocation67_spill] sm:$0xff] }
 0x448   :  { %1805 = vmatmul.f32.gmra.mxu0 %v1618_v7  ;;  %1913 = vmatpush.msra.mxu1 %v6693_v44  ;;  %v6702_v57 = vld [vmem:[#allocation31_spill] sm:$0xff]  ;;  %v1449_v7 = vsel %vm1436_vm10, %v6703_v12, %v3092_v61  ;;  %v3241_v38 = vld [vmem:[%s6448_s9 + $0xf8] sm:$0xff]  ;;  %v3242_v44 = vld [vmem:[%s6448_s9 + $0x160] sm:$0xff] }
 0x449   :  { %1828 = vmatmul.f32.gmra.mxu1 %v1619_v33  ;;  %1851 = vmatmul.f32.gmra.mxu2 %v1620_v54  ;;  %v3238_v33 = vld [vmem:[%s6448_s9 + $0x168] sm:$0xff] }
 0x44a   :  { %1874 = vmatmul.f32.gmra.mxu3 %v1621_v23  ;;  %v3085_v17 = vpop.permute.xlu0 %3084  ;;  %1939 = vmatpush.msra.mxu2 %v5053_v36  ;;  %v3239_v54 = vld [vmem:[%s6448_s9 + $0x1e8] sm:$0xff] }
 0x44b   :  { %v5489_v29 = vpop.permute.xlu1 %3079  ;;  %1962 = vmatpush.msra.mxu3 %v5093_v63  ;;  %1891 = vmatpush.msra.mxu0 %v6694_v24  ;;  %v3087_v10 = vunpack.i.h.bf16 %v3085_v17  ;;  %v3086_v62 = vunpack.i.l.bf16 %v3085_v17  ;;  %v3234_v63 = vld [vmem:[%s6448_s9 + $0x178] sm:$0xff]  ;;  %v5531_v37 = vpop.permute.xlu2 %3119  ;;  %v3243_v24 = vld [vmem:[%s6448_s9 + $0x1e0] sm:$0xff] }
 0x44c   :  { %v3082_v59 = vunpack.i.h.bf16 %v5489_v29  ;;  %v3081_v45 = vunpack.i.l.bf16 %v5489_v29  ;;  %1914 = vmatpush.msra.mxu1 %v6652_v21  ;;  %2016 = vmatpush.msrb.mxu2 %v3234_v63  ;;  %v1316_v21 = vsel %vm279_vm0, %v3076_v16, %v3077_v34  ;;  %v3240_v17 = vld [vmem:[%s6448_s9 + $0x78] sm:$0xff]  ;;  %v3122_v12 = vunpack.i.h.bf16 %v5531_v37  ;;  %v3285_v29 = vld [vmem:[%s6448_s9 + $0x180] sm:$0xff] }
 0x44d   :  { %2039 = vmatpush.msrb.mxu3 %v3235_v13  ;;  %1892 = vmatpush.msra.mxu0 %v6654_v42  ;;  %v1445_v60 = vsel %vm1436_vm10, %v3086_v62, %v3087_v10  ;;  %v6698_v42 = vld [vmem:[#allocation34_spill] sm:$0xff]  ;;  %v1350_v8 = vmax.f32 %v6702_v57, %v1316_v21  ;;  %v1443_v56 = vsel %vm1436_vm10, %v3087_v10, %v3091_v35  ;;  %v3246_v21 = vld [vmem:[%s6448_s9 + $0x1d8] sm:$0xff] }
 0x44e   :  { %v1320_v1 = vsel %vm279_vm0, %v6695_v40, %v3082_v59  ;;  %v1318_v41 = vsel %vm279_vm0, %v3082_v59, %v3076_v16  ;;  %v1314_v36 = vsel %vm279_vm0, %v3077_v34, %v3081_v45  ;;  %1915 = vmatpush.msra.mxu1 %v6697_v9  ;;  %2017 = vmatpush.msrb.mxu2 %v3236_v2  ;;  %v3107_v9 = vunpack.i.h.bf16 %v5485_v58  ;;  %v3253_v57 = vld [vmem:[%s6448_s9 + $0x60] sm:$0xff] }
 0x44f   :  { %v1348_v43 = vmax.f32 %v6696_v39, %v1320_v1  ;;  %2040 = vmatpush.msrb.mxu3 %v3237_v31  ;;  %v1349_v15 = vmax.f32 %v6698_v42, %v1318_v41  ;;  %v1351_v14 = vmax.f32 %v6699_v55, %v1314_v36  ;;  %1893 = vmatpush.msra.mxu0 %v6700_v22  ;;  %v3245_v41 = vld [vmem:[%s6448_s9 + $0x158] sm:$0xff]  ;;  %v3247_v39 = vld [vmem:[%s6448_s9 + $0xf0] sm:$0xff]  ;;  %v3106_v2 = vunpack.i.l.bf16 %v5485_v58  ;;  %v3249_v42 = vld [vmem:[%s6448_s9 + $0x68] sm:$0xff] }
 0x450   :  { %1916 = vmatpush.msra.mxu1 %v6701_v11  ;;  %2018 = vmatpush.msrb.mxu2 %v3238_v33  ;;  %v1447_v34 = vsel %vm1436_vm10, %v3092_v61, %v3086_v62  ;;  %v1479_v16 = vmax.f32 %v1350_v8, %v1445_v60  ;;  %v3250_v58 = vld [vmem:[%s6448_s9 + $0x1d0] sm:$0xff]  ;;  %v3251_v22 = vld [vmem:[%s6448_s9 + $0xe8] sm:$0xff] }
 0x451   :  { %2041 = vmatpush.msrb.mxu3 %v3239_v54  ;;  %v1477_v20 = vmax.f32 %v1348_v43, %v1449_v7  ;;  %1970 = vmatpush.msrb.mxu0 %v3240_v17  ;;  %v1478_v48 = vmax.f32 %v1349_v15, %v1447_v34  ;;  %v1480_v40 = vmax.f32 %v1351_v14, %v1443_v56  ;;  %v3248_v43 = vld [vmem:[%s6448_s9 + $0x150] sm:$0xff]  ;;  %v3252_v11 = vld [vmem:[%s6448_s9 + $0x148] sm:$0xff]  ;;  %v3260_v34 = vld [vmem:[%s6448_s9 + $0x138] sm:$0xff] }
 0x452   :  { %v5537_v26 = vpop.permute.xlu0 %3099  ;;  %1993 = vmatpush.msrb.mxu1 %v3241_v38  ;;  %2019 = vmatpush.msrb.mxu2 %v3242_v44  ;;  %v1317_v8 = vsel %vm279_vm0, %v3106_v2, %v3107_v9  ;;  %v3259_v38 = vld [vmem:[%s6448_s9 + $0xd8] sm:$0xff]  ;;  %v3121_v44 = vunpack.i.l.bf16 %v5531_v37 }
 0x453   :  { %v3102_v18 = vunpack.i.h.bf16 %v5537_v26  ;;  %v3101_v28 = vunpack.i.l.bf16 %v5537_v26  ;;  %v3095_v5 = vpop.permute.xlu1 %3094  ;;  %2042 = vmatpush.msrb.mxu3 %v3243_v24  ;;  %v5608_v15 = vpop.permute.xlu2 %3134  ;;  %v3291_v26 = vld [vmem:[%s6448_s9 + $0x88] sm:$0xff] }
 0x454   :  { %v3097_v23 = vunpack.i.h.bf16 %v3095_v5  ;;  %v3096_v27 = vunpack.i.l.bf16 %v3095_v5  ;;  %2020 = vmatpush.msrb.mxu2 %v3245_v41  ;;  %1994 = vmatpush.msrb.mxu1 %v3247_v39  ;;  %v3137_v41 = vunpack.i.h.bf16 %v5608_v15 }
 0x455   :  { %v1578_v59 = vsel %vm1565_vm11, %v3041_v32, %v3102_v18  ;;  %v3244_v32 = vld [vmem:[%s6448_s9 + $0x70] sm:$0xff]  ;;  %2043 = vmatpush.msrb.mxu3 %v3246_v21 }
 0x456   :  { %v1606_v10 = vmax.f32 %v1477_v20, %v1578_v59  ;;  %v1572_v62 = vsel %vm1565_vm11, %v3097_v23, %v3101_v28  ;;  %1971 = vmatpush.msrb.mxu0 %v3244_v32  ;;  %v1574_v1 = vsel %vm1565_vm11, %v3096_v27, %v3097_v23  ;;  %v1576_v61 = vsel %vm1565_vm11, %v3102_v18, %v3096_v27  ;;  %v3254_v18 = vld [vmem:[%s6448_s9 + $0x1c8] sm:$0xff]  ;;  %v3255_v20 = vld [vmem:[%s6448_s9 + $0xe0] sm:$0xff]  ;;  %v3263_v21 = vld [vmem:[%s6448_s9 + $0xd0] sm:$0xff] }
 0x457   :  { %v1607_v36 = vmax.f32 %v1478_v48, %v1576_v61  ;;  %v1608_v63 = vmax.f32 %v1479_v16, %v1574_v1  ;;  %v1609_v13 = vmax.f32 %v1480_v40, %v1572_v62  ;;  %2021 = vmatpush.msrb.mxu2 %v3248_v43  ;;  %2044 = vmatpush.msrb.mxu3 %v3250_v58  ;;  %v3256_v23 = vld [vmem:[%s6448_s9 + $0x140] sm:$0xff]  ;;  %v6705_v16 = vld [vmem:[#allocation49_spill] sm:$0xff]  ;;  %v3262_v62 = vld [vmem:[%s6448_s9 + $0x50] sm:$0xff] }
 0x458   :  { %1894 = vmatmul.f32.vlgmr.msra.gmra.mxu0 %v1606_v10  ;;  %1995 = vmatpush.msrb.mxu1 %v3251_v22  ;;  %v3257_v27 = vld [vmem:[%s6448_s9 + $0x1c0] sm:$0xff]  ;;  %v3261_v10 = vld [vmem:[%s6448_s9 + $0x1b8] sm:$0xff]  ;;  %v1450_v48 = vsel %vm1436_vm10, %v3061_v50, %v3122_v12  ;;  %v6706_v40 = vld [vmem:[#allocation47_spill] sm:$0xff] }
 0x459   :  { %1917 = vmatmul.f32.vlgmr.msra.gmra.mxu1 %v1607_v36  ;;  %1940 = vmatmul.f32.vlgmr.msra.gmra.mxu2 %v1608_v63  ;;  %v1366_v32 = vmax.f32 %v6706_v40, %v1317_v8  ;;  %v6707_v1 = vld [vmem:[#allocation48_spill] sm:$0xff]  ;;  %v3274_v40 = vld [vmem:[%s6448_s9 + $0x198] sm:$0xff] }
 0x45a   :  { %v5601_v31 = vpop.permute.xlu0 %3114  ;;  %1963 = vmatmul.f32.vlgmr.msra.gmra.mxu3 %v1609_v13  ;;  %1972 = vmatpush.msrb.mxu0 %v3249_v42  ;;  %v3136_v42 = vunpack.i.l.bf16 %v5608_v15 }
 0x45b   :  { %v5603_v60 = vpop.permute.xlu1 %3109  ;;  %2022 = vmatpush.msrb.mxu2 %v3252_v11  ;;  %2045 = vmatpush.msrb.mxu3 %v3254_v18  ;;  %v3117_v5 = vunpack.i.h.bf16 %v5601_v31  ;;  %v3116_v33 = vunpack.i.l.bf16 %v5601_v31 }
 0x45c   :  { %v3112_v55 = vunpack.i.h.bf16 %v5603_v60  ;;  %v3111_v14 = vunpack.i.l.bf16 %v5603_v60  ;;  %1973 = vmatpush.msrb.mxu0 %v3253_v57  ;;  %1996 = vmatpush.msrb.mxu1 %v3255_v20  ;;  %v5709_v57 = vpop.permute.xlu2 %3149  ;;  %v3270_v20 = vld [vmem:[%s6448_s9 + $0x120] sm:$0xff] }
 0x45d   :  { %2023 = vmatpush.msrb.mxu2 %v3256_v23  ;;  %2046 = vmatpush.msrb.mxu3 %v3257_v27  ;;  %v1446_v50 = vsel %vm1436_vm10, %v3116_v33, %v3117_v5  ;;  %v1448_v31 = vsel %vm1436_vm10, %v3122_v12, %v3116_v33  ;;  %v1444_v11 = vsel %vm1436_vm10, %v3117_v5, %v3121_v44  ;;  %v3268_v5 = vld [vmem:[%s6448_s9 + $0x40] sm:$0xff] }
 0x45e   :  { %v1319_v7 = vsel %vm279_vm0, %v3112_v55, %v3106_v2  ;;  %v1315_v54 = vsel %vm279_vm0, %v3107_v9, %v3111_v14  ;;  %v1321_v56 = vsel %vm279_vm0, %v3051_v30, %v3112_v55  ;;  %1974 = vmatpush.msrb.mxu0 %v3258_v52  ;;  %v6704_v30 = vld [vmem:[#allocation30_spill] sm:$0xff]  ;;  %1997 = vmatpush.msrb.mxu1 %v3259_v38  ;;  %v3265_v9 = vld [vmem:[%s6448_s9 + $0x48] sm:$0xff] }
 0x45f   :  { %v1364_v17 = vmax.f32 %v6704_v30, %v1321_v56  ;;  %2024 = vmatpush.msrb.mxu2 %v3260_v34  ;;  %v1365_v59 = vmax.f32 %v6705_v16, %v1319_v7  ;;  %2047 = vmatpush.msrb.mxu3 %v3261_v10  ;;  %v1367_v61 = vmax.f32 %v6707_v1, %v1315_v54  ;;  %v3266_v55 = vld [vmem:[%s6448_s9 + $0xc8] sm:$0xff]  ;;  %v6708_v27 = vld [vmem:[#allocation74_spill] sm:$0xff]  ;;  %v3272_v34 = vld [vmem:[%s6448_s9 + $0xb8] sm:$0xff]  ;;  %v3152_v16 = vunpack.i.h.bf16 %v5709_v57 }
 0x460   :  { %1975 = vmatpush.msrb.mxu0 %v3262_v62  ;;  %1998 = vmatpush.msrb.mxu1 %v3263_v21  ;;  %v1495_v7 = vmax.f32 %v1366_v32, %v1446_v50  ;;  %v1308_v23 = vsel %vm279_vm0, %v3136_v42, %v3137_v41  ;;  %v6709_v52 = vunpack.i.h.bf16 %v6708_v27  ;;  %v6710_v32 = vld [vmem:[#allocation60_spill] sm:$0xff]  ;;  %v6712_v50 = vunpack.i.h.bf16 %v5166_v53  ;;  %v3287_v27 = vld [vmem:[%s6448_s9 + $0x98] sm:$0xff] }
 0x461   :  { %2025 = vmatpush.msrb.mxu2 %v3264_v6  ;;  %2048 = vmatpush.msrb.mxu3 %v4938_v0  ;;  %v1493_v2 = vmax.f32 %v1364_v17, %v1450_v48  ;;  %v3267_v0 = vld [vmem:[%s6448_s9 + $0x128] sm:$0xff]  ;;  %v1494_v22 = vmax.f32 %v1365_v59, %v1448_v31  ;;  %v1496_v18 = vmax.f32 %v1367_v61, %v1444_v11  ;;  %v3151_v59 = vunpack.i.l.bf16 %v5709_v57  ;;  %v3273_v48 = vld [vmem:[%s6448_s9 + $0x118] sm:$0xff]  ;;  %v3278_v31 = vld [vmem:[%s6448_s9 + $0x190] sm:$0xff] }
 0x462   :  { %v5663_v24 = vpop.permute.xlu0 %3129  ;;  %1976 = vmatpush.msrb.mxu0 %v3265_v9  ;;  %1999 = vmatpush.msrb.mxu1 %v3266_v55  ;;  %v1338_v30 = vsel %vm279_vm0, %v3137_v41, %v6709_v52  ;;  %v1354_v1 = vmax.f32 %v6710_v32, %v1308_v23  ;;  %v6711_v61 = vld [vmem:[#allocation61_spill] sm:$0xff]  ;;  %v3279_v55 = vld [vmem:[%s6448_s9 + $0x28] sm:$0xff] }
 0x463   :  { %v3132_v36 = vunpack.i.h.bf16 %v5663_v24  ;;  %v3131_v63 = vunpack.i.l.bf16 %v5663_v24  ;;  %v3125_v13 = vpop.permute.xlu1 %3124  ;;  %2026 = vmatpush.msrb.mxu2 %v3267_v0  ;;  %2049 = vmatpush.msrb.mxu3 %v4967_v3  ;;  %v3269_v3 = vld [vmem:[%s6448_s9 + $0xc0] sm:$0xff]  ;;  %v1355_v41 = vmax.f32 %v6711_v61, %v1338_v30  ;;  %v1566_v53 = vsel %vm1565_vm11, %v3151_v59, %v3152_v16  ;;  %v3280_v11 = vld [vmem:[%s6448_s9 + $0xa8] sm:$0xff] }
 0x464   :  { %v3127_v39 = vunpack.i.h.bf16 %v3125_v13  ;;  %v3126_v43 = vunpack.i.l.bf16 %v3125_v13  ;;  %1977 = vmatpush.msrb.mxu0 %v3268_v5  ;;  %2000 = vmatpush.msrb.mxu1 %v3269_v3  ;;  %v3276_v13 = vld [vmem:[%s6448_s9 + $0xb0] sm:$0xff]  ;;  %v6713_v0 = vunpack.i.h.bf16 %v5212_v25  ;;  %v3282_v25 = vld [vmem:[%s6448_s9 + $0x20] sm:$0xff]  ;;  %v3286_v3 = vld [vmem:[%s6448_s9 + $0x18] sm:$0xff] }
 0x465   :  { %v1579_v58 = vsel %vm1565_vm11, %v3071_v49, %v3132_v36  ;;  %2027 = vmatpush.msrb.mxu2 %v3270_v20  ;;  %2050 = vmatpush.msrb.mxu3 %v6683_v47  ;;  %v3271_v47 = vld [vmem:[%s6448_s9 + $0x38] sm:$0xff]  ;;  %v6715_v20 = vld [vmem:[#allocation55_spill] sm:$0xff]  ;;  %v3292_v61 = vld [vmem:[%s6448_s9] sm:$0xff] }
 0x466   :  { %v1622_v8 = vmax.f32 %v1493_v2, %v1579_v58  ;;  %v1577_v12 = vsel %vm1565_vm11, %v3132_v36, %v3126_v43  ;;  %v1575_v49 = vsel %vm1565_vm11, %v3126_v43, %v3127_v39  ;;  %v1573_v33 = vsel %vm1565_vm11, %v3127_v39, %v3131_v63  ;;  %1978 = vmatpush.msrb.mxu0 %v3271_v47  ;;  %v3275_v36 = vld [vmem:[%s6448_s9 + $0x30] sm:$0xff]  ;;  %v3290_v57 = vld [vmem:[%s6448_s9 + $0x8] sm:$0xff] }
 0x467   :  { %v1623_v4 = vmax.f32 %v1494_v22, %v1577_v12  ;;  %v1624_v54 = vmax.f32 %v1495_v7, %v1575_v49  ;;  %v1625_v56 = vmax.f32 %v1496_v18, %v1573_v33  ;;  %2001 = vmatpush.msrb.mxu1 %v3272_v34  ;;  %2028 = vmatpush.msrb.mxu2 %v3273_v48  ;;  %v3277_v43 = vld [vmem:[%s6448_s9 + $0x110] sm:$0xff]  ;;  %v5790_v22 = vpop.permute.xlu2 %3164  ;;  %v3284_v49 = vld [vmem:[%s6448_s9 + $0x100] sm:$0xff] }
 0x468   :  { %1897 = vmatmul.f32.gmra.mxu0 %v1622_v8  ;;  %2051 = vmatpush.msrb.mxu3 %v3274_v40  ;;  %v1596_v58 = vsel %vm1565_vm11, %v3152_v16, %v6713_v0  ;;  %v3281_v8 = vld [vmem:[%s6448_s9 + $0x108] sm:$0xff]  ;;  %v3166_v15 = vunpack.i.l.bf16 %v5790_v22  ;;  %v3288_v47 = vld [vmem:[%s6448_s9 + $0x10] sm:$0xff] }
 0x469   :  { %1920 = vmatmul.f32.gmra.mxu1 %v1623_v4  ;;  %1943 = vmatmul.f32.gmra.mxu2 %v1624_v54  ;;  %v6714_v54 = vld [vmem:[#allocation35_spill] sm:$0xff] }
 0x46a   :  { %1966 = vmatmul.f32.gmra.mxu3 %v1625_v56  ;;  %v5738_v17 = vpop.permute.xlu0 %3144  ;;  %1979 = vmatpush.msrb.mxu0 %v3275_v36  ;;  %v1568_v34 = vsel %vm1565_vm11, %v3166_v15, %v3151_v59  ;;  %v1570_v46 = vsel %vm1565_vm11, %v3101_v28, %v3166_v15  ;;  %v3293_v36 = vld [vmem:[%s6448_s9 + $0x80] sm:$0xff] }
 0x46b   :  { %v5740_v38 = vpop.permute.xlu1 %3139  ;;  %2002 = vmatpush.msrb.mxu1 %v3276_v13  ;;  %v3146_v21 = vunpack.i.l.bf16 %v5738_v17  ;;  %2029 = vmatpush.msrb.mxu2 %v3277_v43  ;;  %v3147_v52 = vunpack.i.h.bf16 %v5738_v17 }
 0x46c   :  { %v3142_v10 = vunpack.i.h.bf16 %v5740_v38  ;;  %v3141_v62 = vunpack.i.l.bf16 %v5740_v38  ;;  %2052 = vmatpush.msrb.mxu3 %v3278_v31  ;;  %1980 = vmatpush.msrb.mxu0 %v3279_v55  ;;  %v6720_v55 = vld [vmem:[#allocation52_spill] sm:$0xff] }
 0x46d   :  { %2003 = vmatpush.msrb.mxu1 %v3280_v11  ;;  %2030 = vmatpush.msrb.mxu2 %v3281_v8  ;;  %v1310_v18 = vsel %vm279_vm0, %v3146_v21, %v3136_v42  ;;  %v1312_v4 = vsel %vm279_vm0, %v3081_v45, %v3146_v21  ;;  %v6718_v21 = vld [vmem:[#allocation57_spill] sm:$0xff]  ;;  %v6722_v8 = vld [vmem:[#allocation12_spill] sm:$0xff] }
 0x46e   :  { %v1437_v6 = vsel %vm1436_vm10, %v3141_v62, %v3142_v10  ;;  %v1467_v39 = vsel %vm1436_vm10, %v3142_v10, %v6712_v50  ;;  %2053 = vmatpush.msrb.mxu3 %v5078_v51  ;;  %1981 = vmatpush.msrb.mxu0 %v3282_v25  ;;  %v3283_v51 = vld [vmem:[%s6448_s9 + $0xa0] sm:$0xff]  ;;  %v1352_v56 = vmax.f32 %v6714_v54, %v1312_v4  ;;  %v3289_v10 = vld [vmem:[%s6448_s9 + $0x90] sm:$0xff]  ;;  %v6723_v25 = vunpack.i.l.bf16 %v6722_v8 }
 0x46f   :  { %v1483_v9 = vmax.f32 %v1354_v1, %v1437_v6  ;;  %v1484_v2 = vmax.f32 %v1355_v41, %v1467_v39  ;;  %2004 = vmatpush.msrb.mxu1 %v3283_v51  ;;  %2031 = vmatpush.msrb.mxu2 %v3284_v49  ;;  %v1353_v23 = vmax.f32 %v6715_v20, %v1310_v18  ;;  %v3167_v41 = vunpack.i.h.bf16 %v5790_v22  ;;  %v6719_v50 = vld [vmem:[#allocation70_spill] sm:$0xff]  ;;  %v6725_v51 = vld [vmem:[#allocation69_spill] sm:$0xff] }
 0x470   :  { %2054 = vmatpush.msrb.mxu3 %v3285_v29  ;;  %1982 = vmatpush.msrb.mxu0 %v3286_v3  ;;  %v6724_v18 = vld [vmem:[#allocation50_spill] sm:$0xff] }
 0x471   :  { %v1612_v12 = vmax.f32 %v1483_v9, %v1566_v53  ;;  %v1613_v7 = vmax.f32 %v1484_v2, %v1596_v58  ;;  %2005 = vmatpush.msrb.mxu1 %v3287_v27  ;;  %v6721_v53 = vunpack.i.l.bf16 %v6720_v55 }
 0x472   :  { %v3160_v33 = vpop.permute.xlu0 %3159  ;;  %1983 = vmatpush.msrb.mxu0 %v3288_v47 }
 0x473   :  { %v3155_v42 = vpop.permute.xlu1 %3154  ;;  %2032 = vmatmul.f32.vlgmr.msrb.gmra.mxu2 %v1612_v12  ;;  %v3161_v45 = vunpack.i.l.bf16 %v3160_v33  ;;  %2055 = vmatmul.f32.vlgmr.msrb.gmra.mxu3 %v1613_v7 }
 0x474   :  { %v3156_v5 = vunpack.i.l.bf16 %v3155_v42  ;;  %2006 = vmatpush.msrb.mxu1 %v3289_v10  ;;  %1984 = vmatpush.msrb.mxu0 %v3290_v57  ;;  %v3157_v1 = vunpack.i.h.bf16 %v3155_v42 }
 0x475   :  { %v1309_v59 = vsel %vm279_vm0, %v3147_v52, %v3161_v45 }
 0x476   :  { %v1439_v30 = vsel %vm1436_vm10, %v3156_v5, %v3141_v62  ;;  %v1441_v38 = vsel %vm1436_vm10, %v3091_v35, %v3156_v5  ;;  %v3162_v35 = vunpack.i.h.bf16 %v3160_v33  ;;  %v6716_v62 = vld [vmem:[#allocation16_spill] sm:$0xff]  ;;  %2007 = vmatpush.msrb.mxu1 %v3291_v26  ;;  %1985 = vmatpush.msrb.mxu0 %v3292_v61  ;;  %v1370_v6 = vmax.f32 %v6718_v21, %v1309_v59 }
 0x477   :  { %v1481_v16 = vmax.f32 %v1352_v56, %v1441_v38  ;;  %v1482_v17 = vmax.f32 %v1353_v23, %v1439_v30  ;;  %v6717_v48 = vunpack.i.l.bf16 %v6716_v62 }
 0x478   :  { %2008 = vmatpush.msrb.mxu1 %v3293_v36  ;;  %v1311_v9 = vsel %vm279_vm0, %v3162_v35, %v3147_v52  ;;  %v1313_v2 = vsel %vm279_vm0, %v3111_v14, %v3162_v35  ;;  %v1427_v14 = vpop.permute.xlu2 %1426 }
 0x479   :  { %v1339_v40 = vsel %vm279_vm0, %v3161_v45, %v6717_v48  ;;  %v1610_v28 = vmax.f32 %v1481_v16, %v1570_v46  ;;  %v1611_v32 = vmax.f32 %v1482_v17, %v1568_v34  ;;  %v1368_v4 = vmax.f32 %v6724_v18, %v1313_v2 }
 0x47a   :  { %v1564_v13 = vpop.permute.xlu0 %1563  ;;  %v1371_v39 = vmax.f32 %v6719_v50, %v1339_v40  ;;  %v1369_v49 = vmax.f32 %v6725_v51, %v1311_v9  ;;  %v1442_v33 = vsel %vm1436_vm10, %v3121_v44, %v1427_v14  ;;  %v1440_v15 = vsel %vm1436_vm10, %v1427_v14, %v3157_v1  ;;  %v2144_v51 = vld [vmem:[#allocation7 + $0x10] sm:$0xff] }
 0x47b   :  { %v1435_v43 = vpop.permute.xlu1 %1434  ;;  %1986 = vmatmul.f32.vlgmr.msrb.gmra.mxu0 %v1610_v28  ;;  %2009 = vmatmul.f32.vlgmr.msrb.gmra.mxu1 %v1611_v32  ;;  %v1567_v11 = vsel %vm1565_vm11, %v3167_v41, %v1564_v13  ;;  %v1597_v60 = vsel %vm1565_vm11, %v1564_v13, %v6723_v25  ;;  %v1497_v42 = vmax.f32 %v1368_v4, %v1442_v33 }
 0x47c   :  { %v1438_v31 = vsel %vm1436_vm10, %v3157_v1, %v1435_v43  ;;  %v1468_v0 = vsel %vm1436_vm10, %v1435_v43, %v6721_v53  ;;  %v1498_v45 = vmax.f32 %v1369_v49, %v1440_v15 }
 0x47d   :  { %v1499_v58 = vmax.f32 %v1370_v6, %v1438_v31  ;;  %v1500_v22 = vmax.f32 %v1371_v39, %v1468_v0 }
 0x47f   :  { %v1628_v12 = vmax.f32 %v1499_v58, %v1567_v11  ;;  %v1629_v7 = vmax.f32 %v1500_v22, %v1597_v60 }
 0x481   :  { %2035 = vmatmul.f32.gmra.mxu2 %v1628_v12  ;;  %2058 = vmatmul.f32.gmra.mxu3 %v1629_v7 }
 0x483   :  { %v1556_v29 = vpop.permute.xlu1 %1555 }
 0x484   :  { %v1569_v5 = vsel %vm1565_vm11, %v1556_v29, %v3167_v41  ;;  %v1571_v3 = vsel %vm1565_vm11, %v3131_v63, %v1556_v29 }
 0x485   :  { %v1626_v54 = vmax.f32 %v1497_v42, %v1571_v3  ;;  %v1627_v56 = vmax.f32 %v1498_v45, %v1569_v5  ;;  %v2143_v42 = vld [vmem:[#allocation7 + $0x8] sm:$0xff]  ;;  %v2142_v45 = vld [vmem:[#allocation7] sm:$0xff]  ;;  %v2145_v5 = vld [vmem:[#allocation7 + $0x18] sm:$0xff] }
 0x487   :  { %1989 = vmatmul.f32.gmra.mxu0 %v1626_v54  ;;  %2012 = vmatmul.f32.gmra.mxu1 %v1627_v56 }
 0x48d   :  { %v1734_v37 = vpop.f32.mrf.mxu1 }
 0x493   :  { %v1757_v23 = vpop.f32.mrf.mxu2 }
 0x496   :  { %v1711_v44 = vpop.f32.mrf.mxu0 }
 0x497   :  { %v1735_v20 = vadd.f32 %v1734_v37, %v1711_v44 }
 0x499   :  { %v1758_v27 = vadd.f32 %v1757_v23, %v1735_v20  ;;  %v119_v23 = vadd.s32 128, %v6629_v19 }
 0x49c   :  { %v1780_v52 = vpop.f32.mrf.mxu3 }
 0x49d   :  { %v5902_v30 = vadd.f32 %v1780_v52, %v1758_v27  ;;  %v121_v52 = vadd.s32 384, %v6629_v19 }
 0x49f   :  { %2106 = vrot.lane.b32.xlu1 %v5902_v30, %s3403_s27 }
 0x4a6   :  { %v1760_v34 = vpop.f32.mrf.mxu2  ;;  %v1783_v16 = vpop.f32.mrf.mxu3 }
 0x4a8   :  { %v1714_v38 = vpop.f32.mrf.mxu0  ;;  %v1737_v24 = vpop.f32.mrf.mxu1 }
 0x4a9   :  { %v1738_v47 = vadd.f32 %v1737_v24, %v1714_v38  ;;  %v2063_v24 = vand.u32 255, %v119_v23 }
 0x4ab   :  { %v1761_v63 = vadd.f32 %v1760_v34, %v1738_v47  ;;  %v2065_v47 = vand.u32 255, %v121_v52  ;;  %vm2103_vm12 = vcmp.le.s32.totalorder %v2063_v24, 254 }
 0x4ad   :  { %v5906_v17 = vadd.f32 %v1783_v16, %v1761_v63  ;;  %vm5954_vm13 = vcmp.le.s32.totalorder %v2065_v47, 254  ;;  %v120_v16 = vadd.s32 256, %v6629_v19 }
 0x4af   :  { %2108 = vrot.lane.b32.xlu1 %v5906_v17, %s3403_s27 }
 0x4b5   :  { %v1803_v10 = vpop.f32.mrf.mxu0 }
 0x4b7   :  { %v1826_v46 = vpop.f32.mrf.mxu1 }
 0x4b8   :  { %v1827_v35 = vadd.f32 %v1826_v46, %v1803_v10 }
 0x4bc   :  { %v1849_v57 = vpop.f32.mrf.mxu2  ;;  %v1872_v62 = vpop.f32.mrf.mxu3 }
 0x4bd   :  { %v1850_v59 = vadd.f32 %v1849_v57, %v1827_v35 }
 0x4bf   :  { %v5910_v48 = vadd.f32 %v1872_v62, %v1850_v59 }
 0x4c1   :  { %2110 = vrot.lane.b32.xlu2 %v5910_v48, %s3403_s27 }
 0x4c5   :  { %v1806_v40 = vpop.f32.mrf.mxu0 }
 0x4c6   :  { %v1829_v26 = vpop.f32.mrf.mxu1 }
 0x4c7   :  { %v1830_v28 = vadd.f32 %v1829_v26, %v1806_v40  ;;  %v2064_v40 = vand.u32 255, %v120_v16 }
 0x4c9   :  { %vm2068_vm14 = vcmp.ge.s32.totalorder %v2064_v40, 1 }
 0x4cc   :  { %v1852_v32 = vpop.f32.mrf.mxu2 }
 0x4cd   :  { %v1853_v1 = vadd.f32 %v1852_v32, %v1830_v28  ;;  %v1875_v61 = vpop.f32.mrf.mxu3 }
 0x4cf   :  { %v5914_v41 = vadd.f32 %v1875_v61, %v1853_v1  ;;  %v2138_v61 = vld [vmem:[#allocation6] sm:$0xff] }
 0x4d1   :  { %2076 = vrot.lane.b32.xlu1 %v5914_v41, %s3402_s22  ;;  %2112 = vrot.lane.b32.xlu0 %v5914_v41, %s3403_s27 }
 0x4d5   :  { %v1895_v36 = vpop.f32.mrf.mxu0 }
 0x4d6   :  { %v1918_v13 = vpop.f32.mrf.mxu1 }
 0x4d7   :  { %v1919_v21 = vadd.f32 %v1918_v13, %v1895_v36  ;;  %v2139_v13 = vld [vmem:[#allocation6 + $0x8] sm:$0xff] }
 0x4dc   :  { %v1941_v6 = vpop.f32.mrf.mxu2 }
 0x4dd   :  { %v1942_v50 = vadd.f32 %v1941_v6, %v1919_v21  ;;  %v1964_v39 = vpop.f32.mrf.mxu3  ;;  %v2062_v21 = vand.u32 255, %v6629_v19 }
 0x4df   :  { %v5920_v43 = vadd.f32 %v1964_v39, %v1942_v50  ;;  %vm2066_vm2 = vcmp.ge.s32.totalorder %v2062_v21, 1 }
 0x4e1   :  { %2078 = vrot.lane.b32.xlu1 %v5920_v43, %s3402_s22  ;;  %2114 = vrot.lane.b32.xlu0 %v5920_v43, %s3403_s27 }
 0x4e5   :  { %v1898_v9 = vpop.f32.mrf.mxu0 }
 0x4e6   :  { %v1921_v2 = vpop.f32.mrf.mxu1 }
 0x4e7   :  { %v1922_v31 = vadd.f32 %v1921_v2, %v1898_v9  ;;  %v2140_v9 = vld [vmem:[#allocation6 + $0x10] sm:$0xff] }
 0x4ec   :  { %v1944_v55 = vpop.f32.mrf.mxu2 }
 0x4ed   :  { %v1945_v53 = vadd.f32 %v1944_v55, %v1922_v31  ;;  %v1967_v0 = vpop.f32.mrf.mxu3 }
 0x4ef   :  { %v5926_v58 = vadd.f32 %v1967_v0, %v1945_v53  ;;  %v2141_v0 = vld [vmem:[#allocation6 + $0x18] sm:$0xff] }
 0x4f1   :  { %2116 = vrot.lane.b32.xlu0 %v5926_v58, %s3403_s27 }
 0x4f6   :  { %v2033_v25 = vpop.f32.mrf.mxu2  ;;  %v2056_v14 = vpop.f32.mrf.mxu3 }
 0x4f8   :  { %v1987_v22 = vpop.f32.mrf.mxu0  ;;  %v2010_v11 = vpop.f32.mrf.mxu1 }
 0x4f9   :  { %v2011_v8 = vadd.f32 %v2010_v11, %v1987_v22  ;;  %2080 = vrot.lane.b32.xlu0 %v5926_v58, %s3402_s22 }
 0x4fb   :  { %v2034_v60 = vadd.f32 %v2033_v25, %v2011_v8 }
 0x4fd   :  { %v5932_v12 = vadd.f32 %v2056_v14, %v2034_v60 }
 0x4ff   :  { %2118 = vrot.lane.b32.xlu2 %v5932_v12, %s3403_s27  ;;  %2082 = vrot.lane.b32.xlu1 %v5932_v12, %s3402_s22 }
 0x504   :  { %v1990_v7 = vpop.f32.mrf.mxu0  ;;  %v2013_v18 = vpop.f32.mrf.mxu1 }
 0x505   :  { %v2014_v4 = vadd.f32 %v2013_v18, %v1990_v7  ;;  %v2036_v49 = vpop.f32.mrf.mxu2  ;;  %v2059_v15 = vpop.f32.mrf.mxu3 }
 0x507   :  { %v2037_v33 = vadd.f32 %v2036_v49, %v2014_v4  ;;  %2158 = vperm.xlu1 %2935, %v2144_v51  }
 0x509   :  { %v2060_v29 = vadd.f32 %v2059_v15, %v2037_v33 }
 0x50b   :  { %2120 = vrot.lane.b32.xlu2 %v2060_v29, %s3403_s27  ;;  %2084 = vrot.lane.b32.xlu0 %v2060_v29, %s3402_s22 }
 0x511   :  { %v2107_v3 = vpop.permute.xlu1 %2106 }
 0x513   :  { %2074 = vrot.lane.b32.xlu2 %v5910_v48, %s3402_s22  ;;  %2070 = vrot.lane.b32.xlu0 %v5902_v30, %s3402_s22 }
 0x51b   :  { %2072 = vrot.lane.b32.xlu2 %v5906_v17, %s3402_s22  ;;  %2153 = vperm.xlu0 %2937, %v2143_v42   ;;  %v2111_v54 = vpop.permute.xlu2 %2110 }
 0x51c   :  { %v2126_v20 = vsel %vm279_vm0, %v2107_v3, %v2111_v54 }
 0x521   :  { %v2109_v56 = vpop.permute.xlu1 %2108 }
 0x523   :  { %2148 = vperm.xlu2 %2936, %v2142_v45  }
 0x52b   :  { %2163 = vperm.xlu2 %2936, %v2145_v5  }
 0x543   :  { %v2113_v37 = vpop.permute.xlu0 %2112  ;;  %v2077_v35 = vpop.permute.xlu1 %2076 }
 0x544   :  { %v2127_v44 = vsel %vm279_vm0, %v2109_v56, %v2113_v37 }
 0x545   :  { %2189 = vmatpush.msra.mxu0 %v2127_v44 }
 0x547   :  { %2190 = vmatpush.msra.mxu0 %v2126_v20 }
 0x549   :  { %2191 = vmatpush.msra.mxu0 %v5906_v17 }
 0x54b   :  { %2192 = vmatpush.msra.mxu0 %v5902_v30 }
 0x553   :  { %v2115_v27 = vpop.permute.xlu0 %2114  ;;  %v2079_v1 = vpop.permute.xlu1 %2078 }
 0x554   :  { %v2124_v57 = vsel %vm279_vm0, %v2111_v54, %v2115_v27 }
 0x559   :  { %v2119_v38 = vpop.permute.xlu2 %2118 }
 0x55a   :  { %v2128_v59 = vsel %vm279_vm0, %v2119_v38, %v2107_v3  ;;  %v2122_v62 = vsel %vm279_vm0, %v2115_v27, %v2119_v38 }
 0x563   :  { %v2117_v34 = vpop.permute.xlu0 %2116 }
 0x564   :  { %v2125_v17 = vsel %vm279_vm0, %v2113_v37, %v2117_v34 }
 0x565   :  { %v2121_v30 = vpop.permute.xlu2 %2120  ;;  %2856 = vmatpush.msk.msra.mxu1 %vm2103_vm12, %v2125_v17 }
 0x566   :  { %v2123_v10 = vsel %vm279_vm0, %v2117_v34, %v2121_v30  ;;  %v2129_v46 = vsel %vm279_vm0, %v2121_v30, %v2109_v56 }
 0x567   :  { %2247 = vmatpush.msra.mxu2 %v2123_v10  ;;  %2868 = vmatpush.msk.msra.mxu3 %vm5954_vm13, %v2129_v46 }
 0x568   :  { %2857 = vmatpush.msk.msra.mxu1 %vm2103_vm12, %v2124_v57 }
 0x569   :  { %2248 = vmatpush.msra.mxu2 %v2122_v62  ;;  %2869 = vmatpush.msk.msra.mxu3 %vm5954_vm13, %v2128_v59 }
 0x56a   :  { %2220 = vmatpush.msra.mxu1 %v5914_v41 }
 0x56b   :  { %2249 = vmatpush.msra.mxu2 %v5926_v58  ;;  %2278 = vmatpush.msra.mxu3 %v2060_v29  ;;  %v2081_v26 = vpop.permute.xlu0 %2080 }
 0x56c   :  { %2221 = vmatpush.msra.mxu1 %v5910_v48  ;;  %v2089_v32 = vsel %vm198_vm1, %v2077_v35, %v2081_v26 }
 0x56d   :  { %2279 = vmatpush.msra.mxu3 %v5932_v12  ;;  %v2075_v28 = vpop.permute.xlu2 %2074  ;;  %2250 = vmatpush.msra.mxu2 %v5920_v43 }
 0x56e   :  { %v2088_v41 = vsel %vm198_vm1, %v2075_v28, %v2079_v1 }
 0x56f   :  { %2862 = vmatpush.msk.msra.mxu2 %vm2068_vm14, %v2089_v32 }
 0x571   :  { %2863 = vmatpush.msk.msra.mxu2 %vm2068_vm14, %v2088_v41  ;;  %v2083_v6 = vpop.permute.xlu1 %2082 }
 0x572   :  { %2864 = vmatmul.msk.f32.vlgmr.msra.gmra.mxu2 %vm2166_vm15, %v2138_v61  ;;  %v2086_v2 = vsel %vm198_vm1, %v2079_v1, %v2083_v6 }
 0x575   :  { %v2073_v48 = vpop.permute.xlu2 %2072 }
 0x576   :  { %v2091_v36 = vsel %vm198_vm1, %v2073_v48, %v2077_v35 }
 0x577   :  { %2222 = vmatpush.msra.mxu1 %v2091_v36 }
 0x579   :  { %v2159_v20 = vpop.permute.xlu1 %2158 }
 0x57a   :  { %2865 = vmatmul.msk.f32.gmra.mxu2 %vm2166_vm15, %v2139_v13 }
 0x57d   :  { %v2085_v50 = vpop.permute.xlu0 %2084  ;;  %v2149_v22 = vpop.permute.xlu2 %2148 }
 0x57e   :  { %v2093_v39 = vsel %vm198_vm1, %v2085_v50, %v2073_v48  ;;  %v2087_v43 = vsel %vm198_vm1, %v2081_v26, %v2085_v50 }
 0x57f   :  { %2850 = vmatpush.msk.msra.mxu0 %vm2066_vm2, %v2093_v39  ;;  %2280 = vmatpush.msra.mxu3 %v2087_v43  ;;  %v2435_v43 = vld [vmem:[%s6446_s7 + $0x10] sm:$0xff] }
 0x581   :  { %2281 = vmatpush.msra.mxu3 %v2086_v2  ;;  %v2475_v2 = vld [vmem:[%s6447_s8 + $0x10] sm:$0xff] }
 0x582   :  { %2866 = vmatmul.msk.f32.gmra.mxu2 %vm2166_vm15, %v2140_v9  ;;  %2870 = vmatmul.msk.f32.vlgmr.msra.gmra.mxu3 %vm2166_vm15, %v2138_v61 }
 0x585   :  { %v2071_v31 = vpop.permute.xlu0 %2070  ;;  %v2164_v30 = vpop.permute.xlu2 %2163 }
 0x586   :  { %v2092_v55 = vsel %vm198_vm1, %v2083_v6, %v2071_v31  ;;  %v2090_v53 = vsel %vm198_vm1, %v2071_v31, %v2075_v28 }
 0x587   :  { %2851 = vmatpush.msk.msra.mxu0 %vm2066_vm2, %v2092_v55  ;;  %2223 = vmatpush.msra.mxu1 %v2090_v53 }
 0x588   :  { %2852 = vmatmul.msk.f32.vlgmr.msra.gmra.mxu0 %vm2166_vm15, %v2138_v61  ;;  %2858 = vmatmul.msk.f32.vlgmr.msra.gmra.mxu1 %vm2166_vm15, %v2138_v61 }
 0x58a   :  { %2867 = vmatmul.msk.f32.gmra.mxu2 %vm2166_vm15, %v2141_v0  ;;  %2871 = vmatmul.msk.f32.gmra.mxu3 %vm2166_vm15, %v2139_v13 }
 0x58d   :  { %v2154_v49 = vpop.permute.xlu0 %2153 }
 0x590   :  { %2853 = vmatmul.msk.f32.gmra.mxu0 %vm2166_vm15, %v2139_v13  ;;  %2859 = vmatmul.msk.f32.gmra.mxu1 %vm2166_vm15, %v2139_v13 }
 0x592   :  { %2872 = vmatmul.msk.f32.gmra.mxu3 %vm2166_vm15, %v2140_v9 }
 0x598   :  { %2854 = vmatmul.msk.f32.gmra.mxu0 %vm2166_vm15, %v2140_v9  ;;  %2860 = vmatmul.msk.f32.gmra.mxu1 %vm2166_vm15, %v2140_v9  ;;  %v2473_v9 = vld [vmem:[%s6447_s8] sm:$0xff] }
 0x59a   :  { %2873 = vmatmul.msk.f32.gmra.mxu3 %vm2166_vm15, %v2141_v0 }
 0x5a0   :  { %2855 = vmatmul.msk.f32.gmra.mxu0 %vm2166_vm15, %v2141_v0  ;;  %2861 = vmatmul.msk.f32.gmra.mxu1 %vm2166_vm15, %v2141_v0 }
 0x5f5   :  { %v2254_v58 = vpop.f32.mrf.mxu2 }
 0x5f6   :  { %v6017_v12 = vadd.f32 %v2254_v58, %v2149_v22 }
 0x5fd   :  { %v2257_v7 = vpop.f32.mrf.mxu2 }
 0x5fe   :  { %v2258_v3 = vadd.f32 %v2257_v7, %v2154_v49 }
 0x605   :  { %v2196_v11 = vpop.f32.mrf.mxu0  ;;  %v2225_v8 = vpop.f32.mrf.mxu1 }
 0x606   :  { %v6013_v25 = vadd.f32 %v2196_v11, %v2149_v22  ;;  %v6015_v60 = vadd.f32 %v2225_v8, %v2149_v22  ;;  %v2283_v14 = vpop.f32.mrf.mxu3  ;;  %v2260_v56 = vpop.f32.mrf.mxu2 }
 0x607   :  { %v6021_v4 = vadd.f32 %v2283_v14, %v2149_v22  ;;  %v6025_v34 = vadd.f32 %v2260_v56, %v2159_v20 }
 0x608   :  { %v2295_v18 = vadd.f32 %v6015_v60, %v6013_v25 }
 0x60a   :  { %v2296_v51 = vadd.f32 %v2295_v18, %v6017_v12 }
 0x60c   :  { %v2297_v33 = vadd.f32 %v2296_v51, %v6021_v4 }
 0x60d   :  { %v2199_v15 = vpop.f32.mrf.mxu0  ;;  %v2228_v29 = vpop.f32.mrf.mxu1 }
 0x60e   :  { %v2200_v42 = vadd.f32 %v2199_v15, %v2154_v49  ;;  %v2229_v45 = vadd.f32 %v2228_v29, %v2154_v49  ;;  %v2286_v5 = vpop.f32.mrf.mxu3  ;;  %2298 = vadd.xlane.f32.xlu1 %v2297_v33  ;;  %v2263_v10 = vpop.f32.mrf.mxu2 }
 0x60f   :  { %v2287_v37 = vadd.f32 %v2286_v5, %v2154_v49  ;;  %v6031_v26 = vadd.f32 %v2263_v10, %v2164_v30 }
 0x610   :  { %v2300_v54 = vadd.f32 %v2229_v45, %v2200_v42 }
 0x612   :  { %v2301_v44 = vadd.f32 %v2300_v54, %v2258_v3 }
 0x614   :  { %v2302_v23 = vadd.f32 %v2301_v44, %v2287_v37 }
 0x615   :  { %v2202_v27 = vpop.f32.mrf.mxu0  ;;  %v2231_v52 = vpop.f32.mrf.mxu1 }
 0x616   :  { %v2203_v38 = vadd.f32 %v2202_v27, %v2159_v20  ;;  %v2232_v24 = vadd.f32 %v2231_v52, %v2159_v20  ;;  %v2289_v47 = vpop.f32.mrf.mxu3  ;;  %2303 = vadd.xlane.f32.xlu2 %v2302_v23 }
 0x617   :  { %v6027_v16 = vadd.f32 %v2289_v47, %v2159_v20  ;;  %v2436_v47 = vld [vmem:[%s6446_s7 + $0x18] sm:$0xff] }
 0x618   :  { %v2305_v63 = vadd.f32 %v2232_v24, %v2203_v38 }
 0x61a   :  { %v2306_v17 = vadd.f32 %v2305_v63, %v6025_v34 }
 0x61c   :  { %v2307_v46 = vadd.f32 %v2306_v17, %v6027_v16 }
 0x61d   :  { %v2205_v35 = vpop.f32.mrf.mxu0  ;;  %v2234_v57 = vpop.f32.mrf.mxu1 }
 0x61e   :  { %v2206_v59 = vadd.f32 %v2205_v35, %v2164_v30  ;;  %v2235_v62 = vadd.f32 %v2234_v57, %v2164_v30  ;;  %2308 = vadd.xlane.f32.xlu0 %v2307_v46  ;;  %v2292_v40 = vpop.f32.mrf.mxu3 }
 0x61f   :  { %v6033_v32 = vadd.f32 %v2292_v40, %v2164_v30 }
 0x620   :  { %v2310_v28 = vadd.f32 %v2235_v62, %v2206_v59 }
 0x622   :  { %v2311_v1 = vadd.f32 %v2310_v28, %v6031_v26 }
 0x624   :  { %v2312_v61 = vadd.f32 %v2311_v1, %v6033_v32 }
 0x626   :  { %2313 = vadd.xlane.f32.xlu1 %v2312_v61 }
 0x681   :  { %v2299_v41 = vpop.xlane.xlu1 %2298 }
 0x689   :  { %v2304_v21 = vpop.xlane.xlu2 %2303 }
 0x691   :  { %v2309_v48 = vpop.xlane.xlu0 %2308 }
 0x692   :  { %v2315_v36 = vadd.f32 %v2309_v48, %v2299_v41 }
 0x694   :  { %v2317_v13 = vmul.f32 0.0009765625, %v2315_v36 }
 0x696   :  { %2321 = vperm.xlu0 %2937, %v2317_v13  }
 0x699   :  { %v2314_v6 = vpop.xlane.xlu1 %2313 }
 0x69a   :  { %v2316_v50 = vadd.f32 %v2314_v6, %v2304_v21 }
 0x69c   :  { %v2318_v39 = vmul.f32 0.0009765625, %v2316_v50 }
 0x69e   :  { %2326 = vperm.xlu2 %2936, %v2318_v39  }
 0x6a6   :  { %2449 = vperm.xlu2 %2936, %v2435_v43  }
 0x6ae   :  { %2479 = vperm.xlu2 %2936, %v2473_v9  }
 0x6b6   :  { %2489 = vperm.xlu2 %2936, %v2475_v2  }
 0x6f8   :  { %v2327_v31 = vpop.permute.xlu2 %2326 }
 0x6f9   :  { %v6046_v55 = vsub.f32 %v2200_v42, %v2327_v31  ;;  %v6048_v53 = vsub.f32 %v2229_v45, %v2327_v31  ;;  %v6050_v0 = vsub.f32 %v2258_v3, %v2327_v31  ;;  %v6052_v58 = vsub.f32 %v2287_v37, %v2327_v31 }
 0x6fa   :  { %v6093_v27 = vsub.f32 %v2206_v59, %v2327_v31  ;;  %v6095_v52 = vsub.f32 %v2235_v62, %v2327_v31  ;;  %v6115_v35 = vsub.f32 %v6033_v32, %v2327_v31 }
 0x6fb   :  { %v2349_v22 = vmul.f32 %v6046_v55, %v6046_v55  ;;  %v2350_v11 = vmul.f32 %v6048_v53, %v6048_v53  ;;  %v2351_v8 = vmul.f32 %v6050_v0, %v6050_v0  ;;  %v2352_v7 = vmul.f32 %v6052_v58, %v6052_v58 }
 0x6fc   :  { %v2358_v17 = vmul.f32 %v6095_v52, %v6095_v52  ;;  %v2360_v62 = vmul.f32 %v6115_v35, %v6115_v35 }
 0x6fd   :  { %v2366_v14 = vadd.f32 %v2350_v11, %v2349_v22 }
 0x6ff   :  { %v2367_v18 = vadd.f32 %v2366_v14, %v2351_v8 }
 0x701   :  { %v2368_v51 = vadd.f32 %v2367_v18, %v2352_v7 }
 0x703   :  { %2369 = vadd.xlane.f32.xlu0 %v2368_v51  ;;  %v2434_v51 = vld [vmem:[%s6446_s7 + $0x8] sm:$0xff] }
 0x708   :  { %v2322_v49 = vpop.permute.xlu0 %2321 }
 0x709   :  { %v6063_v33 = vsub.f32 %v6013_v25, %v2322_v49  ;;  %v6066_v15 = vsub.f32 %v6015_v60, %v2322_v49  ;;  %v6069_v29 = vsub.f32 %v6017_v12, %v2322_v49  ;;  %v6071_v42 = vsub.f32 %v2203_v38, %v2322_v49 }
 0x70a   :  { %v6073_v45 = vsub.f32 %v2232_v24, %v2322_v49  ;;  %v6076_v5 = vsub.f32 %v6021_v4, %v2322_v49  ;;  %v6091_v44 = vsub.f32 %v6025_v34, %v2322_v49  ;;  %v6098_v38 = vsub.f32 %v6027_v16, %v2322_v49 }
 0x70b   :  { %v2345_v3 = vmul.f32 %v6063_v33, %v6063_v33  ;;  %v2346_v25 = vmul.f32 %v6066_v15, %v6066_v15  ;;  %v2347_v60 = vmul.f32 %v6069_v29, %v6069_v29  ;;  %v2353_v12 = vmul.f32 %v6071_v42, %v6071_v42 }
 0x70c   :  { %v2354_v56 = vmul.f32 %v6073_v45, %v6073_v45  ;;  %v2348_v4 = vmul.f32 %v6076_v5, %v6076_v5  ;;  %v2355_v24 = vmul.f32 %v6091_v44, %v6091_v44  ;;  %v2357_v34 = vmul.f32 %v6093_v27, %v6093_v27 }
 0x70d   :  { %v2361_v54 = vadd.f32 %v2346_v25, %v2345_v3  ;;  %v2356_v30 = vmul.f32 %v6098_v38, %v6098_v38  ;;  %v6112_v16 = vsub.f32 %v6031_v26, %v2327_v31  ;;  %v2433_v26 = vld [vmem:[%s6446_s7] sm:$0xff]  ;;  %v2476_v25 = vld [vmem:[%s6447_s8 + $0x18] sm:$0xff] }
 0x70e   :  { %v2371_v23 = vadd.f32 %v2354_v56, %v2353_v12  ;;  %v2376_v46 = vadd.f32 %v2358_v17, %v2357_v34 }
 0x70f   :  { %v2362_v37 = vadd.f32 %v2361_v54, %v2347_v60  ;;  %v2359_v57 = vmul.f32 %v6112_v16, %v6112_v16  ;;  %v2474_v60 = vld [vmem:[%s6447_s8 + $0x8] sm:$0xff]  ;;  %v2450_v54 = vpop.permute.xlu2 %2449 }
 0x710   :  { %v2372_v63 = vadd.f32 %v2371_v23, %v2355_v24 }
 0x711   :  { %v2363_v20 = vadd.f32 %v2362_v37, %v2348_v4  ;;  %v2377_v59 = vadd.f32 %v2376_v46, %v2359_v57 }
 0x712   :  { %v2373_v10 = vadd.f32 %v2372_v63, %v2356_v30 }
 0x713   :  { %2364 = vadd.xlane.f32.xlu1 %v2363_v20  ;;  %v2378_v40 = vadd.f32 %v2377_v59, %v2360_v62 }
 0x717   :  { %2454 = vperm.xlu0 %2937, %v2436_v47   ;;  %v2480_v12 = vpop.permute.xlu2 %2479 }
 0x71b   :  { %2374 = vadd.xlane.f32.xlu1 %v2373_v10 }
 0x71f   :  { %v2490_v56 = vpop.permute.xlu2 %2489 }
 0x723   :  { %2379 = vadd.xlane.f32.xlu1 %v2378_v40 }
 0x73c   :  { %2439 = vperm.xlu1 %2935, %v2433_v26  }
 0x776   :  { %v2370_v48 = vpop.xlane.xlu0 %2369 }
 0x786   :  { %v2365_v28 = vpop.xlane.xlu1 %2364 }
 0x78e   :  { %v2375_v1 = vpop.xlane.xlu1 %2374 }
 0x78f   :  { %v2381_v61 = vadd.f32 %v2375_v1, %v2365_v28 }
 0x791   :  { %v2383_v41 = vmul.f32 0.0009765625, %v2381_v61 }
 0x793   :  { %v2385_v32 = vadd.f32 1e-05, %v2383_v41 }
 0x795   :  { %3230 = vrsqrt.f32 %v2385_v32  ;;  %vm2393_vm3 = vweird.f32 %v2385_v32 }
 0x796   :  { %v2380_v36 = vpop.xlane.xlu1 %2379 }
 0x797   :  { %v2382_v13 = vadd.f32 %v2380_v36, %v2370_v48 }
 0x799   :  { %v2384_v21 = vmul.f32 0.0009765625, %v2382_v13 }
 0x79b   :  { %v3231_v6 = vpop.eup %3230  ;;  %v2386_v50 = vadd.f32 1e-05, %v2384_v21 }
 0x79c   :  { %v2388_v39 = vmul.f32 %v3231_v6, %v2385_v32  ;;  %vm2394_vm1 = vweird.f32 %v3231_v6 }
 0x79d   :  { %3232 = vrsqrt.f32 %v2386_v50  ;;  %vm2395_vm4 = vmor %vm2393_vm3, %vm2394_vm1  ;;  %vm2403_vm6 = vweird.f32 %v2386_v50 }
 0x79e   :  { %v2389_v43 = vmul.f32 %v3231_v6, %v2388_v39 }
 0x7a0   :  { %v2390_v9 = vmul.f32 0.5, %v2389_v43 }
 0x7a2   :  { %v2391_v2 = vsub.f32 1.5, %v2390_v9 }
 0x7a3   :  { %v3233_v31 = vpop.eup %3232 }
 0x7a4   :  { %v2398_v22 = vmul.f32 %v3233_v31, %v2386_v50  ;;  %v2392_v11 = vmul.f32 %v3231_v6, %v2391_v2  ;;  %vm2404_vm5 = vweird.f32 %v3233_v31 }
 0x7a5   :  { %vm2405_vm7 = vmor %vm2403_vm6, %vm2404_vm5 }
 0x7a6   :  { %v2399_v8 = vmul.f32 %v3233_v31, %v2398_v22  ;;  %v2396_v14 = vsel %vm2395_vm4, %v3231_v6, %v2392_v11 }
 0x7a7   :  { %2409 = vperm.xlu2 %2936, %v2396_v14  }
 0x7a8   :  { %v2400_v7 = vmul.f32 0.5, %v2399_v8 }
 0x7aa   :  { %v2401_v18 = vsub.f32 1.5, %v2400_v7 }
 0x7ac   :  { %v2402_v49 = vmul.f32 %v3233_v31, %v2401_v18  ;;  %v2455_v18 = vpop.permute.xlu0 %2454 }
 0x7ae   :  { %v2406_v3 = vsel %vm2405_vm7, %v3233_v31, %v2402_v49  ;;  %v2440_v47 = vpop.permute.xlu1 %2439 }
 0x7af   :  { %2444 = vperm.xlu2 %2936, %v2434_v51   ;;  %2414 = vperm.xlu1 %2935, %v2406_v3  }
 0x7b7   :  { %2494 = vperm.xlu2 %2936, %v2476_v25   ;;  %2484 = vperm.xlu1 %2935, %v2474_v60  }
 0x801   :  { %v2410_v4 = vpop.permute.xlu2 %2409 }
 0x802   :  { %v2417_v37 = vmul.f32 %v2410_v4, %v6063_v33  ;;  %v2418_v20 = vmul.f32 %v2410_v4, %v6066_v15  ;;  %v2425_v23 = vmul.f32 %v2410_v4, %v6071_v42  ;;  %v2426_v24 = vmul.f32 %v2410_v4, %v6073_v45 }
 0x803   :  { %v2419_v63 = vmul.f32 %v2410_v4, %v6069_v29  ;;  %v2420_v34 = vmul.f32 %v2410_v4, %v6076_v5  ;;  %v2427_v17 = vmul.f32 %v2410_v4, %v6091_v44  ;;  %v2428_v30 = vmul.f32 %v2410_v4, %v6098_v38 }
 0x804   :  { %v2457_v10 = vmul.f32 %v2440_v47, %v2417_v37  ;;  %v2458_v46 = vmul.f32 %v2440_v47, %v2418_v20  ;;  %v2465_v57 = vmul.f32 %v2450_v54, %v2425_v23  ;;  %v2466_v59 = vmul.f32 %v2450_v54, %v2426_v24 }
 0x805   :  { %v2459_v33 = vmul.f32 %v2440_v47, %v2419_v63  ;;  %v2460_v62 = vmul.f32 %v2440_v47, %v2420_v34  ;;  %v2467_v15 = vmul.f32 %v2450_v54, %v2427_v17  ;;  %v2468_v40 = vmul.f32 %v2450_v54, %v2428_v30 }
 0x806   :  { %v2497_v42 = vadd.f32 %v2480_v12, %v2457_v10  ;;  %v2498_v26 = vadd.f32 %v2480_v12, %v2458_v46  ;;  %v2505_v45 = vadd.f32 %v2490_v56, %v2465_v57  ;;  %v2506_v28 = vadd.f32 %v2490_v56, %v2466_v59 }
 0x807   :  { %v2499_v1 = vadd.f32 %v2480_v12, %v2459_v33  ;;  %v2500_v29 = vadd.f32 %v2480_v12, %v2460_v62  ;;  %v2507_v61 = vadd.f32 %v2490_v56, %v2467_v15  ;;  %v2508_v5 = vadd.f32 %v2490_v56, %v2468_v40 }
 0x808   :  { %v2513_v41 = vmax.f32 %v2497_v42, 0.0  ;;  %v2514_v44 = vmax.f32 %v2498_v26, 0.0  ;;  %v2521_v32 = vmax.f32 %v2505_v45, 0.0  ;;  %v2522_v38 = vmax.f32 %v2506_v28, 0.0  ;;  %v2680_v45 = vld [vmem:[%s6449_s10 + $0x178] sm:$0xff]  ;;  %v2679_v28 = vld [vmem:[%s6449_s10 + $0x170] sm:$0xff] }
 0x809   :  { %v2515_v48 = vmax.f32 %v2499_v1, 0.0  ;;  %v2516_v36 = vmax.f32 %v2500_v29, 0.0  ;;  %v2523_v13 = vmax.f32 %v2507_v61, 0.0  ;;  %v2524_v21 = vmax.f32 %v2508_v5, 0.0  ;;  %v2445_v31 = vpop.permute.xlu2 %2444  ;;  %2743 = vmatpush.msrb.mxu2 %v2680_v45  ;;  %v2678_v1 = vld [vmem:[%s6449_s10 + $0x168] sm:$0xff]  ;;  %v2648_v29 = vld [vmem:[%s6449_s10 + $0x78] sm:$0xff] }
 0x80a   :  { %v6141_v6 = vmax.f32 %v2513_v41, %v2521_v32  ;;  %v6143_v50 = vmax.f32 %v2514_v44, %v2522_v38  ;;  %v2664_v61 = vld [vmem:[%s6449_s10 + $0xf8] sm:$0xff]  ;;  %2697 = vmatpush.msrb.mxu0 %v2648_v29  ;;  %v2647_v41 = vld [vmem:[%s6449_s10 + $0x70] sm:$0xff]  ;;  %v2646_v38 = vld [vmem:[%s6449_s10 + $0x68] sm:$0xff] }
 0x80b   :  { %v6145_v39 = vmax.f32 %v2515_v48, %v2523_v13  ;;  %v6147_v43 = vmax.f32 %v2516_v36, %v2524_v21  ;;  %2720 = vmatpush.msrb.mxu1 %v2664_v61  ;;  %v2696_v5 = vld [vmem:[%s6449_s10 + $0x1f8] sm:$0xff]  ;;  %v2663_v44 = vld [vmem:[%s6449_s10 + $0xf0] sm:$0xff]  ;;  %2744 = vmatpush.msrb.mxu2 %v2679_v28  ;;  %v2677_v48 = vld [vmem:[%s6449_s10 + $0x160] sm:$0xff] }
 0x80c   :  { %v3183_v9 = vpack.i.bf16 %v6143_v50, %v6141_v6  ;;  %2766 = vmatpush.msrb.mxu3 %v2696_v5  ;;  %v2695_v32 = vld [vmem:[%s6449_s10 + $0x1f0] sm:$0xff]  ;;  %2698 = vmatpush.msrb.mxu0 %v2647_v41  ;;  %v2662_v36 = vld [vmem:[%s6449_s10 + $0xe8] sm:$0xff]  ;;  %v2645_v21 = vld [vmem:[%s6449_s10 + $0x60] sm:$0xff] }
 0x80d   :  { %v3168_v2 = vpack.i.bf16 %v6147_v43, %v6145_v39  ;;  %2721 = vmatpush.msrb.mxu1 %v2663_v44  ;;  %v2694_v13 = vld [vmem:[%s6449_s10 + $0x1e8] sm:$0xff]  ;;  %2745 = vmatpush.msrb.mxu2 %v2678_v1  ;;  %v2635_v45 = vld [vmem:[%s6449_s10 + $0x10] sm:$0xff]  ;;  %v2633_v41 = vld [vmem:[%s6449_s10] sm:$0xff] }
 0x80e   :  { %3184 = vrot.lane.b32.xlu0 %v3183_v9, %s3405_s3  ;;  %3174 = vrot.lane.b32.xlu2 %v3183_v9, %s3403_s27  ;;  %v2651_v28 = vld [vmem:[%s6449_s10 + $0x90] sm:$0xff]  ;;  %v2634_v29 = vld [vmem:[%s6449_s10 + $0x8] sm:$0xff] }
 0x80f   :  { %3169 = vrot.lane.b32.xlu1 %v3168_v2, %s3403_s27  ;;  %2767 = vmatpush.msrb.mxu3 %v2695_v32  ;;  %v2683_v1 = vld [vmem:[%s6449_s10 + $0x190] sm:$0xff]  ;;  %v2650_v61 = vld [vmem:[%s6449_s10 + $0x88] sm:$0xff]  ;;  %v2649_v44 = vld [vmem:[%s6449_s10 + $0x80] sm:$0xff] }
 0x810   :  { %2699 = vmatpush.msrb.mxu0 %v2646_v38  ;;  %2722 = vmatpush.msrb.mxu1 %v2662_v36  ;;  %v2682_v5 = vld [vmem:[%s6449_s10 + $0x188] sm:$0xff]  ;;  %v2681_v32 = vld [vmem:[%s6449_s10 + $0x180] sm:$0xff] }
 0x811   :  { %2746 = vmatpush.msrb.mxu2 %v2677_v48  ;;  %2768 = vmatpush.msrb.mxu3 %v2694_v13 }
 0x812   :  { %2700 = vmatpush.msrb.mxu0 %v2645_v21 }
 0x816   :  { %3189 = vrot.lane.b32.xlu2 %v3168_v2, %s3406_s4 }
 0x817   :  { %3179 = vrot.lane.b32.xlu1 %v3168_v2, %s3405_s3  ;;  %v2676_v2 = vld [vmem:[%s6449_s10 + $0x158] sm:$0xff] }
 0x818   :  { %2747 = vmatpush.msrb.mxu2 %v2676_v2 }
 0x81f   :  { %3194 = vrot.lane.b32.xlu1 %v3183_v9, %s3406_s4  ;;  %v2661_v9 = vld [vmem:[%s6449_s10 + $0xe0] sm:$0xff] }
 0x820   :  { %2723 = vmatpush.msrb.mxu1 %v2661_v9 }
 0x821   :  { %v2415_v22 = vpop.permute.xlu1 %2414 }
 0x822   :  { %v2429_v11 = vmul.f32 %v2415_v22, %v6093_v27  ;;  %v2430_v8 = vmul.f32 %v2415_v22, %v6095_v52  ;;  %v2431_v14 = vmul.f32 %v2415_v22, %v6112_v16  ;;  %v2432_v7 = vmul.f32 %v2415_v22, %v6115_v35  ;;  %v2495_v27 = vpop.permute.xlu2 %2494 }
 0x823   :  { %v2421_v51 = vmul.f32 %v2415_v22, %v6046_v55  ;;  %v2422_v49 = vmul.f32 %v2415_v22, %v6048_v53  ;;  %v2423_v3 = vmul.f32 %v2415_v22, %v6050_v0  ;;  %v2424_v25 = vmul.f32 %v2415_v22, %v6052_v58  ;;  %v2644_v22 = vld [vmem:[%s6449_s10 + $0x58] sm:$0xff] }
 0x824   :  { %v2469_v60 = vmul.f32 %v2455_v18, %v2429_v11  ;;  %v2470_v54 = vmul.f32 %v2455_v18, %v2430_v8  ;;  %v2471_v12 = vmul.f32 %v2455_v18, %v2431_v14  ;;  %v2472_v56 = vmul.f32 %v2455_v18, %v2432_v7  ;;  %v2660_v11 = vld [vmem:[%s6449_s10 + $0xd8] sm:$0xff]  ;;  %v2675_v8 = vld [vmem:[%s6449_s10 + $0x150] sm:$0xff]  ;;  %v2674_v7 = vld [vmem:[%s6449_s10 + $0x148] sm:$0xff]  ;;  %2701 = vmatpush.msrb.mxu0 %v2644_v22 }
 0x825   :  { %v2461_v20 = vmul.f32 %v2445_v31, %v2421_v51  ;;  %v2462_v35 = vmul.f32 %v2445_v31, %v2422_v49  ;;  %v2463_v23 = vmul.f32 %v2445_v31, %v2423_v3  ;;  %v2464_v24 = vmul.f32 %v2445_v31, %v2424_v25  ;;  %v2693_v31 = vld [vmem:[%s6449_s10 + $0x1e0] sm:$0xff]  ;;  %v2692_v14 = vld [vmem:[%s6449_s10 + $0x1d8] sm:$0xff]  ;;  %2724 = vmatpush.msrb.mxu1 %v2660_v11  ;;  %v2643_v51 = vld [vmem:[%s6449_s10 + $0x50] sm:$0xff] }
 0x826   :  { %v2509_v4 = vadd.f32 %v2495_v27, %v2469_v60  ;;  %v2510_v52 = vadd.f32 %v2495_v27, %v2470_v54  ;;  %v2511_v37 = vadd.f32 %v2495_v27, %v2471_v12  ;;  %v2512_v16 = vadd.f32 %v2495_v27, %v2472_v56  ;;  %2769 = vmatpush.msrb.mxu3 %v2693_v31  ;;  %v2673_v18 = vld [vmem:[%s6449_s10 + $0x140] sm:$0xff]  ;;  %v2659_v49 = vld [vmem:[%s6449_s10 + $0xd0] sm:$0xff]  ;;  %v2672_v3 = vld [vmem:[%s6449_s10 + $0x138] sm:$0xff] }
 0x827   :  { %2748 = vmatpush.msrb.mxu2 %v2675_v8  ;;  %2702 = vmatpush.msrb.mxu0 %v2643_v51  ;;  %v2691_v25 = vld [vmem:[%s6449_s10 + $0x1d0] sm:$0xff]  ;;  %v2642_v60 = vld [vmem:[%s6449_s10 + $0x48] sm:$0xff]  ;;  %v2641_v27 = vld [vmem:[%s6449_s10 + $0x40] sm:$0xff] }
 0x828   :  { %v2525_v34 = vmax.f32 %v2509_v4, 0.0  ;;  %v2526_v58 = vmax.f32 %v2510_v52, 0.0  ;;  %v2527_v17 = vmax.f32 %v2511_v37, 0.0  ;;  %v2528_v30 = vmax.f32 %v2512_v16, 0.0  ;;  %2770 = vmatpush.msrb.mxu3 %v2692_v14  ;;  %2725 = vmatpush.msrb.mxu1 %v2659_v49  ;;  %v2658_v54 = vld [vmem:[%s6449_s10 + $0xc8] sm:$0xff]  ;;  %v2671_v12 = vld [vmem:[%s6449_s10 + $0x130] sm:$0xff] }
 0x829   :  { %v2485_v55 = vpop.permute.xlu1 %2484  ;;  %2749 = vmatpush.msrb.mxu2 %v2674_v7  ;;  %v2690_v56 = vld [vmem:[%s6449_s10 + $0x1c8] sm:$0xff]  ;;  %2703 = vmatpush.msrb.mxu0 %v2642_v60  ;;  %v2657_v4 = vld [vmem:[%s6449_s10 + $0xc0] sm:$0xff]  ;;  %v2640_v16 = vld [vmem:[%s6449_s10 + $0x38] sm:$0xff] }
 0x82a   :  { %v2501_v47 = vadd.f32 %v2485_v55, %v2461_v20  ;;  %v2502_v53 = vadd.f32 %v2485_v55, %v2462_v35  ;;  %v2503_v63 = vadd.f32 %v2485_v55, %v2463_v23  ;;  %v2504_v0 = vadd.f32 %v2485_v55, %v2464_v24  ;;  %2771 = vmatpush.msrb.mxu3 %v2691_v25  ;;  %v2670_v52 = vld [vmem:[%s6449_s10 + $0x128] sm:$0xff]  ;;  %v2689_v37 = vld [vmem:[%s6449_s10 + $0x1c0] sm:$0xff]  ;;  %v2656_v20 = vld [vmem:[%s6449_s10 + $0xb8] sm:$0xff] }
 0x82b   :  { %2750 = vmatpush.msrb.mxu2 %v2673_v18  ;;  %2726 = vmatpush.msrb.mxu1 %v2658_v54  ;;  %v2669_v35 = vld [vmem:[%s6449_s10 + $0x120] sm:$0xff]  ;;  %v2688_v23 = vld [vmem:[%s6449_s10 + $0x1b8] sm:$0xff]  ;;  %v2639_v24 = vld [vmem:[%s6449_s10 + $0x30] sm:$0xff] }
 0x82c   :  { %v2517_v10 = vmax.f32 %v2501_v47, 0.0  ;;  %v2518_v46 = vmax.f32 %v2502_v53, 0.0  ;;  %v2519_v57 = vmax.f32 %v2503_v63, 0.0  ;;  %v2520_v59 = vmax.f32 %v2504_v0, 0.0  ;;  %2772 = vmatpush.msrb.mxu3 %v2690_v56  ;;  %2704 = vmatpush.msrb.mxu0 %v2641_v27  ;;  %v2655_v55 = vld [vmem:[%s6449_s10 + $0xb0] sm:$0xff]  ;;  %v2668_v47 = vld [vmem:[%s6449_s10 + $0x118] sm:$0xff] }
 0x82d   :  { %2751 = vmatpush.msrb.mxu2 %v2672_v3  ;;  %2727 = vmatpush.msrb.mxu1 %v2657_v4  ;;  %v2687_v53 = vld [vmem:[%s6449_s10 + $0x1b0] sm:$0xff]  ;;  %v2638_v63 = vld [vmem:[%s6449_s10 + $0x28] sm:$0xff] }
 0x82e   :  { %v6167_v33 = vmax.f32 %v2517_v10, %v2525_v34  ;;  %v6169_v62 = vmax.f32 %v2518_v46, %v2526_v58  ;;  %v6171_v15 = vmax.f32 %v2519_v57, %v2527_v17  ;;  %v6173_v40 = vmax.f32 %v2520_v59, %v2528_v30  ;;  %2773 = vmatpush.msrb.mxu3 %v2689_v37  ;;  %v2654_v0 = vld [vmem:[%s6449_s10 + $0xa8] sm:$0xff]  ;;  %v2667_v34 = vld [vmem:[%s6449_s10 + $0x110] sm:$0xff]  ;;  %v2637_v17 = vld [vmem:[%s6449_s10 + $0x20] sm:$0xff] }
 0x82f   :  { %2752 = vmatpush.msrb.mxu2 %v2671_v12  ;;  %2705 = vmatpush.msrb.mxu0 %v2640_v16  ;;  %v2686_v58 = vld [vmem:[%s6449_s10 + $0x1a8] sm:$0xff]  ;;  %v2653_v30 = vld [vmem:[%s6449_s10 + $0xa0] sm:$0xff]  ;;  %v2636_v57 = vld [vmem:[%s6449_s10 + $0x18] sm:$0xff] }
 0x830   :  { %v3208_v42 = vpack.i.bf16 %v6173_v40, %v6171_v15  ;;  %v3203_v26 = vpack.i.bf16 %v6169_v62, %v6167_v33  ;;  %2728 = vmatpush.msrb.mxu1 %v2656_v20  ;;  %2774 = vmatpush.msrb.mxu3 %v2688_v23  ;;  %v2666_v10 = vld [vmem:[%s6449_s10 + $0x108] sm:$0xff]  ;;  %v2685_v46 = vld [vmem:[%s6449_s10 + $0x1a0] sm:$0xff]  ;;  %v2652_v59 = vld [vmem:[%s6449_s10 + $0x98] sm:$0xff] }
 0x831   :  { %2753 = vmatpush.msrb.mxu2 %v2670_v52  ;;  %2706 = vmatpush.msrb.mxu0 %v2639_v24 }
 0x832   :  { %3209 = vrot.lane.b32.xlu1 %v3208_v42, %s3405_s3  ;;  %3199 = vrot.lane.b32.xlu0 %v3208_v42, %s3403_s27 }
 0x833   :  { %3204 = vrot.lane.b32.xlu2 %v3203_v26, %s3403_s27  ;;  %2754 = vmatpush.msrb.mxu2 %v2669_v35 }
 0x834   :  { %2729 = vmatpush.msrb.mxu1 %v2655_v55  ;;  %2775 = vmatpush.msrb.mxu3 %v2687_v53 }
 0x835   :  { %2755 = vmatpush.msrb.mxu2 %v2668_v47  ;;  %2707 = vmatpush.msrb.mxu0 %v2638_v63 }
 0x836   :  { %2730 = vmatpush.msrb.mxu1 %v2654_v0  ;;  %2776 = vmatpush.msrb.mxu3 %v2686_v58 }
 0x837   :  { %2756 = vmatpush.msrb.mxu2 %v2667_v34  ;;  %2708 = vmatpush.msrb.mxu0 %v2637_v17 }
 0x838   :  { %2731 = vmatpush.msrb.mxu1 %v2653_v30  ;;  %2777 = vmatpush.msrb.mxu3 %v2685_v46 }
 0x839   :  { %2757 = vmatpush.msrb.mxu2 %v2666_v10  ;;  %2709 = vmatpush.msrb.mxu0 %v2636_v57 }
 0x83a   :  { %3224 = vrot.lane.b32.xlu1 %v3203_v26, %s3406_s4  ;;  %3214 = vrot.lane.b32.xlu0 %v3203_v26, %s3405_s3  ;;  %v2684_v26 = vld [vmem:[%s6449_s10 + $0x198] sm:$0xff] }
 0x83b   :  { %3219 = vrot.lane.b32.xlu2 %v3208_v42, %s3406_s4  ;;  %v2665_v42 = vld [vmem:[%s6449_s10 + $0x100] sm:$0xff]  ;;  %2732 = vmatpush.msrb.mxu1 %v2652_v59 }
 0x83c   :  { %2758 = vmatpush.msrb.mxu2 %v2665_v42  ;;  %2778 = vmatpush.msrb.mxu3 %v2684_v26 }
 0x83d   :  { %2710 = vmatpush.msrb.mxu0 %v2635_v45  ;;  %2733 = vmatpush.msrb.mxu1 %v2651_v28 }
 0x83e   :  { %2779 = vmatpush.msrb.mxu3 %v2683_v1 }
 0x83f   :  { %2711 = vmatpush.msrb.mxu0 %v2634_v29  ;;  %2734 = vmatpush.msrb.mxu1 %v2650_v61 }
 0x840   :  { %2780 = vmatpush.msrb.mxu3 %v2682_v5 }
 0x841   :  { %2712 = vmatpush.msrb.mxu0 %v2633_v41  ;;  %2735 = vmatpush.msrb.mxu1 %v2649_v44 }
 0x842   :  { %2781 = vmatpush.msrb.mxu3 %v2681_v32 }
 0x868   :  { %v3175_v38 = vpop.permute.xlu2 %3174 }
 0x869   :  { %v3177_v2 = vunpack.i.h.bf16 %v3175_v38  ;;  %v3176_v31 = vunpack.i.l.bf16 %v3175_v38 }
 0x86b   :  { %v2557_v54 = vsel %vm279_vm0, %v3176_v31, %v3177_v2 }
 0x86c   :  { %v2561_v16 = vmax.f32 %v6141_v6, %v2557_v54 }
 0x870   :  { %v3190_v21 = vpop.permute.xlu2 %3189 }
 0x871   :  { %v3192_v8 = vunpack.i.h.bf16 %v3190_v21  ;;  %v3191_v14 = vunpack.i.l.bf16 %v3190_v21 }
 0x873   :  { %v2617_v12 = vsel %vm1565_vm11, %v3191_v14, %v3192_v8 }
 0x880   :  { %v3185_v22 = vpop.permute.xlu0 %3184 }
 0x881   :  { %v3170_v48 = vpop.permute.xlu1 %3169  ;;  %v3187_v49 = vunpack.i.h.bf16 %v3185_v22  ;;  %v3186_v3 = vunpack.i.l.bf16 %v3185_v22 }
 0x882   :  { %v3172_v36 = vunpack.i.h.bf16 %v3170_v48  ;;  %v3171_v13 = vunpack.i.l.bf16 %v3170_v48 }
 0x884   :  { %v2553_v9 = vsel %vm279_vm0, %v3171_v13, %v3172_v36  ;;  %v2559_v56 = vsel %vm279_vm0, %v3172_v36, %v3176_v31  ;;  %v2555_v27 = vsel %vm279_vm0, %v3177_v2, %v3171_v13 }
 0x885   :  { %v2563_v51 = vmax.f32 %v6145_v39, %v2553_v9  ;;  %v2589_v39 = vsel %vm1436_vm10, %v3186_v3, %v3187_v49  ;;  %v2564_v20 = vmax.f32 %v6147_v43, %v2559_v56  ;;  %v2562_v35 = vmax.f32 %v6143_v50, %v2555_v27 }
 0x886   :  { %v2593_v47 = vmax.f32 %v2561_v16, %v2589_v39 }
 0x889   :  { %v3180_v11 = vpop.permute.xlu1 %3179 }
 0x88a   :  { %v3182_v7 = vunpack.i.h.bf16 %v3180_v11  ;;  %v3181_v18 = vunpack.i.l.bf16 %v3180_v11 }
 0x88c   :  { %v2585_v25 = vsel %vm1436_vm10, %v3181_v18, %v3182_v7  ;;  %v2587_v52 = vsel %vm1436_vm10, %v3187_v49, %v3181_v18  ;;  %v2591_v37 = vsel %vm1436_vm10, %v3182_v7, %v3186_v3 }
 0x88d   :  { %v2595_v60 = vmax.f32 %v2563_v51, %v2585_v25  ;;  %v2594_v53 = vmax.f32 %v2562_v35, %v2587_v52  ;;  %v2596_v63 = vmax.f32 %v2564_v20, %v2591_v37  ;;  %v3205_v50 = vpop.permute.xlu2 %3204 }
 0x88e   :  { %v3207_v45 = vunpack.i.h.bf16 %v3205_v50  ;;  %v3206_v28 = vunpack.i.l.bf16 %v3205_v50 }
 0x88f   :  { %v2627_v4 = vmax.f32 %v2595_v60, %v2617_v12 }
 0x890   :  { %v2558_v32 = vsel %vm279_vm0, %v3206_v28, %v3207_v45 }
 0x891   :  { %v3195_v23 = vpop.permute.xlu1 %3194  ;;  %2759 = vmatmul.f32.vlgmr.msrb.gmra.mxu2 %v2627_v4  ;;  %v2565_v11 = vmax.f32 %v6167_v33, %v2558_v32 }
 0x892   :  { %v3197_v24 = vunpack.i.h.bf16 %v3195_v23  ;;  %v3196_v55 = vunpack.i.l.bf16 %v3195_v23 }
 0x894   :  { %v2619_v0 = vsel %vm1565_vm11, %v3197_v24, %v3191_v14  ;;  %v2621_v34 = vsel %vm1565_vm11, %v3196_v55, %v3197_v24  ;;  %v2623_v6 = vsel %vm1565_vm11, %v3192_v8, %v3196_v55 }
 0x895   :  { %v2625_v58 = vmax.f32 %v2593_v47, %v2621_v34  ;;  %v2626_v43 = vmax.f32 %v2594_v53, %v2619_v0  ;;  %v2628_v17 = vmax.f32 %v2596_v63, %v2623_v6  ;;  %v3220_v30 = vpop.permute.xlu2 %3219 }
 0x896   :  { %v3222_v1 = vunpack.i.h.bf16 %v3220_v30  ;;  %v3221_v29 = vunpack.i.l.bf16 %v3220_v30 }
 0x897   :  { %2713 = vmatmul.f32.vlgmr.msrb.gmra.mxu0 %v2625_v58  ;;  %2736 = vmatmul.f32.vlgmr.msrb.gmra.mxu1 %v2626_v43 }
 0x898   :  { %2782 = vmatmul.f32.vlgmr.msrb.gmra.mxu3 %v2628_v17  ;;  %v2618_v36 = vsel %vm1565_vm11, %v3221_v29, %v3222_v1 }
 0x8a4   :  { %v3210_v10 = vpop.permute.xlu1 %3209  ;;  %v3200_v46 = vpop.permute.xlu0 %3199 }
 0x8a5   :  { %v3212_v57 = vunpack.i.h.bf16 %v3210_v10  ;;  %v3211_v59 = vunpack.i.l.bf16 %v3210_v10  ;;  %v3202_v42 = vunpack.i.h.bf16 %v3200_v46  ;;  %v3201_v26 = vunpack.i.l.bf16 %v3200_v46 }
 0x8a7   :  { %v2554_v61 = vsel %vm279_vm0, %v3201_v26, %v3202_v42  ;;  %v2586_v41 = vsel %vm1436_vm10, %v3211_v59, %v3212_v57  ;;  %v2560_v38 = vsel %vm279_vm0, %v3202_v42, %v3206_v28  ;;  %v2556_v48 = vsel %vm279_vm0, %v3207_v45, %v3201_v26 }
 0x8a8   :  { %v2567_v5 = vmax.f32 %v6171_v15, %v2554_v61  ;;  %v2568_v8 = vmax.f32 %v6173_v40, %v2560_v38  ;;  %v2566_v14 = vmax.f32 %v6169_v62, %v2556_v48 }
 0x8aa   :  { %v2599_v44 = vmax.f32 %v2567_v5, %v2586_v41 }
 0x8ac   :  { %v3225_v13 = vpop.permute.xlu1 %3224  ;;  %v3215_v21 = vpop.permute.xlu0 %3214  ;;  %v2631_v9 = vmax.f32 %v2599_v44, %v2618_v36 }
 0x8ad   :  { %v3227_v15 = vunpack.i.h.bf16 %v3225_v13  ;;  %v3226_v2 = vunpack.i.l.bf16 %v3225_v13  ;;  %v3217_v31 = vunpack.i.h.bf16 %v3215_v21  ;;  %v3216_v22 = vunpack.i.l.bf16 %v3215_v21 }
 0x8ae   :  { %2762 = vmatmul.f32.gmra.mxu2 %v2631_v9 }
 0x8af   :  { %v2588_v7 = vsel %vm1436_vm10, %v3217_v31, %v3211_v59  ;;  %v2590_v18 = vsel %vm1436_vm10, %v3216_v22, %v3217_v31  ;;  %v2592_v51 = vsel %vm1436_vm10, %v3212_v57, %v3216_v22  ;;  %v2622_v33 = vsel %vm1565_vm11, %v3226_v2, %v3227_v15 }
 0x8b0   :  { %v2597_v49 = vmax.f32 %v2565_v11, %v2590_v18  ;;  %v2598_v3 = vmax.f32 %v2566_v14, %v2588_v7  ;;  %v2600_v25 = vmax.f32 %v2568_v8, %v2592_v51  ;;  %v2620_v40 = vsel %vm1565_vm11, %v3227_v15, %v3221_v29 }
 0x8b1   :  { %v2624_v62 = vsel %vm1565_vm11, %v3222_v1, %v3226_v2 }
 0x8b2   :  { %v2629_v60 = vmax.f32 %v2597_v49, %v2622_v33  ;;  %v2630_v54 = vmax.f32 %v2598_v3, %v2620_v40  ;;  %v2632_v12 = vmax.f32 %v2600_v25, %v2624_v62 }
 0x8b4   :  { %2716 = vmatmul.f32.gmra.mxu0 %v2629_v60  ;;  %2739 = vmatmul.f32.gmra.mxu1 %v2630_v54 }
 0x8b5   :  { %2785 = vmatmul.f32.gmra.mxu3 %v2632_v12 }
 0x914   :  { %v2714_v56 = vpop.f32.mrf.mxu0  ;;  %v2737_v27 = vpop.f32.mrf.mxu1 }
 0x915   :  { %v2738_v4 = vadd.f32 %v2737_v27, %v2714_v56  ;;  %v2760_v39 = vpop.f32.mrf.mxu2 }
 0x917   :  { %v2761_v52 = vadd.f32 %v2760_v39, %v2738_v4 }
 0x91b   :  { %v2783_v37 = vpop.f32.mrf.mxu3 }
 0x91c   :  { %v2784_v16 = vadd.f32 %v2783_v37, %v2761_v52 }
 0x91e   :  { %2789 = vst [vmem:[%s6450_s11] sm:$0xff] %v2784_v16 }
 0x931   :  { %v2717_v20 = vpop.f32.mrf.mxu0  ;;  %v2740_v19 = vpop.f32.mrf.mxu1 }
 0x932   :  { %v2741_v35 = vadd.f32 %v2740_v19, %v2717_v20  ;;  %v2763_v23 = vpop.f32.mrf.mxu2 }
 0x934   :  { %v2764_v24 = vadd.f32 %v2763_v23, %v2741_v35 }
 0x938   :  { %v2786_v55 = vpop.f32.mrf.mxu3 }
 0x939   :  { %v2787_v47 = vadd.f32 %v2786_v55, %v2764_v24 }
 0x93b   :  { %2790 = vst [vmem:[%s6450_s11 + $0x8] sm:$0xff] %v2787_v47 }
 0x93c   :  { %2795 = vsyncpa [#allocation3], 1 }
 0x93d   :  { %2796 = vsyncpa [#allocation5], 1 }
 0x93e   :  { %2797 = vsyncpa [#allocation8], 1 }

</bundles_post_ra>
